<compile_context>
chip_gen: v6e
topology: v6e:2x2x1
jax: 0.10.0
libtpu: 0.0.40
codegen_flags: <defaults>
</compile_context>

<pallas_src>
import functools

import jax
import jax.numpy as jnp
from jax.experimental import pallas as pl
from jax.experimental.pallas import tpu as pltpu

XI = 10.0
EPI = 6.0
IP = 1
NUM_CLASSES = 4      # softDiceLoss(4)
NUM_HEADS = 2        # the model returns a list of 2 head outputs
SMOOTH = 1e-10
L2_EPS = 1e-8
LANES = 128


# ----------------------------------------------------------------------------
# In-kernel helper (traced Python, fully unrolled: C = K = 4, H = 2)
# ----------------------------------------------------------------------------
def _heads_softmax(ch, w_ref, b_ref, *, n_in, n_cls, n_heads, approx_recip):
    """ch: list of n_in dense (tile_rows, 128) slabs.

    Returns probs[h][k] as (tile_rows, 128) slabs, softmax over k.  The 4x4
    1x1-conv channel mix is done with SMEM-scalar broadcast FMAs on the VPU
    (no MXU for such tiny matrices)."""
    probs = []
    for h in range(n_heads):
        logits = []
        for k in range(n_cls):
            base = (h * n_cls + k) * n_in
            l = w_ref[base] * ch[0]
            for c in range(1, n_in):
                l = l + w_ref[base + c] * ch[c]
            logits.append(l + b_ref[h * n_cls + k])
        m = logits[0]
        for k in range(1, n_cls):
            m = jnp.maximum(m, logits[k])
        exps = [jnp.exp(l - m) for l in logits]
        ssum = exps[0]
        for k in range(1, n_cls):
            ssum = ssum + exps[k]
        if approx_recip:
            inv = pl.reciprocal(ssum, approx=True)     # EUP slot
        else:
            inv = 1.0 / ssum                           # exact (feeds the loss)
        probs.append([e * inv for e in exps])
    return probs


# ----------------------------------------------------------------------------
# Kernel 1: stats pass — x' = x + scale_row*dir (fused axpy + l2-scale), heads
# softmax for BOTH x' (p) and x (q, pred recomputed in-register), and row-wise
# accumulation of the pairwise dice partial sums:
#   rows [0, HK)        : Z[h,c]    = sum p_h[c]^2
#   rows [HK, HK+PK)    : I[pair,c] = sum p_i[c]*q_j[c]
#   rows [HK+PK, ...)   : Y[h,c]    = sum q_h[c]^2   (first call only, hoisted)
# ----------------------------------------------------------------------------
def _stats_kernel(x_ref, dir_ref, scale_ref, w_ref, b_ref, stats_ref,
                  *, n_in, n_cls, n_heads, pairs, include_y):
    @pl.when(pl.program_id(1) == 0)
    def _init():
        stats_ref[...] = jnp.zeros_like(stats_ref)

    s = scale_ref[...]                              # (tile_rows, 1), lane-bcast
    xch = [x_ref[c] for c in range(n_in)]
    ach = [xch[c] + s * dir_ref[c] for c in range(n_in)]
    p = _heads_softmax(ach, w_ref, b_ref, n_in=n_in, n_cls=n_cls,
                       n_heads=n_heads, approx_recip=False)
    q = _heads_softmax(xch, w_ref, b_ref, n_in=n_in, n_cls=n_cls,
                       n_heads=n_heads, approx_recip=False)

    r = 0
    for h in range(n_heads):                        # Z
        for k in range(n_cls):
            stats_ref[r] = stats_ref[r] + p[h][k] * p[h][k]
            r += 1
    for (i, j) in pairs:                            # I
        for k in range(n_cls):
            stats_ref[r] = stats_ref[r] + p[i][k] * q[j][k]
            r += 1
    if include_y:                                   # Y (hoisted after 1st call)
        for h in range(n_heads):
            for k in range(n_cls):
                stats_ref[r] = stats_ref[r] + q[h][k] * q[h][k]
                r += 1


# ----------------------------------------------------------------------------
# Kernel 2: analytic gradient of the pairwise soft-Dice adv distance w.r.t. the
# normalized perturbation d (dice -> softmax -> 1x1-conv backward, all VPU FMAs;
# p and q recomputed in-register from the streamed x).
# ----------------------------------------------------------------------------
def _grad_kernel(x_ref, dir_ref, scale_ref, w_ref, b_ref, ca_ref, cb_ref,
                 g_ref, *, n_in, n_cls, n_heads, pairs):
    s = scale_ref[...]
    xch = [x_ref[c] for c in range(n_in)]
    ach = [xch[c] + s * dir_ref[c] for c in range(n_in)]
    p = _heads_softmax(ach, w_ref, b_ref, n_in=n_in, n_cls=n_cls,
                       n_heads=n_heads, approx_recip=True)
    q = _heads_softmax(xch, w_ref, b_ref, n_in=n_in, n_cls=n_cls,
                       n_heads=n_heads, approx_recip=True)

    # dL/dp_i[c] = cb[i,c]*p_i[c] + sum_{pairs (i,j)} ca[pair,c]*q_j[c]
    # (the xi chain-rule factor is folded into ca/cb on the host)
    g = [[cb_ref[i * n_cls + k] * p[i][k] for k in range(n_cls)]
         for i in range(n_heads)]
    for pidx, (i, j) in enumerate(pairs):
        for k in range(n_cls):
            g[i][k] = g[i][k] + ca_ref[pidx * n_cls + k] * q[j][k]

    # softmax backward: dlogit = p * (g - sum_c p*g)
    for i in range(n_heads):
        dot = p[i][0] * g[i][0]
        for k in range(1, n_cls):
            dot = dot + p[i][k] * g[i][k]
        for k in range(n_cls):
            g[i][k] = p[i][k] * (g[i][k] - dot)

    # 1x1-conv backward: one dense slab store per input channel.
    for c in range(n_in):
        acc = None
        for i in range(n_heads):
            for k in range(n_cls):
                term = w_ref[(i * n_cls + k) * n_in + c] * g[i][k]
                acc = term if acc is None else acc + term
        g_ref[c] = acc


# ----------------------------------------------------------------------------
# pallas_call wrappers
# ----------------------------------------------------------------------------
def _smem_spec():
    return pl.BlockSpec(memory_space=pltpu.MemorySpace.SMEM)


def _pick_tile_rows(total_rows):
    """Rows of 128 lanes per grid step (up to 16K lanes per tile)."""
    if total_rows <= 64:                 # whole problem fits in one tile
        return total_rows
    for cand in (128, 64, 56, 48, 40, 32, 24, 16, 8):
        if total_rows % cand == 0:
            return cand
    # TODO(synk): ragged row counts would need a tail tile + in-kernel masking.
    raise ValueError("N*H*W/128 must be divisible by a multiple of 8")


def stats_pass(x_slab, dir_slab, scale_rows, w_flat, b_flat, *,
               n_cls, n_heads, pairs, tile_rows, include_y):
    n_in, total_rows, _ = x_slab.shape
    num_tiles = total_rows // tile_rows
    # v7x: split the reduction across both TensorCores via a leading "parallel"
    # axis with per-core partial accumulators (no-op on single-TC v5e/v6e).
    num_cores = 2 if (num_tiles >= 2 and num_tiles % 2 == 0) else 1
    tpc = num_tiles // num_cores
    n_stat = (n_heads + len(pairs) + (n_heads if include_y else 0)) * n_cls

    kern = functools.partial(_stats_kernel, n_in=n_in, n_cls=n_cls,
                             n_heads=n_heads, pairs=pairs, include_y=include_y)

    def in_map(p, t):
        return (0, p * tpc + t, 0)

    partial_sums = pl.pallas_call(
        kern,
        out_shape=jax.ShapeDtypeStruct(
            (num_cores, n_stat, tile_rows, LANES), jnp.float32),
        grid=(num_cores, tpc),
        in_specs=[pl.BlockSpec((n_in, tile_rows, LANES), in_map),
                  pl.BlockSpec((n_in, tile_rows, LANES), in_map),
                  pl.BlockSpec((tile_rows, 1), lambda p, t: (p * tpc + t, 0)),
                  _smem_spec(), _smem_spec()],
        out_specs=pl.BlockSpec((None, n_stat, tile_rows, LANES),
                               lambda p, t: (p, 0, 0, 0)),
        compiler_params=pltpu.CompilerParams(
            dimension_semantics=("parallel", "arbitrary")),
    )(x_slab, dir_slab, scale_rows, w_flat, b_flat)

    sums = jnp.sum(partial_sums, axis=(0, 2, 3))          # tiny JAX finalize
    hk = n_heads * n_cls
    pk = len(pairs) * n_cls
    z = sums[:hk].reshape(n_heads, n_cls)
    inter = sums[hk:hk + pk].reshape(len(pairs), n_cls)
    y = sums[hk + pk:].reshape(n_heads, n_cls) if include_y else None
    return z, inter, y


def grad_pass(x_slab, dir_slab, scale_rows, coef_a, coef_b, w_flat, b_flat, *,
              n_cls, n_heads, pairs, tile_rows):
    n_in, total_rows, _ = x_slab.shape
    num_tiles = total_rows // tile_rows
    kern = functools.partial(_grad_kernel, n_in=n_in, n_cls=n_cls,
                             n_heads=n_heads, pairs=pairs)
    return pl.pallas_call(
        kern,
        out_shape=jax.ShapeDtypeStruct((n_in, total_rows, LANES), jnp.float32),
        grid=(num_tiles,),
        in_specs=[pl.BlockSpec((n_in, tile_rows, LANES), lambda t: (0, t, 0)),
                  pl.BlockSpec((n_in, tile_rows, LANES), lambda t: (0, t, 0)),
                  pl.BlockSpec((tile_rows, 1), lambda t: (t, 0)),
                  _smem_spec(), _smem_spec(), _smem_spec(), _smem_spec()],
        out_specs=pl.BlockSpec((n_in, tile_rows, LANES), lambda t: (0, t, 0)),
        compiler_params=pltpu.CompilerParams(
            dimension_semantics=("parallel",)),
    )(x_slab, dir_slab, scale_rows, w_flat, b_flat, coef_a, coef_b)


# ----------------------------------------------------------------------------
# JAX-side glue (tiny scalar / per-sample work only)
# ----------------------------------------------------------------------------
def _pack_params(params):
    wt = jnp.stack([jnp.transpose(w) for (w, _) in params])   # (H, K, C)
    bt = jnp.stack([b for (_, b) in params])                  # (H, K)
    return (wt.reshape(-1).astype(jnp.float32),
            bt.reshape(-1).astype(jnp.float32))


def _inv_sample_norm(v_slab, n_batch, hw):
    c = v_slab.shape[0]
    ss = jnp.sum(jnp.square(v_slab.reshape(c, n_batch, hw)), axis=(0, 2))
    return (1.0 / (jnp.sqrt(ss) + L2_EPS)).astype(jnp.float32)


def _scale_rows(inv_norm, factor, hw):
    # One scalar per 128-lane row; rows never straddle samples (hw % 128 == 0).
    return (factor * jnp.repeat(inv_norm, hw // LANES))[:, None]


def _dice_from_stats(z, y, inter, pairs):
    loss = jnp.float32(0.0)
    for pidx, (i, j) in enumerate(pairs):
        dice = (2.0 * inter[pidx] + SMOOTH) / (z[i] + y[j] + SMOOTH)
        loss = loss + jnp.mean(1.0 - dice)
    return loss


def _grad_coefs(z, y, inter, pairs, n_cls, n_heads, xi):
    # dL/dp_i[c,m] = coef_a[pair,c]*q_j[c,m] + coef_b[i,c]*p_i[c,m]; the xi
    # chain-rule factor of x + xi*d_norm is folded in here (host scalars).
    coef_a = []
    coef_b = [jnp.zeros((n_cls,), jnp.float32) for _ in range(n_heads)]
    for pidx, (i, j) in enumerate(pairs):
        denom = z[i] + y[j] + SMOOTH
        numer = 2.0 * inter[pidx] + SMOOTH
        coef_a.append(-2.0 * xi / (n_cls * denom))
        coef_b[i] = coef_b[i] + 2.0 * xi * numer / (n_cls * denom * denom)
    return (jnp.concatenate(coef_a).astype(jnp.float32),
            jnp.concatenate(coef_b).astype(jnp.float32))


@jax.jit
def vat2d_v2_forward(model_params, x_nchw, key):
    n_batch, n_in, img_h, img_w = x_nchw.shape
    hw = img_h * img_w
    m = n_batch * hw
    n_heads = len(model_params)
    n_cls = NUM_CLASSES
    pairs = tuple((i, j) for i in range(n_heads)
                  for j in range(n_heads) if i != j)

    assert hw % LANES == 0, "H*W must be a multiple of 128 (see TODO)"
    total_rows = m // LANES
    tile_rows = _pick_tile_rows(total_rows)

    # channels-first, sublane-dense slabs: (C, M//128, 128)
    x_slab = jnp.transpose(x_nchw, (1, 0, 2, 3)).reshape(
        n_in, total_rows, LANES).astype(jnp.float32)
    w_flat, b_flat = _pack_params(model_params)

    # d = U(-0.5, 0.5); only the per-sample 1/(||d||+eps) scalars are computed
    # here — the x + scale*d axpy itself stays fused inside the kernels.
    d_slab = jax.random.uniform(key, (n_in, m), jnp.float32, -0.5, 0.5)
    d_slab = d_slab.reshape(n_in, total_rows, LANES)
    inv_norm = _inv_sample_norm(d_slab, n_batch, hw)

    y_stat = None
    for _ in range(IP):
        srows = _scale_rows(inv_norm, XI, hw)
        z, inter, y_new = stats_pass(x_slab, d_slab, srows, w_flat, b_flat,
                                     n_cls=n_cls, n_heads=n_heads, pairs=pairs,
                                     tile_rows=tile_rows,
                                     include_y=(y_stat is None))
        if y_stat is None:
            y_stat = y_new
        coef_a, coef_b = _grad_coefs(z, y_stat, inter, pairs, n_cls, n_heads,
                                     XI)
        d_slab = grad_pass(x_slab, d_slab, srows, coef_a, coef_b, w_flat,
                           b_flat, n_cls=n_cls, n_heads=n_heads, pairs=pairs,
                           tile_rows=tile_rows)
        inv_norm = _inv_sample_norm(d_slab, n_batch, hw)

    # Final adversarial pass: x_adv = x + epi*d_norm stays fused in the stats
    # kernel; Y is reused from the first pass.
    srows = _scale_rows(inv_norm, EPI, hw)
    z, inter, y_new = stats_pass(x_slab, d_slab, srows, w_flat, b_flat,
                                 n_cls=n_cls, n_heads=n_heads, pairs=pairs,
                                 tile_rows=tile_rows,
                                 include_y=(y_stat is None))
    if y_stat is None:
        y_stat = y_new
    return _dice_from_stats(z, y_stat, inter, pairs)


# ----------------------------------------------------------------------------
# Synthetic deterministic multi-head "model": 2 heads, each a 1x1 conv C -> 4.
# ----------------------------------------------------------------------------
def make_head_params(base_key, cin, cout, num_heads):
    params = []
    for h in range(num_heads):
        kw, kb = jax.random.split(jax.random.fold_in(base_key, h))
        w = 0.5 * jax.random.normal(kw, (cin, cout), jnp.float32)
        b = 0.1 * jax.random.normal(kb, (cout,), jnp.float32)
        params.append((w, b))
    return params


# ----------------------------------------------------------------------------
# Pure-JAX reference (jax.grad power iteration) — validation only.
# ----------------------------------------------------------------------------
def _reference_forward(model_params, x_nchw, key):
    n_batch, n_in, img_h, img_w = x_nchw.shape
    m = n_batch * img_h * img_w
    x = jnp.transpose(x_nchw, (1, 0, 2, 3)).reshape(n_in, m)

    def heads(xcm):
        outs = []
        for (w, b) in model_params:
            logits = jnp.einsum("ck,cm->km", w, xcm,
                                precision=jax.lax.Precision.HIGHEST)
            outs.append(jax.nn.softmax(logits + b[:, None], axis=0))
        return outs

    def dice(p, q):
        inter = jnp.sum(p * q, axis=1)
        z = jnp.sum(p * p, axis=1)
        y = jnp.sum(q * q, axis=1)
        return jnp.mean(1.0 - (2.0 * inter + SMOOTH) / (z + y + SMOOTH))

    def pairwise(ps, qs):
        tot = 0.0
        for i in range(len(ps)):
            for j in range(len(qs)):
                if i != j:
                    tot = tot + dice(ps[i], qs[j])
        return tot

    def l2n(v):
        vr = v.reshape(n_in, n_batch, -1)
        nrm = jnp.sqrt(jnp.sum(vr * vr, axis=(0, 2)))
        return (vr / (nrm[None, :, None] + L2_EPS)).reshape(n_in, m)

    pred = [jax.lax.stop_gradient(p) for p in heads(x)]
    d = l2n(jax.random.uniform(key, (n_in, m), jnp.float32, -0.5, 0.5))
    for _ in range(IP):
        g = jax.grad(lambda dd: pairwise(heads(x + XI * dd), pred))(d)
        d = l2n(g)
    return pairwise(heads(x + EPI * d), pred)


if __name__ == "__main__":
    key = jax.random.PRNGKey(0)
    kx, kd, kp = jax.random.split(key, 3)

    N, C, H, W = 2, 4, 16, 16
    x = jax.random.normal(kx, (N, C, H, W), jnp.float32)
    model_params = make_head_params(kp, C, NUM_CLASSES, NUM_HEADS)

    lds = vat2d_v2_forward(model_params, x, kd)
    jax.block_until_ready(lds)
    assert lds.shape == ()
    assert bool(jnp.isfinite(lds))

    lds_ref = _reference_forward(model_params, x, kd)
    err = abs(float(lds) - float(lds_ref))
    assert err <= 1e-3 * max(1.0, abs(float(lds_ref))), (float(lds),
                                                         float(lds_ref))
    print("KERNEL_OK")
</pallas_src>

<mosaic_0001>
module attributes {stable_mosaic.version = 11 : i64} {
  func.func @_stats_kernel(%arg0: i32, %arg1: i32, %arg2: memref<4x4x128xf32, #tpu.memory_space<vmem>>, %arg3: memref<4x4x128xf32, #tpu.memory_space<vmem>>, %arg4: memref<4x1xf32, #tpu.memory_space<vmem>>, %arg5: memref<32xf32, #tpu.memory_space<smem>>, %arg6: memref<8xf32, #tpu.memory_space<smem>>, %arg7: memref<1x24x4x128xf32, #tpu.memory_space<vmem>>) attributes {dimension_semantics = [#tpu.dimension_semantics<parallel>, #tpu.dimension_semantics<arbitrary>], iteration_bounds = array<i64: 1, 1>, scalar_prefetch = 0 : i64, scratch_operands = 0 : i64, tpu.core_type = #tpu.core_type<tc>, window_params = [{transform_indices = @transform_0, window_bounds = array<i64: 4, 4, 128>}, {transform_indices = @transform_1, window_bounds = array<i64: 4, 4, 128>}, {transform_indices = @transform_2, window_bounds = array<i64: 4, 1>}, {transform_indices = @transform_3, window_bounds = array<i64: 32>}, {transform_indices = @transform_4, window_bounds = array<i64: 8>}, {transform_indices = @transform_5, window_bounds = array<i64: 1, 24, 4, 128>}]} {
    %c0_i32 = arith.constant 0 : i32
    %0 = arith.cmpi eq, %arg1, %c0_i32 : i32
    %1 = arith.extui %0 : i1 to i32
    %c0_i32_0 = arith.constant 0 : i32
    %2 = arith.cmpi ne, %1, %c0_i32_0 : i32
    scf.if %2 {
      %cst_270 = arith.constant 0.000000e+00 : f32
      %568 = vector.broadcast %cst_270 : f32 to vector<24x4x128xf32>
      %c0_271 = arith.constant 0 : index
      %c0_272 = arith.constant 0 : index
      %c0_273 = arith.constant 0 : index
      %c0_274 = arith.constant 0 : index
      %569 = vector.load %arg7[%c0_271, %c0_272, %c0_273, %c0_274] : memref<1x24x4x128xf32, #tpu.memory_space<vmem>>, vector<1x24x4x128xf32>
      %570 = vector.shape_cast %569 : vector<1x24x4x128xf32> to vector<24x4x128xf32>
      %571 = vector.shape_cast %568 : vector<24x4x128xf32> to vector<1x24x4x128xf32>
      tpu.vector_store %arg7[%c0_271, %c0_272, %c0_273, %c0_274], %571 {strides = array<i32>} : memref<1x24x4x128xf32, #tpu.memory_space<vmem>>, vector<1x24x4x128xf32>,
    } else {
    }
    %c0 = arith.constant 0 : index
    %c0_1 = arith.constant 0 : index
    %3 = vector.load %arg4[%c0, %c0_1] : memref<4x1xf32, #tpu.memory_space<vmem>>, vector<4x1xf32>
    %c0_2 = arith.constant 0 : index
    %c0_3 = arith.constant 0 : index
    %c0_4 = arith.constant 0 : index
    %4 = vector.load %arg2[%c0_2, %c0_3, %c0_4] : memref<4x4x128xf32, #tpu.memory_space<vmem>>, vector<1x4x128xf32>
    %5 = vector.shape_cast %4 : vector<1x4x128xf32> to vector<4x128xf32>
    %c1 = arith.constant 1 : index
    %c0_5 = arith.constant 0 : index
    %c0_6 = arith.constant 0 : index
    %6 = vector.load %arg2[%c1, %c0_5, %c0_6] : memref<4x4x128xf32, #tpu.memory_space<vmem>>, vector<1x4x128xf32>
    %7 = vector.shape_cast %6 : vector<1x4x128xf32> to vector<4x128xf32>
    %c2 = arith.constant 2 : index
    %c0_7 = arith.constant 0 : index
    %c0_8 = arith.constant 0 : index
    %8 = vector.load %arg2[%c2, %c0_7, %c0_8] : memref<4x4x128xf32, #tpu.memory_space<vmem>>, vector<1x4x128xf32>
    %9 = vector.shape_cast %8 : vector<1x4x128xf32> to vector<4x128xf32>
    %c3 = arith.constant 3 : index
    %c0_9 = arith.constant 0 : index
    %c0_10 = arith.constant 0 : index
    %10 = vector.load %arg2[%c3, %c0_9, %c0_10] : memref<4x4x128xf32, #tpu.memory_space<vmem>>, vector<1x4x128xf32>
    %11 = vector.shape_cast %10 : vector<1x4x128xf32> to vector<4x128xf32>
    %c0_11 = arith.constant 0 : index
    %c0_12 = arith.constant 0 : index
    %c0_13 = arith.constant 0 : index
    %12 = vector.load %arg3[%c0_11, %c0_12, %c0_13] : memref<4x4x128xf32, #tpu.memory_space<vmem>>, vector<1x4x128xf32>
    %13 = vector.shape_cast %12 : vector<1x4x128xf32> to vector<4x128xf32>
    %14 = vector.broadcast %3 : vector<4x1xf32> to vector<4x128xf32>
    %15 = arith.mulf %14, %13 : vector<4x128xf32>
    %16 = arith.addf %5, %15 : vector<4x128xf32>
    %c1_14 = arith.constant 1 : index
    %c0_15 = arith.constant 0 : index
    %c0_16 = arith.constant 0 : index
    %17 = vector.load %arg3[%c1_14, %c0_15, %c0_16] : memref<4x4x128xf32, #tpu.memory_space<vmem>>, vector<1x4x128xf32>
    %18 = vector.shape_cast %17 : vector<1x4x128xf32> to vector<4x128xf32>
    %19 = vector.broadcast %3 : vector<4x1xf32> to vector<4x128xf32>
    %20 = arith.mulf %19, %18 : vector<4x128xf32>
    %21 = arith.addf %7, %20 : vector<4x128xf32>
    %c2_17 = arith.constant 2 : index
    %c0_18 = arith.constant 0 : index
    %c0_19 = arith.constant 0 : index
    %22 = vector.load %arg3[%c2_17, %c0_18, %c0_19] : memref<4x4x128xf32, #tpu.memory_space<vmem>>, vector<1x4x128xf32>
    %23 = vector.shape_cast %22 : vector<1x4x128xf32> to vector<4x128xf32>
    %24 = vector.broadcast %3 : vector<4x1xf32> to vector<4x128xf32>
    %25 = arith.mulf %24, %23 : vector<4x128xf32>
    %26 = arith.addf %9, %25 : vector<4x128xf32>
    %c3_20 = arith.constant 3 : index
    %c0_21 = arith.constant 0 : index
    %c0_22 = arith.constant 0 : index
    %27 = vector.load %arg3[%c3_20, %c0_21, %c0_22] : memref<4x4x128xf32, #tpu.memory_space<vmem>>, vector<1x4x128xf32>
    %28 = vector.shape_cast %27 : vector<1x4x128xf32> to vector<4x128xf32>
    %29 = vector.broadcast %3 : vector<4x1xf32> to vector<4x128xf32>
    %30 = arith.mulf %29, %28 : vector<4x128xf32>
    %31 = arith.addf %11, %30 : vector<4x128xf32>
    %c0_23 = arith.constant 0 : index
    %32 = memref.load %arg5[%c0_23] : memref<32xf32, #tpu.memory_space<smem>>
    %33 = vector.broadcast %32 : f32 to vector<4x128xf32>
    %34 = arith.mulf %33, %16 : vector<4x128xf32>
    %c1_24 = arith.constant 1 : index
    %35 = memref.load %arg5[%c1_24] : memref<32xf32, #tpu.memory_space<smem>>
    %36 = vector.broadcast %35 : f32 to vector<4x128xf32>
    %37 = arith.mulf %36, %21 : vector<4x128xf32>
    %38 = arith.addf %34, %37 : vector<4x128xf32>
    %c2_25 = arith.constant 2 : index
    %39 = memref.load %arg5[%c2_25] : memref<32xf32, #tpu.memory_space<smem>>
    %40 = vector.broadcast %39 : f32 to vector<4x128xf32>
    %41 = arith.mulf %40, %26 : vector<4x128xf32>
    %42 = arith.addf %38, %41 : vector<4x128xf32>
    %c3_26 = arith.constant 3 : index
    %43 = memref.load %arg5[%c3_26] : memref<32xf32, #tpu.memory_space<smem>>
    %44 = vector.broadcast %43 : f32 to vector<4x128xf32>
    %45 = arith.mulf %44, %31 : vector<4x128xf32>
    %46 = arith.addf %42, %45 : vector<4x128xf32>
    %c0_27 = arith.constant 0 : index
    %47 = memref.load %arg6[%c0_27] : memref<8xf32, #tpu.memory_space<smem>>
    %48 = vector.broadcast %47 : f32 to vector<4x128xf32>
    %49 = arith.addf %46, %48 : vector<4x128xf32>
    %c4 = arith.constant 4 : index
    %50 = memref.load %arg5[%c4] : memref<32xf32, #tpu.memory_space<smem>>
    %51 = vector.broadcast %50 : f32 to vector<4x128xf32>
    %52 = arith.mulf %51, %16 : vector<4x128xf32>
    %c5 = arith.constant 5 : index
    %53 = memref.load %arg5[%c5] : memref<32xf32, #tpu.memory_space<smem>>
    %54 = vector.broadcast %53 : f32 to vector<4x128xf32>
    %55 = arith.mulf %54, %21 : vector<4x128xf32>
    %56 = arith.addf %52, %55 : vector<4x128xf32>
    %c6 = arith.constant 6 : index
    %57 = memref.load %arg5[%c6] : memref<32xf32, #tpu.memory_space<smem>>
    %58 = vector.broadcast %57 : f32 to vector<4x128xf32>
    %59 = arith.mulf %58, %26 : vector<4x128xf32>
    %60 = arith.addf %56, %59 : vector<4x128xf32>
    %c7 = arith.constant 7 : index
    %61 = memref.load %arg5[%c7] : memref<32xf32, #tpu.memory_space<smem>>
    %62 = vector.broadcast %61 : f32 to vector<4x128xf32>
    %63 = arith.mulf %62, %31 : vector<4x128xf32>
    %64 = arith.addf %60, %63 : vector<4x128xf32>
    %c1_28 = arith.constant 1 : index
    %65 = memref.load %arg6[%c1_28] : memref<8xf32, #tpu.memory_space<smem>>
    %66 = vector.broadcast %65 : f32 to vector<4x128xf32>
    %67 = arith.addf %64, %66 : vector<4x128xf32>
    %c8 = arith.constant 8 : index
    %68 = memref.load %arg5[%c8] : memref<32xf32, #tpu.memory_space<smem>>
    %69 = vector.broadcast %68 : f32 to vector<4x128xf32>
    %70 = arith.mulf %69, %16 : vector<4x128xf32>
    %c9 = arith.constant 9 : index
    %71 = memref.load %arg5[%c9] : memref<32xf32, #tpu.memory_space<smem>>
    %72 = vector.broadcast %71 : f32 to vector<4x128xf32>
    %73 = arith.mulf %72, %21 : vector<4x128xf32>
    %74 = arith.addf %70, %73 : vector<4x128xf32>
    %c10 = arith.constant 10 : index
    %75 = memref.load %arg5[%c10] : memref<32xf32, #tpu.memory_space<smem>>
    %76 = vector.broadcast %75 : f32 to vector<4x128xf32>
    %77 = arith.mulf %76, %26 : vector<4x128xf32>
    %78 = arith.addf %74, %77 : vector<4x128xf32>
    %c11 = arith.constant 11 : index
    %79 = memref.load %arg5[%c11] : memref<32xf32, #tpu.memory_space<smem>>
    %80 = vector.broadcast %79 : f32 to vector<4x128xf32>
    %81 = arith.mulf %80, %31 : vector<4x128xf32>
    %82 = arith.addf %78, %81 : vector<4x128xf32>
    %c2_29 = arith.constant 2 : index
    %83 = memref.load %arg6[%c2_29] : memref<8xf32, #tpu.memory_space<smem>>
    %84 = vector.broadcast %83 : f32 to vector<4x128xf32>
    %85 = arith.addf %82, %84 : vector<4x128xf32>
    %c12 = arith.constant 12 : index
    %86 = memref.load %arg5[%c12] : memref<32xf32, #tpu.memory_space<smem>>
    %87 = vector.broadcast %86 : f32 to vector<4x128xf32>
    %88 = arith.mulf %87, %16 : vector<4x128xf32>
    %c13 = arith.constant 13 : index
    %89 = memref.load %arg5[%c13] : memref<32xf32, #tpu.memory_space<smem>>
    %90 = vector.broadcast %89 : f32 to vector<4x128xf32>
    %91 = arith.mulf %90, %21 : vector<4x128xf32>
    %92 = arith.addf %88, %91 : vector<4x128xf32>
    %c14 = arith.constant 14 : index
    %93 = memref.load %arg5[%c14] : memref<32xf32, #tpu.memory_space<smem>>
    %94 = vector.broadcast %93 : f32 to vector<4x128xf32>
    %95 = arith.mulf %94, %26 : vector<4x128xf32>
    %96 = arith.addf %92, %95 : vector<4x128xf32>
    %c15 = arith.constant 15 : index
    %97 = memref.load %arg5[%c15] : memref<32xf32, #tpu.memory_space<smem>>
    %98 = vector.broadcast %97 : f32 to vector<4x128xf32>
    %99 = arith.mulf %98, %31 : vector<4x128xf32>
    %100 = arith.addf %96, %99 : vector<4x128xf32>
    %c3_30 = arith.constant 3 : index
    %101 = memref.load %arg6[%c3_30] : memref<8xf32, #tpu.memory_space<smem>>
    %102 = vector.broadcast %101 : f32 to vector<4x128xf32>
    %103 = arith.addf %100, %102 : vector<4x128xf32>
    %104 = arith.maximumf %49, %67 : vector<4x128xf32>
    %105 = arith.maximumf %104, %85 : vector<4x128xf32>
    %106 = arith.maximumf %105, %103 : vector<4x128xf32>
    %107 = arith.subf %49, %106 : vector<4x128xf32>
    %108 = math.exp %107 : vector<4x128xf32>
    %109 = arith.subf %67, %106 : vector<4x128xf32>
    %110 = math.exp %109 : vector<4x128xf32>
    %111 = arith.subf %85, %106 : vector<4x128xf32>
    %112 = math.exp %111 : vector<4x128xf32>
    %113 = arith.subf %103, %106 : vector<4x128xf32>
    %114 = math.exp %113 : vector<4x128xf32>
    %115 = arith.addf %108, %110 : vector<4x128xf32>
    %116 = arith.addf %115, %112 : vector<4x128xf32>
    %117 = arith.addf %116, %114 : vector<4x128xf32>
    %cst = arith.constant 1.000000e+00 : f32
    %118 = vector.broadcast %cst : f32 to vector<4x128xf32>
    %119 = arith.divf %118, %117 : vector<4x128xf32>
    %120 = arith.mulf %108, %119 : vector<4x128xf32>
    %121 = arith.mulf %110, %119 : vector<4x128xf32>
    %122 = arith.mulf %112, %119 : vector<4x128xf32>
    %123 = arith.mulf %114, %119 : vector<4x128xf32>
    %c16 = arith.constant 16 : index
    %124 = memref.load %arg5[%c16] : memref<32xf32, #tpu.memory_space<smem>>
    %125 = vector.broadcast %124 : f32 to vector<4x128xf32>
    %126 = arith.mulf %125, %16 : vector<4x128xf32>
    %c17 = arith.constant 17 : index
    %127 = memref.load %arg5[%c17] : memref<32xf32, #tpu.memory_space<smem>>
    %128 = vector.broadcast %127 : f32 to vector<4x128xf32>
    %129 = arith.mulf %128, %21 : vector<4x128xf32>
    %130 = arith.addf %126, %129 : vector<4x128xf32>
    %c18 = arith.constant 18 : index
    %131 = memref.load %arg5[%c18] : memref<32xf32, #tpu.memory_space<smem>>
    %132 = vector.broadcast %131 : f32 to vector<4x128xf32>
    %133 = arith.mulf %132, %26 : vector<4x128xf32>
    %134 = arith.addf %130, %133 : vector<4x128xf32>
    %c19 = arith.constant 19 : index
    %135 = memref.load %arg5[%c19] : memref<32xf32, #tpu.memory_space<smem>>
    %136 = vector.broadcast %135 : f32 to vector<4x128xf32>
    %137 = arith.mulf %136, %31 : vector<4x128xf32>
    %138 = arith.addf %134, %137 : vector<4x128xf32>
    %c4_31 = arith.constant 4 : index
    %139 = memref.load %arg6[%c4_31] : memref<8xf32, #tpu.memory_space<smem>>
    %140 = vector.broadcast %139 : f32 to vector<4x128xf32>
    %141 = arith.addf %138, %140 : vector<4x128xf32>
    %c20 = arith.constant 20 : index
    %142 = memref.load %arg5[%c20] : memref<32xf32, #tpu.memory_space<smem>>
    %143 = vector.broadcast %142 : f32 to vector<4x128xf32>
    %144 = arith.mulf %143, %16 : vector<4x128xf32>
    %c21 = arith.constant 21 : index
    %145 = memref.load %arg5[%c21] : memref<32xf32, #tpu.memory_space<smem>>
    %146 = vector.broadcast %145 : f32 to vector<4x128xf32>
    %147 = arith.mulf %146, %21 : vector<4x128xf32>
    %148 = arith.addf %144, %147 : vector<4x128xf32>
    %c22 = arith.constant 22 : index
    %149 = memref.load %arg5[%c22] : memref<32xf32, #tpu.memory_space<smem>>
    %150 = vector.broadcast %149 : f32 to vector<4x128xf32>
    %151 = arith.mulf %150, %26 : vector<4x128xf32>
    %152 = arith.addf %148, %151 : vector<4x128xf32>
    %c23 = arith.constant 23 : index
    %153 = memref.load %arg5[%c23] : memref<32xf32, #tpu.memory_space<smem>>
    %154 = vector.broadcast %153 : f32 to vector<4x128xf32>
    %155 = arith.mulf %154, %31 : vector<4x128xf32>
    %156 = arith.addf %152, %155 : vector<4x128xf32>
    %c5_32 = arith.constant 5 : index
    %157 = memref.load %arg6[%c5_32] : memref<8xf32, #tpu.memory_space<smem>>
    %158 = vector.broadcast %157 : f32 to vector<4x128xf32>
    %159 = arith.addf %156, %158 : vector<4x128xf32>
    %c24 = arith.constant 24 : index
    %160 = memref.load %arg5[%c24] : memref<32xf32, #tpu.memory_space<smem>>
    %161 = vector.broadcast %160 : f32 to vector<4x128xf32>
    %162 = arith.mulf %161, %16 : vector<4x128xf32>
    %c25 = arith.constant 25 : index
    %163 = memref.load %arg5[%c25] : memref<32xf32, #tpu.memory_space<smem>>
    %164 = vector.broadcast %163 : f32 to vector<4x128xf32>
    %165 = arith.mulf %164, %21 : vector<4x128xf32>
    %166 = arith.addf %162, %165 : vector<4x128xf32>
    %c26 = arith.constant 26 : index
    %167 = memref.load %arg5[%c26] : memref<32xf32, #tpu.memory_space<smem>>
    %168 = vector.broadcast %167 : f32 to vector<4x128xf32>
    %169 = arith.mulf %168, %26 : vector<4x128xf32>
    %170 = arith.addf %166, %169 : vector<4x128xf32>
    %c27 = arith.constant 27 : index
    %171 = memref.load %arg5[%c27] : memref<32xf32, #tpu.memory_space<smem>>
    %172 = vector.broadcast %171 : f32 to vector<4x128xf32>
    %173 = arith.mulf %172, %31 : vector<4x128xf32>
    %174 = arith.addf %170, %173 : vector<4x128xf32>
    %c6_33 = arith.constant 6 : index
    %175 = memref.load %arg6[%c6_33] : memref<8xf32, #tpu.memory_space<smem>>
    %176 = vector.broadcast %175 : f32 to vector<4x128xf32>
    %177 = arith.addf %174, %176 : vector<4x128xf32>
    %c28 = arith.constant 28 : index
    %178 = memref.load %arg5[%c28] : memref<32xf32, #tpu.memory_space<smem>>
    %179 = vector.broadcast %178 : f32 to vector<4x128xf32>
    %180 = arith.mulf %179, %16 : vector<4x128xf32>
    %c29 = arith.constant 29 : index
    %181 = memref.load %arg5[%c29] : memref<32xf32, #tpu.memory_space<smem>>
    %182 = vector.broadcast %181 : f32 to vector<4x128xf32>
    %183 = arith.mulf %182, %21 : vector<4x128xf32>
    %184 = arith.addf %180, %183 : vector<4x128xf32>
    %c30 = arith.constant 30 : index
    %185 = memref.load %arg5[%c30] : memref<32xf32, #tpu.memory_space<smem>>
    %186 = vector.broadcast %185 : f32 to vector<4x128xf32>
    %187 = arith.mulf %186, %26 : vector<4x128xf32>
    %188 = arith.addf %184, %187 : vector<4x128xf32>
    %c31 = arith.constant 31 : index
    %189 = memref.load %arg5[%c31] : memref<32xf32, #tpu.memory_space<smem>>
    %190 = vector.broadcast %189 : f32 to vector<4x128xf32>
    %191 = arith.mulf %190, %31 : vector<4x128xf32>
    %192 = arith.addf %188, %191 : vector<4x128xf32>
    %c7_34 = arith.constant 7 : index
    %193 = memref.load %arg6[%c7_34] : memref<8xf32, #tpu.memory_space<smem>>
    %194 = vector.broadcast %193 : f32 to vector<4x128xf32>
    %195 = arith.addf %192, %194 : vector<4x128xf32>
    %196 = arith.maximumf %141, %159 : vector<4x128xf32>
    %197 = arith.maximumf %196, %177 : vector<4x128xf32>
    %198 = arith.maximumf %197, %195 : vector<4x128xf32>
    %199 = arith.subf %141, %198 : vector<4x128xf32>
    %200 = math.exp %199 : vector<4x128xf32>
    %201 = arith.subf %159, %198 : vector<4x128xf32>
    %202 = math.exp %201 : vector<4x128xf32>
    %203 = arith.subf %177, %198 : vector<4x128xf32>
    %204 = math.exp %203 : vector<4x128xf32>
    %205 = arith.subf %195, %198 : vector<4x128xf32>
    %206 = math.exp %205 : vector<4x128xf32>
    %207 = arith.addf %200, %202 : vector<4x128xf32>
    %208 = arith.addf %207, %204 : vector<4x128xf32>
    %209 = arith.addf %208, %206 : vector<4x128xf32>
    %cst_35 = arith.constant 1.000000e+00 : f32
    %210 = vector.broadcast %cst_35 : f32 to vector<4x128xf32>
    %211 = arith.divf %210, %209 : vector<4x128xf32>
    %212 = arith.mulf %200, %211 : vector<4x128xf32>
    %213 = arith.mulf %202, %211 : vector<4x128xf32>
    %214 = arith.mulf %204, %211 : vector<4x128xf32>
    %215 = arith.mulf %206, %211 : vector<4x128xf32>
    %c0_36 = arith.constant 0 : index
    %216 = memref.load %arg5[%c0_36] : memref<32xf32, #tpu.memory_space<smem>>
    %217 = vector.broadcast %216 : f32 to vector<4x128xf32>
    %218 = arith.mulf %217, %5 : vector<4x128xf32>
    %c1_37 = arith.constant 1 : index
    %219 = memref.load %arg5[%c1_37] : memref<32xf32, #tpu.memory_space<smem>>
    %220 = vector.broadcast %219 : f32 to vector<4x128xf32>
    %221 = arith.mulf %220, %7 : vector<4x128xf32>
    %222 = arith.addf %218, %221 : vector<4x128xf32>
    %c2_38 = arith.constant 2 : index
    %223 = memref.load %arg5[%c2_38] : memref<32xf32, #tpu.memory_space<smem>>
    %224 = vector.broadcast %223 : f32 to vector<4x128xf32>
    %225 = arith.mulf %224, %9 : vector<4x128xf32>
    %226 = arith.addf %222, %225 : vector<4x128xf32>
    %c3_39 = arith.constant 3 : index
    %227 = memref.load %arg5[%c3_39] : memref<32xf32, #tpu.memory_space<smem>>
    %228 = vector.broadcast %227 : f32 to vector<4x128xf32>
    %229 = arith.mulf %228, %11 : vector<4x128xf32>
    %230 = arith.addf %226, %229 : vector<4x128xf32>
    %c0_40 = arith.constant 0 : index
    %231 = memref.load %arg6[%c0_40] : memref<8xf32, #tpu.memory_space<smem>>
    %232 = vector.broadcast %231 : f32 to vector<4x128xf32>
    %233 = arith.addf %230, %232 : vector<4x128xf32>
    %c4_41 = arith.constant 4 : index
    %234 = memref.load %arg5[%c4_41] : memref<32xf32, #tpu.memory_space<smem>>
    %235 = vector.broadcast %234 : f32 to vector<4x128xf32>
    %236 = arith.mulf %235, %5 : vector<4x128xf32>
    %c5_42 = arith.constant 5 : index
    %237 = memref.load %arg5[%c5_42] : memref<32xf32, #tpu.memory_space<smem>>
    %238 = vector.broadcast %237 : f32 to vector<4x128xf32>
    %239 = arith.mulf %238, %7 : vector<4x128xf32>
    %240 = arith.addf %236, %239 : vector<4x128xf32>
    %c6_43 = arith.constant 6 : index
    %241 = memref.load %arg5[%c6_43] : memref<32xf32, #tpu.memory_space<smem>>
    %242 = vector.broadcast %241 : f32 to vector<4x128xf32>
    %243 = arith.mulf %242, %9 : vector<4x128xf32>
    %244 = arith.addf %240, %243 : vector<4x128xf32>
    %c7_44 = arith.constant 7 : index
    %245 = memref.load %arg5[%c7_44] : memref<32xf32, #tpu.memory_space<smem>>
    %246 = vector.broadcast %245 : f32 to vector<4x128xf32>
    %247 = arith.mulf %246, %11 : vector<4x128xf32>
    %248 = arith.addf %244, %247 : vector<4x128xf32>
    %c1_45 = arith.constant 1 : index
    %249 = memref.load %arg6[%c1_45] : memref<8xf32, #tpu.memory_space<smem>>
    %250 = vector.broadcast %249 : f32 to vector<4x128xf32>
    %251 = arith.addf %248, %250 : vector<4x128xf32>
    %c8_46 = arith.constant 8 : index
    %252 = memref.load %arg5[%c8_46] : memref<32xf32, #tpu.memory_space<smem>>
    %253 = vector.broadcast %252 : f32 to vector<4x128xf32>
    %254 = arith.mulf %253, %5 : vector<4x128xf32>
    %c9_47 = arith.constant 9 : index
    %255 = memref.load %arg5[%c9_47] : memref<32xf32, #tpu.memory_space<smem>>
    %256 = vector.broadcast %255 : f32 to vector<4x128xf32>
    %257 = arith.mulf %256, %7 : vector<4x128xf32>
    %258 = arith.addf %254, %257 : vector<4x128xf32>
    %c10_48 = arith.constant 10 : index
    %259 = memref.load %arg5[%c10_48] : memref<32xf32, #tpu.memory_space<smem>>
    %260 = vector.broadcast %259 : f32 to vector<4x128xf32>
    %261 = arith.mulf %260, %9 : vector<4x128xf32>
    %262 = arith.addf %258, %261 : vector<4x128xf32>
    %c11_49 = arith.constant 11 : index
    %263 = memref.load %arg5[%c11_49] : memref<32xf32, #tpu.memory_space<smem>>
    %264 = vector.broadcast %263 : f32 to vector<4x128xf32>
    %265 = arith.mulf %264, %11 : vector<4x128xf32>
    %266 = arith.addf %262, %265 : vector<4x128xf32>
    %c2_50 = arith.constant 2 : index
    %267 = memref.load %arg6[%c2_50] : memref<8xf32, #tpu.memory_space<smem>>
    %268 = vector.broadcast %267 : f32 to vector<4x128xf32>
    %269 = arith.addf %266, %268 : vector<4x128xf32>
    %c12_51 = arith.constant 12 : index
    %270 = memref.load %arg5[%c12_51] : memref<32xf32, #tpu.memory_space<smem>>
    %271 = vector.broadcast %270 : f32 to vector<4x128xf32>
    %272 = arith.mulf %271, %5 : vector<4x128xf32>
    %c13_52 = arith.constant 13 : index
    %273 = memref.load %arg5[%c13_52] : memref<32xf32, #tpu.memory_space<smem>>
    %274 = vector.broadcast %273 : f32 to vector<4x128xf32>
    %275 = arith.mulf %274, %7 : vector<4x128xf32>
    %276 = arith.addf %272, %275 : vector<4x128xf32>
    %c14_53 = arith.constant 14 : index
    %277 = memref.load %arg5[%c14_53] : memref<32xf32, #tpu.memory_space<smem>>
    %278 = vector.broadcast %277 : f32 to vector<4x128xf32>
    %279 = arith.mulf %278, %9 : vector<4x128xf32>
    %280 = arith.addf %276, %279 : vector<4x128xf32>
    %c15_54 = arith.constant 15 : index
    %281 = memref.load %arg5[%c15_54] : memref<32xf32, #tpu.memory_space<smem>>
    %282 = vector.broadcast %281 : f32 to vector<4x128xf32>
    %283 = arith.mulf %282, %11 : vector<4x128xf32>
    %284 = arith.addf %280, %283 : vector<4x128xf32>
    %c3_55 = arith.constant 3 : index
    %285 = memref.load %arg6[%c3_55] : memref<8xf32, #tpu.memory_space<smem>>
    %286 = vector.broadcast %285 : f32 to vector<4x128xf32>
    %287 = arith.addf %284, %286 : vector<4x128xf32>
    %288 = arith.maximumf %233, %251 : vector<4x128xf32>
    %289 = arith.maximumf %288, %269 : vector<4x128xf32>
    %290 = arith.maximumf %289, %287 : vector<4x128xf32>
    %291 = arith.subf %233, %290 : vector<4x128xf32>
    %292 = math.exp %291 : vector<4x128xf32>
    %293 = arith.subf %251, %290 : vector<4x128xf32>
    %294 = math.exp %293 : vector<4x128xf32>
    %295 = arith.subf %269, %290 : vector<4x128xf32>
    %296 = math.exp %295 : vector<4x128xf32>
    %297 = arith.subf %287, %290 : vector<4x128xf32>
    %298 = math.exp %297 : vector<4x128xf32>
    %299 = arith.addf %292, %294 : vector<4x128xf32>
    %300 = arith.addf %299, %296 : vector<4x128xf32>
    %301 = arith.addf %300, %298 : vector<4x128xf32>
    %cst_56 = arith.constant 1.000000e+00 : f32
    %302 = vector.broadcast %cst_56 : f32 to vector<4x128xf32>
    %303 = arith.divf %302, %301 : vector<4x128xf32>
    %304 = arith.mulf %292, %303 : vector<4x128xf32>
    %305 = arith.mulf %294, %303 : vector<4x128xf32>
    %306 = arith.mulf %296, %303 : vector<4x128xf32>
    %307 = arith.mulf %298, %303 : vector<4x128xf32>
    %c16_57 = arith.constant 16 : index
    %308 = memref.load %arg5[%c16_57] : memref<32xf32, #tpu.memory_space<smem>>
    %309 = vector.broadcast %308 : f32 to vector<4x128xf32>
    %310 = arith.mulf %309, %5 : vector<4x128xf32>
    %c17_58 = arith.constant 17 : index
    %311 = memref.load %arg5[%c17_58] : memref<32xf32, #tpu.memory_space<smem>>
    %312 = vector.broadcast %311 : f32 to vector<4x128xf32>
    %313 = arith.mulf %312, %7 : vector<4x128xf32>
    %314 = arith.addf %310, %313 : vector<4x128xf32>
    %c18_59 = arith.constant 18 : index
    %315 = memref.load %arg5[%c18_59] : memref<32xf32, #tpu.memory_space<smem>>
    %316 = vector.broadcast %315 : f32 to vector<4x128xf32>
    %317 = arith.mulf %316, %9 : vector<4x128xf32>
    %318 = arith.addf %314, %317 : vector<4x128xf32>
    %c19_60 = arith.constant 19 : index
    %319 = memref.load %arg5[%c19_60] : memref<32xf32, #tpu.memory_space<smem>>
    %320 = vector.broadcast %319 : f32 to vector<4x128xf32>
    %321 = arith.mulf %320, %11 : vector<4x128xf32>
    %322 = arith.addf %318, %321 : vector<4x128xf32>
    %c4_61 = arith.constant 4 : index
    %323 = memref.load %arg6[%c4_61] : memref<8xf32, #tpu.memory_space<smem>>
    %324 = vector.broadcast %323 : f32 to vector<4x128xf32>
    %325 = arith.addf %322, %324 : vector<4x128xf32>
    %c20_62 = arith.constant 20 : index
    %326 = memref.load %arg5[%c20_62] : memref<32xf32, #tpu.memory_space<smem>>
    %327 = vector.broadcast %326 : f32 to vector<4x128xf32>
    %328 = arith.mulf %327, %5 : vector<4x128xf32>
    %c21_63 = arith.constant 21 : index
    %329 = memref.load %arg5[%c21_63] : memref<32xf32, #tpu.memory_space<smem>>
    %330 = vector.broadcast %329 : f32 to vector<4x128xf32>
    %331 = arith.mulf %330, %7 : vector<4x128xf32>
    %332 = arith.addf %328, %331 : vector<4x128xf32>
    %c22_64 = arith.constant 22 : index
    %333 = memref.load %arg5[%c22_64] : memref<32xf32, #tpu.memory_space<smem>>
    %334 = vector.broadcast %333 : f32 to vector<4x128xf32>
    %335 = arith.mulf %334, %9 : vector<4x128xf32>
    %336 = arith.addf %332, %335 : vector<4x128xf32>
    %c23_65 = arith.constant 23 : index
    %337 = memref.load %arg5[%c23_65] : memref<32xf32, #tpu.memory_space<smem>>
    %338 = vector.broadcast %337 : f32 to vector<4x128xf32>
    %339 = arith.mulf %338, %11 : vector<4x128xf32>
    %340 = arith.addf %336, %339 : vector<4x128xf32>
    %c5_66 = arith.constant 5 : index
    %341 = memref.load %arg6[%c5_66] : memref<8xf32, #tpu.memory_space<smem>>
    %342 = vector.broadcast %341 : f32 to vector<4x128xf32>
    %343 = arith.addf %340, %342 : vector<4x128xf32>
    %c24_67 = arith.constant 24 : index
    %344 = memref.load %arg5[%c24_67] : memref<32xf32, #tpu.memory_space<smem>>
    %345 = vector.broadcast %344 : f32 to vector<4x128xf32>
    %346 = arith.mulf %345, %5 : vector<4x128xf32>
    %c25_68 = arith.constant 25 : index
    %347 = memref.load %arg5[%c25_68] : memref<32xf32, #tpu.memory_space<smem>>
    %348 = vector.broadcast %347 : f32 to vector<4x128xf32>
    %349 = arith.mulf %348, %7 : vector<4x128xf32>
    %350 = arith.addf %346, %349 : vector<4x128xf32>
    %c26_69 = arith.constant 26 : index
    %351 = memref.load %arg5[%c26_69] : memref<32xf32, #tpu.memory_space<smem>>
    %352 = vector.broadcast %351 : f32 to vector<4x128xf32>
    %353 = arith.mulf %352, %9 : vector<4x128xf32>
    %354 = arith.addf %350, %353 : vector<4x128xf32>
    %c27_70 = arith.constant 27 : index
    %355 = memref.load %arg5[%c27_70] : memref<32xf32, #tpu.memory_space<smem>>
    %356 = vector.broadcast %355 : f32 to vector<4x128xf32>
    %357 = arith.mulf %356, %11 : vector<4x128xf32>
    %358 = arith.addf %354, %357 : vector<4x128xf32>
    %c6_71 = arith.constant 6 : index
    %359 = memref.load %arg6[%c6_71] : memref<8xf32, #tpu.memory_space<smem>>
    %360 = vector.broadcast %359 : f32 to vector<4x128xf32>
    %361 = arith.addf %358, %360 : vector<4x128xf32>
    %c28_72 = arith.constant 28 : index
    %362 = memref.load %arg5[%c28_72] : memref<32xf32, #tpu.memory_space<smem>>
    %363 = vector.broadcast %362 : f32 to vector<4x128xf32>
    %364 = arith.mulf %363, %5 : vector<4x128xf32>
    %c29_73 = arith.constant 29 : index
    %365 = memref.load %arg5[%c29_73] : memref<32xf32, #tpu.memory_space<smem>>
    %366 = vector.broadcast %365 : f32 to vector<4x128xf32>
    %367 = arith.mulf %366, %7 : vector<4x128xf32>
    %368 = arith.addf %364, %367 : vector<4x128xf32>
    %c30_74 = arith.constant 30 : index
    %369 = memref.load %arg5[%c30_74] : memref<32xf32, #tpu.memory_space<smem>>
    %370 = vector.broadcast %369 : f32 to vector<4x128xf32>
    %371 = arith.mulf %370, %9 : vector<4x128xf32>
    %372 = arith.addf %368, %371 : vector<4x128xf32>
    %c31_75 = arith.constant 31 : index
    %373 = memref.load %arg5[%c31_75] : memref<32xf32, #tpu.memory_space<smem>>
    %374 = vector.broadcast %373 : f32 to vector<4x128xf32>
    %375 = arith.mulf %374, %11 : vector<4x128xf32>
    %376 = arith.addf %372, %375 : vector<4x128xf32>
    %c7_76 = arith.constant 7 : index
    %377 = memref.load %arg6[%c7_76] : memref<8xf32, #tpu.memory_space<smem>>
    %378 = vector.broadcast %377 : f32 to vector<4x128xf32>
    %379 = arith.addf %376, %378 : vector<4x128xf32>
    %380 = arith.maximumf %325, %343 : vector<4x128xf32>
    %381 = arith.maximumf %380, %361 : vector<4x128xf32>
    %382 = arith.maximumf %381, %379 : vector<4x128xf32>
    %383 = arith.subf %325, %382 : vector<4x128xf32>
    %384 = math.exp %383 : vector<4x128xf32>
    %385 = arith.subf %343, %382 : vector<4x128xf32>
    %386 = math.exp %385 : vector<4x128xf32>
    %387 = arith.subf %361, %382 : vector<4x128xf32>
    %388 = math.exp %387 : vector<4x128xf32>
    %389 = arith.subf %379, %382 : vector<4x128xf32>
    %390 = math.exp %389 : vector<4x128xf32>
    %391 = arith.addf %384, %386 : vector<4x128xf32>
    %392 = arith.addf %391, %388 : vector<4x128xf32>
    %393 = arith.addf %392, %390 : vector<4x128xf32>
    %cst_77 = arith.constant 1.000000e+00 : f32
    %394 = vector.broadcast %cst_77 : f32 to vector<4x128xf32>
    %395 = arith.divf %394, %393 : vector<4x128xf32>
    %396 = arith.mulf %384, %395 : vector<4x128xf32>
    %397 = arith.mulf %386, %395 : vector<4x128xf32>
    %398 = arith.mulf %388, %395 : vector<4x128xf32>
    %399 = arith.mulf %390, %395 : vector<4x128xf32>
    %c0_78 = arith.constant 0 : index
    %c0_79 = arith.constant 0 : index
    %c0_80 = arith.constant 0 : index
    %c0_81 = arith.constant 0 : index
    %400 = vector.load %arg7[%c0_78, %c0_79, %c0_80, %c0_81] : memref<1x24x4x128xf32, #tpu.memory_space<vmem>>, vector<1x1x4x128xf32>
    %401 = vector.shape_cast %400 : vector<1x1x4x128xf32> to vector<4x128xf32>
    %402 = arith.mulf %120, %120 : vector<4x128xf32>
    %403 = arith.addf %401, %402 : vector<4x128xf32>
    %c0_82 = arith.constant 0 : index
    %c0_83 = arith.constant 0 : index
    %c0_84 = arith.constant 0 : index
    %c0_85 = arith.constant 0 : index
    %404 = vector.load %arg7[%c0_82, %c0_83, %c0_84, %c0_85] : memref<1x24x4x128xf32, #tpu.memory_space<vmem>>, vector<1x1x4x128xf32>
    %405 = vector.shape_cast %404 : vector<1x1x4x128xf32> to vector<4x128xf32>
    %406 = vector.shape_cast %403 : vector<4x128xf32> to vector<1x1x4x128xf32>
    tpu.vector_store %arg7[%c0_82, %c0_83, %c0_84, %c0_85], %406 {strides = array<i32>} : memref<1x24x4x128xf32, #tpu.memory_space<vmem>>, vector<1x1x4x128xf32>,
    %c0_86 = arith.constant 0 : index
    %c1_87 = arith.constant 1 : index
    %c0_88 = arith.constant 0 : index
    %c0_89 = arith.constant 0 : index
    %407 = vector.load %arg7[%c0_86, %c1_87, %c0_88, %c0_89] : memref<1x24x4x128xf32, #tpu.memory_space<vmem>>, vector<1x1x4x128xf32>
    %408 = vector.shape_cast %407 : vector<1x1x4x128xf32> to vector<4x128xf32>
    %409 = arith.mulf %121, %121 : vector<4x128xf32>
    %410 = arith.addf %408, %409 : vector<4x128xf32>
    %c0_90 = arith.constant 0 : index
    %c1_91 = arith.constant 1 : index
    %c0_92 = arith.constant 0 : index
    %c0_93 = arith.constant 0 : index
    %411 = vector.load %arg7[%c0_90, %c1_91, %c0_92, %c0_93] : memref<1x24x4x128xf32, #tpu.memory_space<vmem>>, vector<1x1x4x128xf32>
    %412 = vector.shape_cast %411 : vector<1x1x4x128xf32> to vector<4x128xf32>
    %413 = vector.shape_cast %410 : vector<4x128xf32> to vector<1x1x4x128xf32>
    tpu.vector_store %arg7[%c0_90, %c1_91, %c0_92, %c0_93], %413 {strides = array<i32>} : memref<1x24x4x128xf32, #tpu.memory_space<vmem>>, vector<1x1x4x128xf32>,
    %c0_94 = arith.constant 0 : index
    %c2_95 = arith.constant 2 : index
    %c0_96 = arith.constant 0 : index
    %c0_97 = arith.constant 0 : index
    %414 = vector.load %arg7[%c0_94, %c2_95, %c0_96, %c0_97] : memref<1x24x4x128xf32, #tpu.memory_space<vmem>>, vector<1x1x4x128xf32>
    %415 = vector.shape_cast %414 : vector<1x1x4x128xf32> to vector<4x128xf32>
    %416 = arith.mulf %122, %122 : vector<4x128xf32>
    %417 = arith.addf %415, %416 : vector<4x128xf32>
    %c0_98 = arith.constant 0 : index
    %c2_99 = arith.constant 2 : index
    %c0_100 = arith.constant 0 : index
    %c0_101 = arith.constant 0 : index
    %418 = vector.load %arg7[%c0_98, %c2_99, %c0_100, %c0_101] : memref<1x24x4x128xf32, #tpu.memory_space<vmem>>, vector<1x1x4x128xf32>
    %419 = vector.shape_cast %418 : vector<1x1x4x128xf32> to vector<4x128xf32>
    %420 = vector.shape_cast %417 : vector<4x128xf32> to vector<1x1x4x128xf32>
    tpu.vector_store %arg7[%c0_98, %c2_99, %c0_100, %c0_101], %420 {strides = array<i32>} : memref<1x24x4x128xf32, #tpu.memory_space<vmem>>, vector<1x1x4x128xf32>,
    %c0_102 = arith.constant 0 : index
    %c3_103 = arith.constant 3 : index
    %c0_104 = arith.constant 0 : index
    %c0_105 = arith.constant 0 : index
    %421 = vector.load %arg7[%c0_102, %c3_103, %c0_104, %c0_105] : memref<1x24x4x128xf32, #tpu.memory_space<vmem>>, vector<1x1x4x128xf32>
    %422 = vector.shape_cast %421 : vector<1x1x4x128xf32> to vector<4x128xf32>
    %423 = arith.mulf %123, %123 : vector<4x128xf32>
    %424 = arith.addf %422, %423 : vector<4x128xf32>
    %c0_106 = arith.constant 0 : index
    %c3_107 = arith.constant 3 : index
    %c0_108 = arith.constant 0 : index
    %c0_109 = arith.constant 0 : index
    %425 = vector.load %arg7[%c0_106, %c3_107, %c0_108, %c0_109] : memref<1x24x4x128xf32, #tpu.memory_space<vmem>>, vector<1x1x4x128xf32>
    %426 = vector.shape_cast %425 : vector<1x1x4x128xf32> to vector<4x128xf32>
    %427 = vector.shape_cast %424 : vector<4x128xf32> to vector<1x1x4x128xf32>
    tpu.vector_store %arg7[%c0_106, %c3_107, %c0_108, %c0_109], %427 {strides = array<i32>} : memref<1x24x4x128xf32, #tpu.memory_space<vmem>>, vector<1x1x4x128xf32>,
    %c0_110 = arith.constant 0 : index
    %c4_111 = arith.constant 4 : index
    %c0_112 = arith.constant 0 : index
    %c0_113 = arith.constant 0 : index
    %428 = vector.load %arg7[%c0_110, %c4_111, %c0_112, %c0_113] : memref<1x24x4x128xf32, #tpu.memory_space<vmem>>, vector<1x1x4x128xf32>
    %429 = vector.shape_cast %428 : vector<1x1x4x128xf32> to vector<4x128xf32>
    %430 = arith.mulf %212, %212 : vector<4x128xf32>
    %431 = arith.addf %429, %430 : vector<4x128xf32>
    %c0_114 = arith.constant 0 : index
    %c4_115 = arith.constant 4 : index
    %c0_116 = arith.constant 0 : index
    %c0_117 = arith.constant 0 : index
    %432 = vector.load %arg7[%c0_114, %c4_115, %c0_116, %c0_117] : memref<1x24x4x128xf32, #tpu.memory_space<vmem>>, vector<1x1x4x128xf32>
    %433 = vector.shape_cast %432 : vector<1x1x4x128xf32> to vector<4x128xf32>
    %434 = vector.shape_cast %431 : vector<4x128xf32> to vector<1x1x4x128xf32>
    tpu.vector_store %arg7[%c0_114, %c4_115, %c0_116, %c0_117], %434 {strides = array<i32>} : memref<1x24x4x128xf32, #tpu.memory_space<vmem>>, vector<1x1x4x128xf32>,
    %c0_118 = arith.constant 0 : index
    %c5_119 = arith.constant 5 : index
    %c0_120 = arith.constant 0 : index
    %c0_121 = arith.constant 0 : index
    %435 = vector.load %arg7[%c0_118, %c5_119, %c0_120, %c0_121] : memref<1x24x4x128xf32, #tpu.memory_space<vmem>>, vector<1x1x4x128xf32>
    %436 = vector.shape_cast %435 : vector<1x1x4x128xf32> to vector<4x128xf32>
    %437 = arith.mulf %213, %213 : vector<4x128xf32>
    %438 = arith.addf %436, %437 : vector<4x128xf32>
    %c0_122 = arith.constant 0 : index
    %c5_123 = arith.constant 5 : index
    %c0_124 = arith.constant 0 : index
    %c0_125 = arith.constant 0 : index
    %439 = vector.load %arg7[%c0_122, %c5_123, %c0_124, %c0_125] : memref<1x24x4x128xf32, #tpu.memory_space<vmem>>, vector<1x1x4x128xf32>
    %440 = vector.shape_cast %439 : vector<1x1x4x128xf32> to vector<4x128xf32>
    %441 = vector.shape_cast %438 : vector<4x128xf32> to vector<1x1x4x128xf32>
    tpu.vector_store %arg7[%c0_122, %c5_123, %c0_124, %c0_125], %441 {strides = array<i32>} : memref<1x24x4x128xf32, #tpu.memory_space<vmem>>, vector<1x1x4x128xf32>,
    %c0_126 = arith.constant 0 : index
    %c6_127 = arith.constant 6 : index
    %c0_128 = arith.constant 0 : index
    %c0_129 = arith.constant 0 : index
    %442 = vector.load %arg7[%c0_126, %c6_127, %c0_128, %c0_129] : memref<1x24x4x128xf32, #tpu.memory_space<vmem>>, vector<1x1x4x128xf32>
    %443 = vector.shape_cast %442 : vector<1x1x4x128xf32> to vector<4x128xf32>
    %444 = arith.mulf %214, %214 : vector<4x128xf32>
    %445 = arith.addf %443, %444 : vector<4x128xf32>
    %c0_130 = arith.constant 0 : index
    %c6_131 = arith.constant 6 : index
    %c0_132 = arith.constant 0 : index
    %c0_133 = arith.constant 0 : index
    %446 = vector.load %arg7[%c0_130, %c6_131, %c0_132, %c0_133] : memref<1x24x4x128xf32, #tpu.memory_space<vmem>>, vector<1x1x4x128xf32>
    %447 = vector.shape_cast %446 : vector<1x1x4x128xf32> to vector<4x128xf32>
    %448 = vector.shape_cast %445 : vector<4x128xf32> to vector<1x1x4x128xf32>
    tpu.vector_store %arg7[%c0_130, %c6_131, %c0_132, %c0_133], %448 {strides = array<i32>} : memref<1x24x4x128xf32, #tpu.memory_space<vmem>>, vector<1x1x4x128xf32>,
    %c0_134 = arith.constant 0 : index
    %c7_135 = arith.constant 7 : index
    %c0_136 = arith.constant 0 : index
    %c0_137 = arith.constant 0 : index
    %449 = vector.load %arg7[%c0_134, %c7_135, %c0_136, %c0_137] : memref<1x24x4x128xf32, #tpu.memory_space<vmem>>, vector<1x1x4x128xf32>
    %450 = vector.shape_cast %449 : vector<1x1x4x128xf32> to vector<4x128xf32>
    %451 = arith.mulf %215, %215 : vector<4x128xf32>
    %452 = arith.addf %450, %451 : vector<4x128xf32>
    %c0_138 = arith.constant 0 : index
    %c7_139 = arith.constant 7 : index
    %c0_140 = arith.constant 0 : index
    %c0_141 = arith.constant 0 : index
    %453 = vector.load %arg7[%c0_138, %c7_139, %c0_140, %c0_141] : memref<1x24x4x128xf32, #tpu.memory_space<vmem>>, vector<1x1x4x128xf32>
    %454 = vector.shape_cast %453 : vector<1x1x4x128xf32> to vector<4x128xf32>
    %455 = vector.shape_cast %452 : vector<4x128xf32> to vector<1x1x4x128xf32>
    tpu.vector_store %arg7[%c0_138, %c7_139, %c0_140, %c0_141], %455 {strides = array<i32>} : memref<1x24x4x128xf32, #tpu.memory_space<vmem>>, vector<1x1x4x128xf32>,
    %c0_142 = arith.constant 0 : index
    %c8_143 = arith.constant 8 : index
    %c0_144 = arith.constant 0 : index
    %c0_145 = arith.constant 0 : index
    %456 = vector.load %arg7[%c0_142, %c8_143, %c0_144, %c0_145] : memref<1x24x4x128xf32, #tpu.memory_space<vmem>>, vector<1x1x4x128xf32>
    %457 = vector.shape_cast %456 : vector<1x1x4x128xf32> to vector<4x128xf32>
    %458 = arith.mulf %120, %396 : vector<4x128xf32>
    %459 = arith.addf %457, %458 : vector<4x128xf32>
    %c0_146 = arith.constant 0 : index
    %c8_147 = arith.constant 8 : index
    %c0_148 = arith.constant 0 : index
    %c0_149 = arith.constant 0 : index
    %460 = vector.load %arg7[%c0_146, %c8_147, %c0_148, %c0_149] : memref<1x24x4x128xf32, #tpu.memory_space<vmem>>, vector<1x1x4x128xf32>
    %461 = vector.shape_cast %460 : vector<1x1x4x128xf32> to vector<4x128xf32>
    %462 = vector.shape_cast %459 : vector<4x128xf32> to vector<1x1x4x128xf32>
    tpu.vector_store %arg7[%c0_146, %c8_147, %c0_148, %c0_149], %462 {strides = array<i32>} : memref<1x24x4x128xf32, #tpu.memory_space<vmem>>, vector<1x1x4x128xf32>,
    %c0_150 = arith.constant 0 : index
    %c9_151 = arith.constant 9 : index
    %c0_152 = arith.constant 0 : index
    %c0_153 = arith.constant 0 : index
    %463 = vector.load %arg7[%c0_150, %c9_151, %c0_152, %c0_153] : memref<1x24x4x128xf32, #tpu.memory_space<vmem>>, vector<1x1x4x128xf32>
    %464 = vector.shape_cast %463 : vector<1x1x4x128xf32> to vector<4x128xf32>
    %465 = arith.mulf %121, %397 : vector<4x128xf32>
    %466 = arith.addf %464, %465 : vector<4x128xf32>
    %c0_154 = arith.constant 0 : index
    %c9_155 = arith.constant 9 : index
    %c0_156 = arith.constant 0 : index
    %c0_157 = arith.constant 0 : index
    %467 = vector.load %arg7[%c0_154, %c9_155, %c0_156, %c0_157] : memref<1x24x4x128xf32, #tpu.memory_space<vmem>>, vector<1x1x4x128xf32>
    %468 = vector.shape_cast %467 : vector<1x1x4x128xf32> to vector<4x128xf32>
    %469 = vector.shape_cast %466 : vector<4x128xf32> to vector<1x1x4x128xf32>
    tpu.vector_store %arg7[%c0_154, %c9_155, %c0_156, %c0_157], %469 {strides = array<i32>} : memref<1x24x4x128xf32, #tpu.memory_space<vmem>>, vector<1x1x4x128xf32>,
    %c0_158 = arith.constant 0 : index
    %c10_159 = arith.constant 10 : index
    %c0_160 = arith.constant 0 : index
    %c0_161 = arith.constant 0 : index
    %470 = vector.load %arg7[%c0_158, %c10_159, %c0_160, %c0_161] : memref<1x24x4x128xf32, #tpu.memory_space<vmem>>, vector<1x1x4x128xf32>
    %471 = vector.shape_cast %470 : vector<1x1x4x128xf32> to vector<4x128xf32>
    %472 = arith.mulf %122, %398 : vector<4x128xf32>
    %473 = arith.addf %471, %472 : vector<4x128xf32>
    %c0_162 = arith.constant 0 : index
    %c10_163 = arith.constant 10 : index
    %c0_164 = arith.constant 0 : index
    %c0_165 = arith.constant 0 : index
    %474 = vector.load %arg7[%c0_162, %c10_163, %c0_164, %c0_165] : memref<1x24x4x128xf32, #tpu.memory_space<vmem>>, vector<1x1x4x128xf32>
    %475 = vector.shape_cast %474 : vector<1x1x4x128xf32> to vector<4x128xf32>
    %476 = vector.shape_cast %473 : vector<4x128xf32> to vector<1x1x4x128xf32>
    tpu.vector_store %arg7[%c0_162, %c10_163, %c0_164, %c0_165], %476 {strides = array<i32>} : memref<1x24x4x128xf32, #tpu.memory_space<vmem>>, vector<1x1x4x128xf32>,
    %c0_166 = arith.constant 0 : index
    %c11_167 = arith.constant 11 : index
    %c0_168 = arith.constant 0 : index
    %c0_169 = arith.constant 0 : index
    %477 = vector.load %arg7[%c0_166, %c11_167, %c0_168, %c0_169] : memref<1x24x4x128xf32, #tpu.memory_space<vmem>>, vector<1x1x4x128xf32>
    %478 = vector.shape_cast %477 : vector<1x1x4x128xf32> to vector<4x128xf32>
    %479 = arith.mulf %123, %399 : vector<4x128xf32>
    %480 = arith.addf %478, %479 : vector<4x128xf32>
    %c0_170 = arith.constant 0 : index
    %c11_171 = arith.constant 11 : index
    %c0_172 = arith.constant 0 : index
    %c0_173 = arith.constant 0 : index
    %481 = vector.load %arg7[%c0_170, %c11_171, %c0_172, %c0_173] : memref<1x24x4x128xf32, #tpu.memory_space<vmem>>, vector<1x1x4x128xf32>
    %482 = vector.shape_cast %481 : vector<1x1x4x128xf32> to vector<4x128xf32>
    %483 = vector.shape_cast %480 : vector<4x128xf32> to vector<1x1x4x128xf32>
    tpu.vector_store %arg7[%c0_170, %c11_171, %c0_172, %c0_173], %483 {strides = array<i32>} : memref<1x24x4x128xf32, #tpu.memory_space<vmem>>, vector<1x1x4x128xf32>,
    %c0_174 = arith.constant 0 : index
    %c12_175 = arith.constant 12 : index
    %c0_176 = arith.constant 0 : index
    %c0_177 = arith.constant 0 : index
    %484 = vector.load %arg7[%c0_174, %c12_175, %c0_176, %c0_177] : memref<1x24x4x128xf32, #tpu.memory_space<vmem>>, vector<1x1x4x128xf32>
    %485 = vector.shape_cast %484 : vector<1x1x4x128xf32> to vector<4x128xf32>
    %486 = arith.mulf %212, %304 : vector<4x128xf32>
    %487 = arith.addf %485, %486 : vector<4x128xf32>
    %c0_178 = arith.constant 0 : index
    %c12_179 = arith.constant 12 : index
    %c0_180 = arith.constant 0 : index
    %c0_181 = arith.constant 0 : index
    %488 = vector.load %arg7[%c0_178, %c12_179, %c0_180, %c0_181] : memref<1x24x4x128xf32, #tpu.memory_space<vmem>>, vector<1x1x4x128xf32>
    %489 = vector.shape_cast %488 : vector<1x1x4x128xf32> to vector<4x128xf32>
    %490 = vector.shape_cast %487 : vector<4x128xf32> to vector<1x1x4x128xf32>
    tpu.vector_store %arg7[%c0_178, %c12_179, %c0_180, %c0_181], %490 {strides = array<i32>} : memref<1x24x4x128xf32, #tpu.memory_space<vmem>>, vector<1x1x4x128xf32>,
    %c0_182 = arith.constant 0 : index
    %c13_183 = arith.constant 13 : index
    %c0_184 = arith.constant 0 : index
    %c0_185 = arith.constant 0 : index
    %491 = vector.load %arg7[%c0_182, %c13_183, %c0_184, %c0_185] : memref<1x24x4x128xf32, #tpu.memory_space<vmem>>, vector<1x1x4x128xf32>
    %492 = vector.shape_cast %491 : vector<1x1x4x128xf32> to vector<4x128xf32>
    %493 = arith.mulf %213, %305 : vector<4x128xf32>
    %494 = arith.addf %492, %493 : vector<4x128xf32>
    %c0_186 = arith.constant 0 : index
    %c13_187 = arith.constant 13 : index
    %c0_188 = arith.constant 0 : index
    %c0_189 = arith.constant 0 : index
    %495 = vector.load %arg7[%c0_186, %c13_187, %c0_188, %c0_189] : memref<1x24x4x128xf32, #tpu.memory_space<vmem>>, vector<1x1x4x128xf32>
    %496 = vector.shape_cast %495 : vector<1x1x4x128xf32> to vector<4x128xf32>
    %497 = vector.shape_cast %494 : vector<4x128xf32> to vector<1x1x4x128xf32>
    tpu.vector_store %arg7[%c0_186, %c13_187, %c0_188, %c0_189], %497 {strides = array<i32>} : memref<1x24x4x128xf32, #tpu.memory_space<vmem>>, vector<1x1x4x128xf32>,
    %c0_190 = arith.constant 0 : index
    %c14_191 = arith.constant 14 : index
    %c0_192 = arith.constant 0 : index
    %c0_193 = arith.constant 0 : index
    %498 = vector.load %arg7[%c0_190, %c14_191, %c0_192, %c0_193] : memref<1x24x4x128xf32, #tpu.memory_space<vmem>>, vector<1x1x4x128xf32>
    %499 = vector.shape_cast %498 : vector<1x1x4x128xf32> to vector<4x128xf32>
    %500 = arith.mulf %214, %306 : vector<4x128xf32>
    %501 = arith.addf %499, %500 : vector<4x128xf32>
    %c0_194 = arith.constant 0 : index
    %c14_195 = arith.constant 14 : index
    %c0_196 = arith.constant 0 : index
    %c0_197 = arith.constant 0 : index
    %502 = vector.load %arg7[%c0_194, %c14_195, %c0_196, %c0_197] : memref<1x24x4x128xf32, #tpu.memory_space<vmem>>, vector<1x1x4x128xf32>
    %503 = vector.shape_cast %502 : vector<1x1x4x128xf32> to vector<4x128xf32>
    %504 = vector.shape_cast %501 : vector<4x128xf32> to vector<1x1x4x128xf32>
    tpu.vector_store %arg7[%c0_194, %c14_195, %c0_196, %c0_197], %504 {strides = array<i32>} : memref<1x24x4x128xf32, #tpu.memory_space<vmem>>, vector<1x1x4x128xf32>,
    %c0_198 = arith.constant 0 : index
    %c15_199 = arith.constant 15 : index
    %c0_200 = arith.constant 0 : index
    %c0_201 = arith.constant 0 : index
    %505 = vector.load %arg7[%c0_198, %c15_199, %c0_200, %c0_201] : memref<1x24x4x128xf32, #tpu.memory_space<vmem>>, vector<1x1x4x128xf32>
    %506 = vector.shape_cast %505 : vector<1x1x4x128xf32> to vector<4x128xf32>
    %507 = arith.mulf %215, %307 : vector<4x128xf32>
    %508 = arith.addf %506, %507 : vector<4x128xf32>
    %c0_202 = arith.constant 0 : index
    %c15_203 = arith.constant 15 : index
    %c0_204 = arith.constant 0 : index
    %c0_205 = arith.constant 0 : index
    %509 = vector.load %arg7[%c0_202, %c15_203, %c0_204, %c0_205] : memref<1x24x4x128xf32, #tpu.memory_space<vmem>>, vector<1x1x4x128xf32>
    %510 = vector.shape_cast %509 : vector<1x1x4x128xf32> to vector<4x128xf32>
    %511 = vector.shape_cast %508 : vector<4x128xf32> to vector<1x1x4x128xf32>
    tpu.vector_store %arg7[%c0_202, %c15_203, %c0_204, %c0_205], %511 {strides = array<i32>} : memref<1x24x4x128xf32, #tpu.memory_space<vmem>>, vector<1x1x4x128xf32>,
    %c0_206 = arith.constant 0 : index
    %c16_207 = arith.constant 16 : index
    %c0_208 = arith.constant 0 : index
    %c0_209 = arith.constant 0 : index
    %512 = vector.load %arg7[%c0_206, %c16_207, %c0_208, %c0_209] : memref<1x24x4x128xf32, #tpu.memory_space<vmem>>, vector<1x1x4x128xf32>
    %513 = vector.shape_cast %512 : vector<1x1x4x128xf32> to vector<4x128xf32>
    %514 = arith.mulf %304, %304 : vector<4x128xf32>
    %515 = arith.addf %513, %514 : vector<4x128xf32>
    %c0_210 = arith.constant 0 : index
    %c16_211 = arith.constant 16 : index
    %c0_212 = arith.constant 0 : index
    %c0_213 = arith.constant 0 : index
    %516 = vector.load %arg7[%c0_210, %c16_211, %c0_212, %c0_213] : memref<1x24x4x128xf32, #tpu.memory_space<vmem>>, vector<1x1x4x128xf32>
    %517 = vector.shape_cast %516 : vector<1x1x4x128xf32> to vector<4x128xf32>
    %518 = vector.shape_cast %515 : vector<4x128xf32> to vector<1x1x4x128xf32>
    tpu.vector_store %arg7[%c0_210, %c16_211, %c0_212, %c0_213], %518 {strides = array<i32>} : memref<1x24x4x128xf32, #tpu.memory_space<vmem>>, vector<1x1x4x128xf32>,
    %c0_214 = arith.constant 0 : index
    %c17_215 = arith.constant 17 : index
    %c0_216 = arith.constant 0 : index
    %c0_217 = arith.constant 0 : index
    %519 = vector.load %arg7[%c0_214, %c17_215, %c0_216, %c0_217] : memref<1x24x4x128xf32, #tpu.memory_space<vmem>>, vector<1x1x4x128xf32>
    %520 = vector.shape_cast %519 : vector<1x1x4x128xf32> to vector<4x128xf32>
    %521 = arith.mulf %305, %305 : vector<4x128xf32>
    %522 = arith.addf %520, %521 : vector<4x128xf32>
    %c0_218 = arith.constant 0 : index
    %c17_219 = arith.constant 17 : index
    %c0_220 = arith.constant 0 : index
    %c0_221 = arith.constant 0 : index
    %523 = vector.load %arg7[%c0_218, %c17_219, %c0_220, %c0_221] : memref<1x24x4x128xf32, #tpu.memory_space<vmem>>, vector<1x1x4x128xf32>
    %524 = vector.shape_cast %523 : vector<1x1x4x128xf32> to vector<4x128xf32>
    %525 = vector.shape_cast %522 : vector<4x128xf32> to vector<1x1x4x128xf32>
    tpu.vector_store %arg7[%c0_218, %c17_219, %c0_220, %c0_221], %525 {strides = array<i32>} : memref<1x24x4x128xf32, #tpu.memory_space<vmem>>, vector<1x1x4x128xf32>,
    %c0_222 = arith.constant 0 : index
    %c18_223 = arith.constant 18 : index
    %c0_224 = arith.constant 0 : index
    %c0_225 = arith.constant 0 : index
    %526 = vector.load %arg7[%c0_222, %c18_223, %c0_224, %c0_225] : memref<1x24x4x128xf32, #tpu.memory_space<vmem>>, vector<1x1x4x128xf32>
    %527 = vector.shape_cast %526 : vector<1x1x4x128xf32> to vector<4x128xf32>
    %528 = arith.mulf %306, %306 : vector<4x128xf32>
    %529 = arith.addf %527, %528 : vector<4x128xf32>
    %c0_226 = arith.constant 0 : index
    %c18_227 = arith.constant 18 : index
    %c0_228 = arith.constant 0 : index
    %c0_229 = arith.constant 0 : index
    %530 = vector.load %arg7[%c0_226, %c18_227, %c0_228, %c0_229] : memref<1x24x4x128xf32, #tpu.memory_space<vmem>>, vector<1x1x4x128xf32>
    %531 = vector.shape_cast %530 : vector<1x1x4x128xf32> to vector<4x128xf32>
    %532 = vector.shape_cast %529 : vector<4x128xf32> to vector<1x1x4x128xf32>
    tpu.vector_store %arg7[%c0_226, %c18_227, %c0_228, %c0_229], %532 {strides = array<i32>} : memref<1x24x4x128xf32, #tpu.memory_space<vmem>>, vector<1x1x4x128xf32>,
    %c0_230 = arith.constant 0 : index
    %c19_231 = arith.constant 19 : index
    %c0_232 = arith.constant 0 : index
    %c0_233 = arith.constant 0 : index
    %533 = vector.load %arg7[%c0_230, %c19_231, %c0_232, %c0_233] : memref<1x24x4x128xf32, #tpu.memory_space<vmem>>, vector<1x1x4x128xf32>
    %534 = vector.shape_cast %533 : vector<1x1x4x128xf32> to vector<4x128xf32>
    %535 = arith.mulf %307, %307 : vector<4x128xf32>
    %536 = arith.addf %534, %535 : vector<4x128xf32>
    %c0_234 = arith.constant 0 : index
    %c19_235 = arith.constant 19 : index
    %c0_236 = arith.constant 0 : index
    %c0_237 = arith.constant 0 : index
    %537 = vector.load %arg7[%c0_234, %c19_235, %c0_236, %c0_237] : memref<1x24x4x128xf32, #tpu.memory_space<vmem>>, vector<1x1x4x128xf32>
    %538 = vector.shape_cast %537 : vector<1x1x4x128xf32> to vector<4x128xf32>
    %539 = vector.shape_cast %536 : vector<4x128xf32> to vector<1x1x4x128xf32>
    tpu.vector_store %arg7[%c0_234, %c19_235, %c0_236, %c0_237], %539 {strides = array<i32>} : memref<1x24x4x128xf32, #tpu.memory_space<vmem>>, vector<1x1x4x128xf32>,
    %c0_238 = arith.constant 0 : index
    %c20_239 = arith.constant 20 : index
    %c0_240 = arith.constant 0 : index
    %c0_241 = arith.constant 0 : index
    %540 = vector.load %arg7[%c0_238, %c20_239, %c0_240, %c0_241] : memref<1x24x4x128xf32, #tpu.memory_space<vmem>>, vector<1x1x4x128xf32>
    %541 = vector.shape_cast %540 : vector<1x1x4x128xf32> to vector<4x128xf32>
    %542 = arith.mulf %396, %396 : vector<4x128xf32>
    %543 = arith.addf %541, %542 : vector<4x128xf32>
    %c0_242 = arith.constant 0 : index
    %c20_243 = arith.constant 20 : index
    %c0_244 = arith.constant 0 : index
    %c0_245 = arith.constant 0 : index
    %544 = vector.load %arg7[%c0_242, %c20_243, %c0_244, %c0_245] : memref<1x24x4x128xf32, #tpu.memory_space<vmem>>, vector<1x1x4x128xf32>
    %545 = vector.shape_cast %544 : vector<1x1x4x128xf32> to vector<4x128xf32>
    %546 = vector.shape_cast %543 : vector<4x128xf32> to vector<1x1x4x128xf32>
    tpu.vector_store %arg7[%c0_242, %c20_243, %c0_244, %c0_245], %546 {strides = array<i32>} : memref<1x24x4x128xf32, #tpu.memory_space<vmem>>, vector<1x1x4x128xf32>,
    %c0_246 = arith.constant 0 : index
    %c21_247 = arith.constant 21 : index
    %c0_248 = arith.constant 0 : index
    %c0_249 = arith.constant 0 : index
    %547 = vector.load %arg7[%c0_246, %c21_247, %c0_248, %c0_249] : memref<1x24x4x128xf32, #tpu.memory_space<vmem>>, vector<1x1x4x128xf32>
    %548 = vector.shape_cast %547 : vector<1x1x4x128xf32> to vector<4x128xf32>
    %549 = arith.mulf %397, %397 : vector<4x128xf32>
    %550 = arith.addf %548, %549 : vector<4x128xf32>
    %c0_250 = arith.constant 0 : index
    %c21_251 = arith.constant 21 : index
    %c0_252 = arith.constant 0 : index
    %c0_253 = arith.constant 0 : index
    %551 = vector.load %arg7[%c0_250, %c21_251, %c0_252, %c0_253] : memref<1x24x4x128xf32, #tpu.memory_space<vmem>>, vector<1x1x4x128xf32>
    %552 = vector.shape_cast %551 : vector<1x1x4x128xf32> to vector<4x128xf32>
    %553 = vector.shape_cast %550 : vector<4x128xf32> to vector<1x1x4x128xf32>
    tpu.vector_store %arg7[%c0_250, %c21_251, %c0_252, %c0_253], %553 {strides = array<i32>} : memref<1x24x4x128xf32, #tpu.memory_space<vmem>>, vector<1x1x4x128xf32>,
    %c0_254 = arith.constant 0 : index
    %c22_255 = arith.constant 22 : index
    %c0_256 = arith.constant 0 : index
    %c0_257 = arith.constant 0 : index
    %554 = vector.load %arg7[%c0_254, %c22_255, %c0_256, %c0_257] : memref<1x24x4x128xf32, #tpu.memory_space<vmem>>, vector<1x1x4x128xf32>
    %555 = vector.shape_cast %554 : vector<1x1x4x128xf32> to vector<4x128xf32>
    %556 = arith.mulf %398, %398 : vector<4x128xf32>
    %557 = arith.addf %555, %556 : vector<4x128xf32>
    %c0_258 = arith.constant 0 : index
    %c22_259 = arith.constant 22 : index
    %c0_260 = arith.constant 0 : index
    %c0_261 = arith.constant 0 : index
    %558 = vector.load %arg7[%c0_258, %c22_259, %c0_260, %c0_261] : memref<1x24x4x128xf32, #tpu.memory_space<vmem>>, vector<1x1x4x128xf32>
    %559 = vector.shape_cast %558 : vector<1x1x4x128xf32> to vector<4x128xf32>
    %560 = vector.shape_cast %557 : vector<4x128xf32> to vector<1x1x4x128xf32>
    tpu.vector_store %arg7[%c0_258, %c22_259, %c0_260, %c0_261], %560 {strides = array<i32>} : memref<1x24x4x128xf32, #tpu.memory_space<vmem>>, vector<1x1x4x128xf32>,
    %c0_262 = arith.constant 0 : index
    %c23_263 = arith.constant 23 : index
    %c0_264 = arith.constant 0 : index
    %c0_265 = arith.constant 0 : index
    %561 = vector.load %arg7[%c0_262, %c23_263, %c0_264, %c0_265] : memref<1x24x4x128xf32, #tpu.memory_space<vmem>>, vector<1x1x4x128xf32>
    %562 = vector.shape_cast %561 : vector<1x1x4x128xf32> to vector<4x128xf32>
    %563 = arith.mulf %399, %399 : vector<4x128xf32>
    %564 = arith.addf %562, %563 : vector<4x128xf32>
    %c0_266 = arith.constant 0 : index
    %c23_267 = arith.constant 23 : index
    %c0_268 = arith.constant 0 : index
    %c0_269 = arith.constant 0 : index
    %565 = vector.load %arg7[%c0_266, %c23_267, %c0_268, %c0_269] : memref<1x24x4x128xf32, #tpu.memory_space<vmem>>, vector<1x1x4x128xf32>
    %566 = vector.shape_cast %565 : vector<1x1x4x128xf32> to vector<4x128xf32>
    %567 = vector.shape_cast %564 : vector<4x128xf32> to vector<1x1x4x128xf32>
    tpu.vector_store %arg7[%c0_266, %c23_267, %c0_268, %c0_269], %567 {strides = array<i32>} : memref<1x24x4x128xf32, #tpu.memory_space<vmem>>, vector<1x1x4x128xf32>,
    return
  }
  func.func @transform_0(%arg0: i32, %arg1: i32) -> (i32, i32, i32) {
    %c1_i32 = arith.constant 1 : i32
    %0 = arith.muli %arg0, %c1_i32 : i32
    %1 = arith.addi %0, %arg1 : i32
    %c0_i32 = arith.constant 0 : i32
    %c0_i32_0 = arith.constant 0 : i32
    %c0_i32_1 = arith.constant 0 : i32
    return %c0_i32, %1, %c0_i32_0 : i32, i32, i32
  }
  func.func @transform_1(%arg0: i32, %arg1: i32) -> (i32, i32, i32) {
    %c1_i32 = arith.constant 1 : i32
    %0 = arith.muli %arg0, %c1_i32 : i32
    %1 = arith.addi %0, %arg1 : i32
    %c0_i32 = arith.constant 0 : i32
    %c0_i32_0 = arith.constant 0 : i32
    %c0_i32_1 = arith.constant 0 : i32
    return %c0_i32, %1, %c0_i32_0 : i32, i32, i32
  }
  func.func @transform_2(%arg0: i32, %arg1: i32) -> (i32, i32) {
    %c1_i32 = arith.constant 1 : i32
    %0 = arith.muli %arg0, %c1_i32 : i32
    %1 = arith.addi %0, %arg1 : i32
    %c0_i32 = arith.constant 0 : i32
    %c0_i32_0 = arith.constant 0 : i32
    return %1, %c0_i32 : i32, i32
  }
  func.func @transform_3(%arg0: i32, %arg1: i32) -> i32 {
    %c0_i32 = arith.constant 0 : i32
    %c0_i32_0 = arith.constant 0 : i32
    return %c0_i32 : i32
  }
  func.func @transform_4(%arg0: i32, %arg1: i32) -> i32 {
    %c0_i32 = arith.constant 0 : i32
    %c0_i32_0 = arith.constant 0 : i32
    return %c0_i32 : i32
  }
  func.func @transform_5(%arg0: i32, %arg1: i32) -> (i32, i32, i32, i32) {
    %c0_i32 = arith.constant 0 : i32
    %c0_i32_0 = arith.constant 0 : i32
    %c0_i32_1 = arith.constant 0 : i32
    %c0_i32_2 = arith.constant 0 : i32
    return %arg0, %c0_i32, %c0_i32_0, %c0_i32_1 : i32, i32, i32, i32
  }
}

module attributes {stable_mosaic.version = 11 : i64} {
  func.func @_grad_kernel(%arg0: i32, %arg1: memref<4x4x128xf32, #tpu.memory_space<vmem>>, %arg2: memref<4x4x128xf32, #tpu.memory_space<vmem>>, %arg3: memref<4x1xf32, #tpu.memory_space<vmem>>, %arg4: memref<32xf32, #tpu.memory_space<smem>>, %arg5: memref<8xf32, #tpu.memory_space<smem>>, %arg6: memref<8xf32, #tpu.memory_space<smem>>, %arg7: memref<8xf32, #tpu.memory_space<smem>>, %arg8: memref<4x4x128xf32, #tpu.memory_space<vmem>>) attributes {dimension_semantics = [#tpu.dimension_semantics<parallel>], iteration_bounds = array<i64: 1>, scalar_prefetch = 0 : i64, scratch_operands = 0 : i64, tpu.core_type = #tpu.core_type<tc>, window_params = [{transform_indices = @transform_0, window_bounds = array<i64: 4, 4, 128>}, {transform_indices = @transform_1, window_bounds = array<i64: 4, 4, 128>}, {transform_indices = @transform_2, window_bounds = array<i64: 4, 1>}, {transform_indices = @transform_3, window_bounds = array<i64: 32>}, {transform_indices = @transform_4, window_bounds = array<i64: 8>}, {transform_indices = @transform_5, window_bounds = array<i64: 8>}, {transform_indices = @transform_6, window_bounds = array<i64: 8>}, {transform_indices = @transform_7, window_bounds = array<i64: 4, 4, 128>}]} {
    %c0 = arith.constant 0 : index
    %c0_0 = arith.constant 0 : index
    %0 = vector.load %arg3[%c0, %c0_0] : memref<4x1xf32, #tpu.memory_space<vmem>>, vector<4x1xf32>
    %c0_1 = arith.constant 0 : index
    %c0_2 = arith.constant 0 : index
    %c0_3 = arith.constant 0 : index
    %1 = vector.load %arg1[%c0_1, %c0_2, %c0_3] : memref<4x4x128xf32, #tpu.memory_space<vmem>>, vector<1x4x128xf32>
    %2 = vector.shape_cast %1 : vector<1x4x128xf32> to vector<4x128xf32>
    %c1 = arith.constant 1 : index
    %c0_4 = arith.constant 0 : index
    %c0_5 = arith.constant 0 : index
    %3 = vector.load %arg1[%c1, %c0_4, %c0_5] : memref<4x4x128xf32, #tpu.memory_space<vmem>>, vector<1x4x128xf32>
    %4 = vector.shape_cast %3 : vector<1x4x128xf32> to vector<4x128xf32>
    %c2 = arith.constant 2 : index
    %c0_6 = arith.constant 0 : index
    %c0_7 = arith.constant 0 : index
    %5 = vector.load %arg1[%c2, %c0_6, %c0_7] : memref<4x4x128xf32, #tpu.memory_space<vmem>>, vector<1x4x128xf32>
    %6 = vector.shape_cast %5 : vector<1x4x128xf32> to vector<4x128xf32>
    %c3 = arith.constant 3 : index
    %c0_8 = arith.constant 0 : index
    %c0_9 = arith.constant 0 : index
    %7 = vector.load %arg1[%c3, %c0_8, %c0_9] : memref<4x4x128xf32, #tpu.memory_space<vmem>>, vector<1x4x128xf32>
    %8 = vector.shape_cast %7 : vector<1x4x128xf32> to vector<4x128xf32>
    %c0_10 = arith.constant 0 : index
    %c0_11 = arith.constant 0 : index
    %c0_12 = arith.constant 0 : index
    %9 = vector.load %arg2[%c0_10, %c0_11, %c0_12] : memref<4x4x128xf32, #tpu.memory_space<vmem>>, vector<1x4x128xf32>
    %10 = vector.shape_cast %9 : vector<1x4x128xf32> to vector<4x128xf32>
    %11 = vector.broadcast %0 : vector<4x1xf32> to vector<4x128xf32>
    %12 = arith.mulf %11, %10 : vector<4x128xf32>
    %13 = arith.addf %2, %12 : vector<4x128xf32>
    %c1_13 = arith.constant 1 : index
    %c0_14 = arith.constant 0 : index
    %c0_15 = arith.constant 0 : index
    %14 = vector.load %arg2[%c1_13, %c0_14, %c0_15] : memref<4x4x128xf32, #tpu.memory_space<vmem>>, vector<1x4x128xf32>
    %15 = vector.shape_cast %14 : vector<1x4x128xf32> to vector<4x128xf32>
    %16 = vector.broadcast %0 : vector<4x1xf32> to vector<4x128xf32>
    %17 = arith.mulf %16, %15 : vector<4x128xf32>
    %18 = arith.addf %4, %17 : vector<4x128xf32>
    %c2_16 = arith.constant 2 : index
    %c0_17 = arith.constant 0 : index
    %c0_18 = arith.constant 0 : index
    %19 = vector.load %arg2[%c2_16, %c0_17, %c0_18] : memref<4x4x128xf32, #tpu.memory_space<vmem>>, vector<1x4x128xf32>
    %20 = vector.shape_cast %19 : vector<1x4x128xf32> to vector<4x128xf32>
    %21 = vector.broadcast %0 : vector<4x1xf32> to vector<4x128xf32>
    %22 = arith.mulf %21, %20 : vector<4x128xf32>
    %23 = arith.addf %6, %22 : vector<4x128xf32>
    %c3_19 = arith.constant 3 : index
    %c0_20 = arith.constant 0 : index
    %c0_21 = arith.constant 0 : index
    %24 = vector.load %arg2[%c3_19, %c0_20, %c0_21] : memref<4x4x128xf32, #tpu.memory_space<vmem>>, vector<1x4x128xf32>
    %25 = vector.shape_cast %24 : vector<1x4x128xf32> to vector<4x128xf32>
    %26 = vector.broadcast %0 : vector<4x1xf32> to vector<4x128xf32>
    %27 = arith.mulf %26, %25 : vector<4x128xf32>
    %28 = arith.addf %8, %27 : vector<4x128xf32>
    %c0_22 = arith.constant 0 : index
    %29 = memref.load %arg4[%c0_22] : memref<32xf32, #tpu.memory_space<smem>>
    %30 = vector.broadcast %29 : f32 to vector<4x128xf32>
    %31 = arith.mulf %30, %13 : vector<4x128xf32>
    %c1_23 = arith.constant 1 : index
    %32 = memref.load %arg4[%c1_23] : memref<32xf32, #tpu.memory_space<smem>>
    %33 = vector.broadcast %32 : f32 to vector<4x128xf32>
    %34 = arith.mulf %33, %18 : vector<4x128xf32>
    %35 = arith.addf %31, %34 : vector<4x128xf32>
    %c2_24 = arith.constant 2 : index
    %36 = memref.load %arg4[%c2_24] : memref<32xf32, #tpu.memory_space<smem>>
    %37 = vector.broadcast %36 : f32 to vector<4x128xf32>
    %38 = arith.mulf %37, %23 : vector<4x128xf32>
    %39 = arith.addf %35, %38 : vector<4x128xf32>
    %c3_25 = arith.constant 3 : index
    %40 = memref.load %arg4[%c3_25] : memref<32xf32, #tpu.memory_space<smem>>
    %41 = vector.broadcast %40 : f32 to vector<4x128xf32>
    %42 = arith.mulf %41, %28 : vector<4x128xf32>
    %43 = arith.addf %39, %42 : vector<4x128xf32>
    %c0_26 = arith.constant 0 : index
    %44 = memref.load %arg5[%c0_26] : memref<8xf32, #tpu.memory_space<smem>>
    %45 = vector.broadcast %44 : f32 to vector<4x128xf32>
    %46 = arith.addf %43, %45 : vector<4x128xf32>
    %c4 = arith.constant 4 : index
    %47 = memref.load %arg4[%c4] : memref<32xf32, #tpu.memory_space<smem>>
    %48 = vector.broadcast %47 : f32 to vector<4x128xf32>
    %49 = arith.mulf %48, %13 : vector<4x128xf32>
    %c5 = arith.constant 5 : index
    %50 = memref.load %arg4[%c5] : memref<32xf32, #tpu.memory_space<smem>>
    %51 = vector.broadcast %50 : f32 to vector<4x128xf32>
    %52 = arith.mulf %51, %18 : vector<4x128xf32>
    %53 = arith.addf %49, %52 : vector<4x128xf32>
    %c6 = arith.constant 6 : index
    %54 = memref.load %arg4[%c6] : memref<32xf32, #tpu.memory_space<smem>>
    %55 = vector.broadcast %54 : f32 to vector<4x128xf32>
    %56 = arith.mulf %55, %23 : vector<4x128xf32>
    %57 = arith.addf %53, %56 : vector<4x128xf32>
    %c7 = arith.constant 7 : index
    %58 = memref.load %arg4[%c7] : memref<32xf32, #tpu.memory_space<smem>>
    %59 = vector.broadcast %58 : f32 to vector<4x128xf32>
    %60 = arith.mulf %59, %28 : vector<4x128xf32>
    %61 = arith.addf %57, %60 : vector<4x128xf32>
    %c1_27 = arith.constant 1 : index
    %62 = memref.load %arg5[%c1_27] : memref<8xf32, #tpu.memory_space<smem>>
    %63 = vector.broadcast %62 : f32 to vector<4x128xf32>
    %64 = arith.addf %61, %63 : vector<4x128xf32>
    %c8 = arith.constant 8 : index
    %65 = memref.load %arg4[%c8] : memref<32xf32, #tpu.memory_space<smem>>
    %66 = vector.broadcast %65 : f32 to vector<4x128xf32>
    %67 = arith.mulf %66, %13 : vector<4x128xf32>
    %c9 = arith.constant 9 : index
    %68 = memref.load %arg4[%c9] : memref<32xf32, #tpu.memory_space<smem>>
    %69 = vector.broadcast %68 : f32 to vector<4x128xf32>
    %70 = arith.mulf %69, %18 : vector<4x128xf32>
    %71 = arith.addf %67, %70 : vector<4x128xf32>
    %c10 = arith.constant 10 : index
    %72 = memref.load %arg4[%c10] : memref<32xf32, #tpu.memory_space<smem>>
    %73 = vector.broadcast %72 : f32 to vector<4x128xf32>
    %74 = arith.mulf %73, %23 : vector<4x128xf32>
    %75 = arith.addf %71, %74 : vector<4x128xf32>
    %c11 = arith.constant 11 : index
    %76 = memref.load %arg4[%c11] : memref<32xf32, #tpu.memory_space<smem>>
    %77 = vector.broadcast %76 : f32 to vector<4x128xf32>
    %78 = arith.mulf %77, %28 : vector<4x128xf32>
    %79 = arith.addf %75, %78 : vector<4x128xf32>
    %c2_28 = arith.constant 2 : index
    %80 = memref.load %arg5[%c2_28] : memref<8xf32, #tpu.memory_space<smem>>
    %81 = vector.broadcast %80 : f32 to vector<4x128xf32>
    %82 = arith.addf %79, %81 : vector<4x128xf32>
    %c12 = arith.constant 12 : index
    %83 = memref.load %arg4[%c12] : memref<32xf32, #tpu.memory_space<smem>>
    %84 = vector.broadcast %83 : f32 to vector<4x128xf32>
    %85 = arith.mulf %84, %13 : vector<4x128xf32>
    %c13 = arith.constant 13 : index
    %86 = memref.load %arg4[%c13] : memref<32xf32, #tpu.memory_space<smem>>
    %87 = vector.broadcast %86 : f32 to vector<4x128xf32>
    %88 = arith.mulf %87, %18 : vector<4x128xf32>
    %89 = arith.addf %85, %88 : vector<4x128xf32>
    %c14 = arith.constant 14 : index
    %90 = memref.load %arg4[%c14] : memref<32xf32, #tpu.memory_space<smem>>
    %91 = vector.broadcast %90 : f32 to vector<4x128xf32>
    %92 = arith.mulf %91, %23 : vector<4x128xf32>
    %93 = arith.addf %89, %92 : vector<4x128xf32>
    %c15 = arith.constant 15 : index
    %94 = memref.load %arg4[%c15] : memref<32xf32, #tpu.memory_space<smem>>
    %95 = vector.broadcast %94 : f32 to vector<4x128xf32>
    %96 = arith.mulf %95, %28 : vector<4x128xf32>
    %97 = arith.addf %93, %96 : vector<4x128xf32>
    %c3_29 = arith.constant 3 : index
    %98 = memref.load %arg5[%c3_29] : memref<8xf32, #tpu.memory_space<smem>>
    %99 = vector.broadcast %98 : f32 to vector<4x128xf32>
    %100 = arith.addf %97, %99 : vector<4x128xf32>
    %101 = arith.maximumf %46, %64 : vector<4x128xf32>
    %102 = arith.maximumf %101, %82 : vector<4x128xf32>
    %103 = arith.maximumf %102, %100 : vector<4x128xf32>
    %104 = arith.subf %46, %103 : vector<4x128xf32>
    %105 = math.exp %104 : vector<4x128xf32>
    %106 = arith.subf %64, %103 : vector<4x128xf32>
    %107 = math.exp %106 : vector<4x128xf32>
    %108 = arith.subf %82, %103 : vector<4x128xf32>
    %109 = math.exp %108 : vector<4x128xf32>
    %110 = arith.subf %100, %103 : vector<4x128xf32>
    %111 = math.exp %110 : vector<4x128xf32>
    %112 = arith.addf %105, %107 : vector<4x128xf32>
    %113 = arith.addf %112, %109 : vector<4x128xf32>
    %114 = arith.addf %113, %111 : vector<4x128xf32>
    %115 = tpu.reciprocal %114 {approx = true} : vector<4x128xf32> -> vector<4x128xf32>
    %116 = arith.mulf %105, %115 : vector<4x128xf32>
    %117 = arith.mulf %107, %115 : vector<4x128xf32>
    %118 = arith.mulf %109, %115 : vector<4x128xf32>
    %119 = arith.mulf %111, %115 : vector<4x128xf32>
    %c16 = arith.constant 16 : index
    %120 = memref.load %arg4[%c16] : memref<32xf32, #tpu.memory_space<smem>>
    %121 = vector.broadcast %120 : f32 to vector<4x128xf32>
    %122 = arith.mulf %121, %13 : vector<4x128xf32>
    %c17 = arith.constant 17 : index
    %123 = memref.load %arg4[%c17] : memref<32xf32, #tpu.memory_space<smem>>
    %124 = vector.broadcast %123 : f32 to vector<4x128xf32>
    %125 = arith.mulf %124, %18 : vector<4x128xf32>
    %126 = arith.addf %122, %125 : vector<4x128xf32>
    %c18 = arith.constant 18 : index
    %127 = memref.load %arg4[%c18] : memref<32xf32, #tpu.memory_space<smem>>
    %128 = vector.broadcast %127 : f32 to vector<4x128xf32>
    %129 = arith.mulf %128, %23 : vector<4x128xf32>
    %130 = arith.addf %126, %129 : vector<4x128xf32>
    %c19 = arith.constant 19 : index
    %131 = memref.load %arg4[%c19] : memref<32xf32, #tpu.memory_space<smem>>
    %132 = vector.broadcast %131 : f32 to vector<4x128xf32>
    %133 = arith.mulf %132, %28 : vector<4x128xf32>
    %134 = arith.addf %130, %133 : vector<4x128xf32>
    %c4_30 = arith.constant 4 : index
    %135 = memref.load %arg5[%c4_30] : memref<8xf32, #tpu.memory_space<smem>>
    %136 = vector.broadcast %135 : f32 to vector<4x128xf32>
    %137 = arith.addf %134, %136 : vector<4x128xf32>
    %c20 = arith.constant 20 : index
    %138 = memref.load %arg4[%c20] : memref<32xf32, #tpu.memory_space<smem>>
    %139 = vector.broadcast %138 : f32 to vector<4x128xf32>
    %140 = arith.mulf %139, %13 : vector<4x128xf32>
    %c21 = arith.constant 21 : index
    %141 = memref.load %arg4[%c21] : memref<32xf32, #tpu.memory_space<smem>>
    %142 = vector.broadcast %141 : f32 to vector<4x128xf32>
    %143 = arith.mulf %142, %18 : vector<4x128xf32>
    %144 = arith.addf %140, %143 : vector<4x128xf32>
    %c22 = arith.constant 22 : index
    %145 = memref.load %arg4[%c22] : memref<32xf32, #tpu.memory_space<smem>>
    %146 = vector.broadcast %145 : f32 to vector<4x128xf32>
    %147 = arith.mulf %146, %23 : vector<4x128xf32>
    %148 = arith.addf %144, %147 : vector<4x128xf32>
    %c23 = arith.constant 23 : index
    %149 = memref.load %arg4[%c23] : memref<32xf32, #tpu.memory_space<smem>>
    %150 = vector.broadcast %149 : f32 to vector<4x128xf32>
    %151 = arith.mulf %150, %28 : vector<4x128xf32>
    %152 = arith.addf %148, %151 : vector<4x128xf32>
    %c5_31 = arith.constant 5 : index
    %153 = memref.load %arg5[%c5_31] : memref<8xf32, #tpu.memory_space<smem>>
    %154 = vector.broadcast %153 : f32 to vector<4x128xf32>
    %155 = arith.addf %152, %154 : vector<4x128xf32>
    %c24 = arith.constant 24 : index
    %156 = memref.load %arg4[%c24] : memref<32xf32, #tpu.memory_space<smem>>
    %157 = vector.broadcast %156 : f32 to vector<4x128xf32>
    %158 = arith.mulf %157, %13 : vector<4x128xf32>
    %c25 = arith.constant 25 : index
    %159 = memref.load %arg4[%c25] : memref<32xf32, #tpu.memory_space<smem>>
    %160 = vector.broadcast %159 : f32 to vector<4x128xf32>
    %161 = arith.mulf %160, %18 : vector<4x128xf32>
    %162 = arith.addf %158, %161 : vector<4x128xf32>
    %c26 = arith.constant 26 : index
    %163 = memref.load %arg4[%c26] : memref<32xf32, #tpu.memory_space<smem>>
    %164 = vector.broadcast %163 : f32 to vector<4x128xf32>
    %165 = arith.mulf %164, %23 : vector<4x128xf32>
    %166 = arith.addf %162, %165 : vector<4x128xf32>
    %c27 = arith.constant 27 : index
    %167 = memref.load %arg4[%c27] : memref<32xf32, #tpu.memory_space<smem>>
    %168 = vector.broadcast %167 : f32 to vector<4x128xf32>
    %169 = arith.mulf %168, %28 : vector<4x128xf32>
    %170 = arith.addf %166, %169 : vector<4x128xf32>
    %c6_32 = arith.constant 6 : index
    %171 = memref.load %arg5[%c6_32] : memref<8xf32, #tpu.memory_space<smem>>
    %172 = vector.broadcast %171 : f32 to vector<4x128xf32>
    %173 = arith.addf %170, %172 : vector<4x128xf32>
    %c28 = arith.constant 28 : index
    %174 = memref.load %arg4[%c28] : memref<32xf32, #tpu.memory_space<smem>>
    %175 = vector.broadcast %174 : f32 to vector<4x128xf32>
    %176 = arith.mulf %175, %13 : vector<4x128xf32>
    %c29 = arith.constant 29 : index
    %177 = memref.load %arg4[%c29] : memref<32xf32, #tpu.memory_space<smem>>
    %178 = vector.broadcast %177 : f32 to vector<4x128xf32>
    %179 = arith.mulf %178, %18 : vector<4x128xf32>
    %180 = arith.addf %176, %179 : vector<4x128xf32>
    %c30 = arith.constant 30 : index
    %181 = memref.load %arg4[%c30] : memref<32xf32, #tpu.memory_space<smem>>
    %182 = vector.broadcast %181 : f32 to vector<4x128xf32>
    %183 = arith.mulf %182, %23 : vector<4x128xf32>
    %184 = arith.addf %180, %183 : vector<4x128xf32>
    %c31 = arith.constant 31 : index
    %185 = memref.load %arg4[%c31] : memref<32xf32, #tpu.memory_space<smem>>
    %186 = vector.broadcast %185 : f32 to vector<4x128xf32>
    %187 = arith.mulf %186, %28 : vector<4x128xf32>
    %188 = arith.addf %184, %187 : vector<4x128xf32>
    %c7_33 = arith.constant 7 : index
    %189 = memref.load %arg5[%c7_33] : memref<8xf32, #tpu.memory_space<smem>>
    %190 = vector.broadcast %189 : f32 to vector<4x128xf32>
    %191 = arith.addf %188, %190 : vector<4x128xf32>
    %192 = arith.maximumf %137, %155 : vector<4x128xf32>
    %193 = arith.maximumf %192, %173 : vector<4x128xf32>
    %194 = arith.maximumf %193, %191 : vector<4x128xf32>
    %195 = arith.subf %137, %194 : vector<4x128xf32>
    %196 = math.exp %195 : vector<4x128xf32>
    %197 = arith.subf %155, %194 : vector<4x128xf32>
    %198 = math.exp %197 : vector<4x128xf32>
    %199 = arith.subf %173, %194 : vector<4x128xf32>
    %200 = math.exp %199 : vector<4x128xf32>
    %201 = arith.subf %191, %194 : vector<4x128xf32>
    %202 = math.exp %201 : vector<4x128xf32>
    %203 = arith.addf %196, %198 : vector<4x128xf32>
    %204 = arith.addf %203, %200 : vector<4x128xf32>
    %205 = arith.addf %204, %202 : vector<4x128xf32>
    %206 = tpu.reciprocal %205 {approx = true} : vector<4x128xf32> -> vector<4x128xf32>
    %207 = arith.mulf %196, %206 : vector<4x128xf32>
    %208 = arith.mulf %198, %206 : vector<4x128xf32>
    %209 = arith.mulf %200, %206 : vector<4x128xf32>
    %210 = arith.mulf %202, %206 : vector<4x128xf32>
    %c0_34 = arith.constant 0 : index
    %211 = memref.load %arg4[%c0_34] : memref<32xf32, #tpu.memory_space<smem>>
    %212 = vector.broadcast %211 : f32 to vector<4x128xf32>
    %213 = arith.mulf %212, %2 : vector<4x128xf32>
    %c1_35 = arith.constant 1 : index
    %214 = memref.load %arg4[%c1_35] : memref<32xf32, #tpu.memory_space<smem>>
    %215 = vector.broadcast %214 : f32 to vector<4x128xf32>
    %216 = arith.mulf %215, %4 : vector<4x128xf32>
    %217 = arith.addf %213, %216 : vector<4x128xf32>
    %c2_36 = arith.constant 2 : index
    %218 = memref.load %arg4[%c2_36] : memref<32xf32, #tpu.memory_space<smem>>
    %219 = vector.broadcast %218 : f32 to vector<4x128xf32>
    %220 = arith.mulf %219, %6 : vector<4x128xf32>
    %221 = arith.addf %217, %220 : vector<4x128xf32>
    %c3_37 = arith.constant 3 : index
    %222 = memref.load %arg4[%c3_37] : memref<32xf32, #tpu.memory_space<smem>>
    %223 = vector.broadcast %222 : f32 to vector<4x128xf32>
    %224 = arith.mulf %223, %8 : vector<4x128xf32>
    %225 = arith.addf %221, %224 : vector<4x128xf32>
    %c0_38 = arith.constant 0 : index
    %226 = memref.load %arg5[%c0_38] : memref<8xf32, #tpu.memory_space<smem>>
    %227 = vector.broadcast %226 : f32 to vector<4x128xf32>
    %228 = arith.addf %225, %227 : vector<4x128xf32>
    %c4_39 = arith.constant 4 : index
    %229 = memref.load %arg4[%c4_39] : memref<32xf32, #tpu.memory_space<smem>>
    %230 = vector.broadcast %229 : f32 to vector<4x128xf32>
    %231 = arith.mulf %230, %2 : vector<4x128xf32>
    %c5_40 = arith.constant 5 : index
    %232 = memref.load %arg4[%c5_40] : memref<32xf32, #tpu.memory_space<smem>>
    %233 = vector.broadcast %232 : f32 to vector<4x128xf32>
    %234 = arith.mulf %233, %4 : vector<4x128xf32>
    %235 = arith.addf %231, %234 : vector<4x128xf32>
    %c6_41 = arith.constant 6 : index
    %236 = memref.load %arg4[%c6_41] : memref<32xf32, #tpu.memory_space<smem>>
    %237 = vector.broadcast %236 : f32 to vector<4x128xf32>
    %238 = arith.mulf %237, %6 : vector<4x128xf32>
    %239 = arith.addf %235, %238 : vector<4x128xf32>
    %c7_42 = arith.constant 7 : index
    %240 = memref.load %arg4[%c7_42] : memref<32xf32, #tpu.memory_space<smem>>
    %241 = vector.broadcast %240 : f32 to vector<4x128xf32>
    %242 = arith.mulf %241, %8 : vector<4x128xf32>
    %243 = arith.addf %239, %242 : vector<4x128xf32>
    %c1_43 = arith.constant 1 : index
    %244 = memref.load %arg5[%c1_43] : memref<8xf32, #tpu.memory_space<smem>>
    %245 = vector.broadcast %244 : f32 to vector<4x128xf32>
    %246 = arith.addf %243, %245 : vector<4x128xf32>
    %c8_44 = arith.constant 8 : index
    %247 = memref.load %arg4[%c8_44] : memref<32xf32, #tpu.memory_space<smem>>
    %248 = vector.broadcast %247 : f32 to vector<4x128xf32>
    %249 = arith.mulf %248, %2 : vector<4x128xf32>
    %c9_45 = arith.constant 9 : index
    %250 = memref.load %arg4[%c9_45] : memref<32xf32, #tpu.memory_space<smem>>
    %251 = vector.broadcast %250 : f32 to vector<4x128xf32>
    %252 = arith.mulf %251, %4 : vector<4x128xf32>
    %253 = arith.addf %249, %252 : vector<4x128xf32>
    %c10_46 = arith.constant 10 : index
    %254 = memref.load %arg4[%c10_46] : memref<32xf32, #tpu.memory_space<smem>>
    %255 = vector.broadcast %254 : f32 to vector<4x128xf32>
    %256 = arith.mulf %255, %6 : vector<4x128xf32>
    %257 = arith.addf %253, %256 : vector<4x128xf32>
    %c11_47 = arith.constant 11 : index
    %258 = memref.load %arg4[%c11_47] : memref<32xf32, #tpu.memory_space<smem>>
    %259 = vector.broadcast %258 : f32 to vector<4x128xf32>
    %260 = arith.mulf %259, %8 : vector<4x128xf32>
    %261 = arith.addf %257, %260 : vector<4x128xf32>
    %c2_48 = arith.constant 2 : index
    %262 = memref.load %arg5[%c2_48] : memref<8xf32, #tpu.memory_space<smem>>
    %263 = vector.broadcast %262 : f32 to vector<4x128xf32>
    %264 = arith.addf %261, %263 : vector<4x128xf32>
    %c12_49 = arith.constant 12 : index
    %265 = memref.load %arg4[%c12_49] : memref<32xf32, #tpu.memory_space<smem>>
    %266 = vector.broadcast %265 : f32 to vector<4x128xf32>
    %267 = arith.mulf %266, %2 : vector<4x128xf32>
    %c13_50 = arith.constant 13 : index
    %268 = memref.load %arg4[%c13_50] : memref<32xf32, #tpu.memory_space<smem>>
    %269 = vector.broadcast %268 : f32 to vector<4x128xf32>
    %270 = arith.mulf %269, %4 : vector<4x128xf32>
    %271 = arith.addf %267, %270 : vector<4x128xf32>
    %c14_51 = arith.constant 14 : index
    %272 = memref.load %arg4[%c14_51] : memref<32xf32, #tpu.memory_space<smem>>
    %273 = vector.broadcast %272 : f32 to vector<4x128xf32>
    %274 = arith.mulf %273, %6 : vector<4x128xf32>
    %275 = arith.addf %271, %274 : vector<4x128xf32>
    %c15_52 = arith.constant 15 : index
    %276 = memref.load %arg4[%c15_52] : memref<32xf32, #tpu.memory_space<smem>>
    %277 = vector.broadcast %276 : f32 to vector<4x128xf32>
    %278 = arith.mulf %277, %8 : vector<4x128xf32>
    %279 = arith.addf %275, %278 : vector<4x128xf32>
    %c3_53 = arith.constant 3 : index
    %280 = memref.load %arg5[%c3_53] : memref<8xf32, #tpu.memory_space<smem>>
    %281 = vector.broadcast %280 : f32 to vector<4x128xf32>
    %282 = arith.addf %279, %281 : vector<4x128xf32>
    %283 = arith.maximumf %228, %246 : vector<4x128xf32>
    %284 = arith.maximumf %283, %264 : vector<4x128xf32>
    %285 = arith.maximumf %284, %282 : vector<4x128xf32>
    %286 = arith.subf %228, %285 : vector<4x128xf32>
    %287 = math.exp %286 : vector<4x128xf32>
    %288 = arith.subf %246, %285 : vector<4x128xf32>
    %289 = math.exp %288 : vector<4x128xf32>
    %290 = arith.subf %264, %285 : vector<4x128xf32>
    %291 = math.exp %290 : vector<4x128xf32>
    %292 = arith.subf %282, %285 : vector<4x128xf32>
    %293 = math.exp %292 : vector<4x128xf32>
    %294 = arith.addf %287, %289 : vector<4x128xf32>
    %295 = arith.addf %294, %291 : vector<4x128xf32>
    %296 = arith.addf %295, %293 : vector<4x128xf32>
    %297 = tpu.reciprocal %296 {approx = true} : vector<4x128xf32> -> vector<4x128xf32>
    %298 = arith.mulf %287, %297 : vector<4x128xf32>
    %299 = arith.mulf %289, %297 : vector<4x128xf32>
    %300 = arith.mulf %291, %297 : vector<4x128xf32>
    %301 = arith.mulf %293, %297 : vector<4x128xf32>
    %c16_54 = arith.constant 16 : index
    %302 = memref.load %arg4[%c16_54] : memref<32xf32, #tpu.memory_space<smem>>
    %303 = vector.broadcast %302 : f32 to vector<4x128xf32>
    %304 = arith.mulf %303, %2 : vector<4x128xf32>
    %c17_55 = arith.constant 17 : index
    %305 = memref.load %arg4[%c17_55] : memref<32xf32, #tpu.memory_space<smem>>
    %306 = vector.broadcast %305 : f32 to vector<4x128xf32>
    %307 = arith.mulf %306, %4 : vector<4x128xf32>
    %308 = arith.addf %304, %307 : vector<4x128xf32>
    %c18_56 = arith.constant 18 : index
    %309 = memref.load %arg4[%c18_56] : memref<32xf32, #tpu.memory_space<smem>>
    %310 = vector.broadcast %309 : f32 to vector<4x128xf32>
    %311 = arith.mulf %310, %6 : vector<4x128xf32>
    %312 = arith.addf %308, %311 : vector<4x128xf32>
    %c19_57 = arith.constant 19 : index
    %313 = memref.load %arg4[%c19_57] : memref<32xf32, #tpu.memory_space<smem>>
    %314 = vector.broadcast %313 : f32 to vector<4x128xf32>
    %315 = arith.mulf %314, %8 : vector<4x128xf32>
    %316 = arith.addf %312, %315 : vector<4x128xf32>
    %c4_58 = arith.constant 4 : index
    %317 = memref.load %arg5[%c4_58] : memref<8xf32, #tpu.memory_space<smem>>
    %318 = vector.broadcast %317 : f32 to vector<4x128xf32>
    %319 = arith.addf %316, %318 : vector<4x128xf32>
    %c20_59 = arith.constant 20 : index
    %320 = memref.load %arg4[%c20_59] : memref<32xf32, #tpu.memory_space<smem>>
    %321 = vector.broadcast %320 : f32 to vector<4x128xf32>
    %322 = arith.mulf %321, %2 : vector<4x128xf32>
    %c21_60 = arith.constant 21 : index
    %323 = memref.load %arg4[%c21_60] : memref<32xf32, #tpu.memory_space<smem>>
    %324 = vector.broadcast %323 : f32 to vector<4x128xf32>
    %325 = arith.mulf %324, %4 : vector<4x128xf32>
    %326 = arith.addf %322, %325 : vector<4x128xf32>
    %c22_61 = arith.constant 22 : index
    %327 = memref.load %arg4[%c22_61] : memref<32xf32, #tpu.memory_space<smem>>
    %328 = vector.broadcast %327 : f32 to vector<4x128xf32>
    %329 = arith.mulf %328, %6 : vector<4x128xf32>
    %330 = arith.addf %326, %329 : vector<4x128xf32>
    %c23_62 = arith.constant 23 : index
    %331 = memref.load %arg4[%c23_62] : memref<32xf32, #tpu.memory_space<smem>>
    %332 = vector.broadcast %331 : f32 to vector<4x128xf32>
    %333 = arith.mulf %332, %8 : vector<4x128xf32>
    %334 = arith.addf %330, %333 : vector<4x128xf32>
    %c5_63 = arith.constant 5 : index
    %335 = memref.load %arg5[%c5_63] : memref<8xf32, #tpu.memory_space<smem>>
    %336 = vector.broadcast %335 : f32 to vector<4x128xf32>
    %337 = arith.addf %334, %336 : vector<4x128xf32>
    %c24_64 = arith.constant 24 : index
    %338 = memref.load %arg4[%c24_64] : memref<32xf32, #tpu.memory_space<smem>>
    %339 = vector.broadcast %338 : f32 to vector<4x128xf32>
    %340 = arith.mulf %339, %2 : vector<4x128xf32>
    %c25_65 = arith.constant 25 : index
    %341 = memref.load %arg4[%c25_65] : memref<32xf32, #tpu.memory_space<smem>>
    %342 = vector.broadcast %341 : f32 to vector<4x128xf32>
    %343 = arith.mulf %342, %4 : vector<4x128xf32>
    %344 = arith.addf %340, %343 : vector<4x128xf32>
    %c26_66 = arith.constant 26 : index
    %345 = memref.load %arg4[%c26_66] : memref<32xf32, #tpu.memory_space<smem>>
    %346 = vector.broadcast %345 : f32 to vector<4x128xf32>
    %347 = arith.mulf %346, %6 : vector<4x128xf32>
    %348 = arith.addf %344, %347 : vector<4x128xf32>
    %c27_67 = arith.constant 27 : index
    %349 = memref.load %arg4[%c27_67] : memref<32xf32, #tpu.memory_space<smem>>
    %350 = vector.broadcast %349 : f32 to vector<4x128xf32>
    %351 = arith.mulf %350, %8 : vector<4x128xf32>
    %352 = arith.addf %348, %351 : vector<4x128xf32>
    %c6_68 = arith.constant 6 : index
    %353 = memref.load %arg5[%c6_68] : memref<8xf32, #tpu.memory_space<smem>>
    %354 = vector.broadcast %353 : f32 to vector<4x128xf32>
    %355 = arith.addf %352, %354 : vector<4x128xf32>
    %c28_69 = arith.constant 28 : index
    %356 = memref.load %arg4[%c28_69] : memref<32xf32, #tpu.memory_space<smem>>
    %357 = vector.broadcast %356 : f32 to vector<4x128xf32>
    %358 = arith.mulf %357, %2 : vector<4x128xf32>
    %c29_70 = arith.constant 29 : index
    %359 = memref.load %arg4[%c29_70] : memref<32xf32, #tpu.memory_space<smem>>
    %360 = vector.broadcast %359 : f32 to vector<4x128xf32>
    %361 = arith.mulf %360, %4 : vector<4x128xf32>
    %362 = arith.addf %358, %361 : vector<4x128xf32>
    %c30_71 = arith.constant 30 : index
    %363 = memref.load %arg4[%c30_71] : memref<32xf32, #tpu.memory_space<smem>>
    %364 = vector.broadcast %363 : f32 to vector<4x128xf32>
    %365 = arith.mulf %364, %6 : vector<4x128xf32>
    %366 = arith.addf %362, %365 : vector<4x128xf32>
    %c31_72 = arith.constant 31 : index
    %367 = memref.load %arg4[%c31_72] : memref<32xf32, #tpu.memory_space<smem>>
    %368 = vector.broadcast %367 : f32 to vector<4x128xf32>
    %369 = arith.mulf %368, %8 : vector<4x128xf32>
    %370 = arith.addf %366, %369 : vector<4x128xf32>
    %c7_73 = arith.constant 7 : index
    %371 = memref.load %arg5[%c7_73] : memref<8xf32, #tpu.memory_space<smem>>
    %372 = vector.broadcast %371 : f32 to vector<4x128xf32>
    %373 = arith.addf %370, %372 : vector<4x128xf32>
    %374 = arith.maximumf %319, %337 : vector<4x128xf32>
    %375 = arith.maximumf %374, %355 : vector<4x128xf32>
    %376 = arith.maximumf %375, %373 : vector<4x128xf32>
    %377 = arith.subf %319, %376 : vector<4x128xf32>
    %378 = math.exp %377 : vector<4x128xf32>
    %379 = arith.subf %337, %376 : vector<4x128xf32>
    %380 = math.exp %379 : vector<4x128xf32>
    %381 = arith.subf %355, %376 : vector<4x128xf32>
    %382 = math.exp %381 : vector<4x128xf32>
    %383 = arith.subf %373, %376 : vector<4x128xf32>
    %384 = math.exp %383 : vector<4x128xf32>
    %385 = arith.addf %378, %380 : vector<4x128xf32>
    %386 = arith.addf %385, %382 : vector<4x128xf32>
    %387 = arith.addf %386, %384 : vector<4x128xf32>
    %388 = tpu.reciprocal %387 {approx = true} : vector<4x128xf32> -> vector<4x128xf32>
    %389 = arith.mulf %378, %388 : vector<4x128xf32>
    %390 = arith.mulf %380, %388 : vector<4x128xf32>
    %391 = arith.mulf %382, %388 : vector<4x128xf32>
    %392 = arith.mulf %384, %388 : vector<4x128xf32>
    %c0_74 = arith.constant 0 : index
    %393 = memref.load %arg7[%c0_74] : memref<8xf32, #tpu.memory_space<smem>>
    %394 = vector.broadcast %393 : f32 to vector<4x128xf32>
    %395 = arith.mulf %394, %116 : vector<4x128xf32>
    %c1_75 = arith.constant 1 : index
    %396 = memref.load %arg7[%c1_75] : memref<8xf32, #tpu.memory_space<smem>>
    %397 = vector.broadcast %396 : f32 to vector<4x128xf32>
    %398 = arith.mulf %397, %117 : vector<4x128xf32>
    %c2_76 = arith.constant 2 : index
    %399 = memref.load %arg7[%c2_76] : memref<8xf32, #tpu.memory_space<smem>>
    %400 = vector.broadcast %399 : f32 to vector<4x128xf32>
    %401 = arith.mulf %400, %118 : vector<4x128xf32>
    %c3_77 = arith.constant 3 : index
    %402 = memref.load %arg7[%c3_77] : memref<8xf32, #tpu.memory_space<smem>>
    %403 = vector.broadcast %402 : f32 to vector<4x128xf32>
    %404 = arith.mulf %403, %119 : vector<4x128xf32>
    %c4_78 = arith.constant 4 : index
    %405 = memref.load %arg7[%c4_78] : memref<8xf32, #tpu.memory_space<smem>>
    %406 = vector.broadcast %405 : f32 to vector<4x128xf32>
    %407 = arith.mulf %406, %207 : vector<4x128xf32>
    %c5_79 = arith.constant 5 : index
    %408 = memref.load %arg7[%c5_79] : memref<8xf32, #tpu.memory_space<smem>>
    %409 = vector.broadcast %408 : f32 to vector<4x128xf32>
    %410 = arith.mulf %409, %208 : vector<4x128xf32>
    %c6_80 = arith.constant 6 : index
    %411 = memref.load %arg7[%c6_80] : memref<8xf32, #tpu.memory_space<smem>>
    %412 = vector.broadcast %411 : f32 to vector<4x128xf32>
    %413 = arith.mulf %412, %209 : vector<4x128xf32>
    %c7_81 = arith.constant 7 : index
    %414 = memref.load %arg7[%c7_81] : memref<8xf32, #tpu.memory_space<smem>>
    %415 = vector.broadcast %414 : f32 to vector<4x128xf32>
    %416 = arith.mulf %415, %210 : vector<4x128xf32>
    %c0_82 = arith.constant 0 : index
    %417 = memref.load %arg6[%c0_82] : memref<8xf32, #tpu.memory_space<smem>>
    %418 = vector.broadcast %417 : f32 to vector<4x128xf32>
    %419 = arith.mulf %418, %389 : vector<4x128xf32>
    %420 = arith.addf %395, %419 : vector<4x128xf32>
    %c1_83 = arith.constant 1 : index
    %421 = memref.load %arg6[%c1_83] : memref<8xf32, #tpu.memory_space<smem>>
    %422 = vector.broadcast %421 : f32 to vector<4x128xf32>
    %423 = arith.mulf %422, %390 : vector<4x128xf32>
    %424 = arith.addf %398, %423 : vector<4x128xf32>
    %c2_84 = arith.constant 2 : index
    %425 = memref.load %arg6[%c2_84] : memref<8xf32, #tpu.memory_space<smem>>
    %426 = vector.broadcast %425 : f32 to vector<4x128xf32>
    %427 = arith.mulf %426, %391 : vector<4x128xf32>
    %428 = arith.addf %401, %427 : vector<4x128xf32>
    %c3_85 = arith.constant 3 : index
    %429 = memref.load %arg6[%c3_85] : memref<8xf32, #tpu.memory_space<smem>>
    %430 = vector.broadcast %429 : f32 to vector<4x128xf32>
    %431 = arith.mulf %430, %392 : vector<4x128xf32>
    %432 = arith.addf %404, %431 : vector<4x128xf32>
    %c4_86 = arith.constant 4 : index
    %433 = memref.load %arg6[%c4_86] : memref<8xf32, #tpu.memory_space<smem>>
    %434 = vector.broadcast %433 : f32 to vector<4x128xf32>
    %435 = arith.mulf %434, %298 : vector<4x128xf32>
    %436 = arith.addf %407, %435 : vector<4x128xf32>
    %c5_87 = arith.constant 5 : index
    %437 = memref.load %arg6[%c5_87] : memref<8xf32, #tpu.memory_space<smem>>
    %438 = vector.broadcast %437 : f32 to vector<4x128xf32>
    %439 = arith.mulf %438, %299 : vector<4x128xf32>
    %440 = arith.addf %410, %439 : vector<4x128xf32>
    %c6_88 = arith.constant 6 : index
    %441 = memref.load %arg6[%c6_88] : memref<8xf32, #tpu.memory_space<smem>>
    %442 = vector.broadcast %441 : f32 to vector<4x128xf32>
    %443 = arith.mulf %442, %300 : vector<4x128xf32>
    %444 = arith.addf %413, %443 : vector<4x128xf32>
    %c7_89 = arith.constant 7 : index
    %445 = memref.load %arg6[%c7_89] : memref<8xf32, #tpu.memory_space<smem>>
    %446 = vector.broadcast %445 : f32 to vector<4x128xf32>
    %447 = arith.mulf %446, %301 : vector<4x128xf32>
    %448 = arith.addf %416, %447 : vector<4x128xf32>
    %449 = arith.mulf %116, %420 : vector<4x128xf32>
    %450 = arith.mulf %117, %424 : vector<4x128xf32>
    %451 = arith.addf %449, %450 : vector<4x128xf32>
    %452 = arith.mulf %118, %428 : vector<4x128xf32>
    %453 = arith.addf %451, %452 : vector<4x128xf32>
    %454 = arith.mulf %119, %432 : vector<4x128xf32>
    %455 = arith.addf %453, %454 : vector<4x128xf32>
    %456 = arith.subf %420, %455 : vector<4x128xf32>
    %457 = arith.mulf %116, %456 : vector<4x128xf32>
    %458 = arith.subf %424, %455 : vector<4x128xf32>
    %459 = arith.mulf %117, %458 : vector<4x128xf32>
    %460 = arith.subf %428, %455 : vector<4x128xf32>
    %461 = arith.mulf %118, %460 : vector<4x128xf32>
    %462 = arith.subf %432, %455 : vector<4x128xf32>
    %463 = arith.mulf %119, %462 : vector<4x128xf32>
    %464 = arith.mulf %207, %436 : vector<4x128xf32>
    %465 = arith.mulf %208, %440 : vector<4x128xf32>
    %466 = arith.addf %464, %465 : vector<4x128xf32>
    %467 = arith.mulf %209, %444 : vector<4x128xf32>
    %468 = arith.addf %466, %467 : vector<4x128xf32>
    %469 = arith.mulf %210, %448 : vector<4x128xf32>
    %470 = arith.addf %468, %469 : vector<4x128xf32>
    %471 = arith.subf %436, %470 : vector<4x128xf32>
    %472 = arith.mulf %207, %471 : vector<4x128xf32>
    %473 = arith.subf %440, %470 : vector<4x128xf32>
    %474 = arith.mulf %208, %473 : vector<4x128xf32>
    %475 = arith.subf %444, %470 : vector<4x128xf32>
    %476 = arith.mulf %209, %475 : vector<4x128xf32>
    %477 = arith.subf %448, %470 : vector<4x128xf32>
    %478 = arith.mulf %210, %477 : vector<4x128xf32>
    %c0_90 = arith.constant 0 : index
    %479 = memref.load %arg4[%c0_90] : memref<32xf32, #tpu.memory_space<smem>>
    %480 = vector.broadcast %479 : f32 to vector<4x128xf32>
    %481 = arith.mulf %480, %457 : vector<4x128xf32>
    %c4_91 = arith.constant 4 : index
    %482 = memref.load %arg4[%c4_91] : memref<32xf32, #tpu.memory_space<smem>>
    %483 = vector.broadcast %482 : f32 to vector<4x128xf32>
    %484 = arith.mulf %483, %459 : vector<4x128xf32>
    %485 = arith.addf %481, %484 : vector<4x128xf32>
    %c8_92 = arith.constant 8 : index
    %486 = memref.load %arg4[%c8_92] : memref<32xf32, #tpu.memory_space<smem>>
    %487 = vector.broadcast %486 : f32 to vector<4x128xf32>
    %488 = arith.mulf %487, %461 : vector<4x128xf32>
    %489 = arith.addf %485, %488 : vector<4x128xf32>
    %c12_93 = arith.constant 12 : index
    %490 = memref.load %arg4[%c12_93] : memref<32xf32, #tpu.memory_space<smem>>
    %491 = vector.broadcast %490 : f32 to vector<4x128xf32>
    %492 = arith.mulf %491, %463 : vector<4x128xf32>
    %493 = arith.addf %489, %492 : vector<4x128xf32>
    %c16_94 = arith.constant 16 : index
    %494 = memref.load %arg4[%c16_94] : memref<32xf32, #tpu.memory_space<smem>>
    %495 = vector.broadcast %494 : f32 to vector<4x128xf32>
    %496 = arith.mulf %495, %472 : vector<4x128xf32>
    %497 = arith.addf %493, %496 : vector<4x128xf32>
    %c20_95 = arith.constant 20 : index
    %498 = memref.load %arg4[%c20_95] : memref<32xf32, #tpu.memory_space<smem>>
    %499 = vector.broadcast %498 : f32 to vector<4x128xf32>
    %500 = arith.mulf %499, %474 : vector<4x128xf32>
    %501 = arith.addf %497, %500 : vector<4x128xf32>
    %c24_96 = arith.constant 24 : index
    %502 = memref.load %arg4[%c24_96] : memref<32xf32, #tpu.memory_space<smem>>
    %503 = vector.broadcast %502 : f32 to vector<4x128xf32>
    %504 = arith.mulf %503, %476 : vector<4x128xf32>
    %505 = arith.addf %501, %504 : vector<4x128xf32>
    %c28_97 = arith.constant 28 : index
    %506 = memref.load %arg4[%c28_97] : memref<32xf32, #tpu.memory_space<smem>>
    %507 = vector.broadcast %506 : f32 to vector<4x128xf32>
    %508 = arith.mulf %507, %478 : vector<4x128xf32>
    %509 = arith.addf %505, %508 : vector<4x128xf32>
    %c0_98 = arith.constant 0 : index
    %c0_99 = arith.constant 0 : index
    %c0_100 = arith.constant 0 : index
    %510 = vector.load %arg8[%c0_98, %c0_99, %c0_100] : memref<4x4x128xf32, #tpu.memory_space<vmem>>, vector<1x4x128xf32>
    %511 = vector.shape_cast %510 : vector<1x4x128xf32> to vector<4x128xf32>
    %512 = vector.shape_cast %509 : vector<4x128xf32> to vector<1x4x128xf32>
    tpu.vector_store %arg8[%c0_98, %c0_99, %c0_100], %512 {strides = array<i32>} : memref<4x4x128xf32, #tpu.memory_space<vmem>>, vector<1x4x128xf32>,
    %c1_101 = arith.constant 1 : index
    %513 = memref.load %arg4[%c1_101] : memref<32xf32, #tpu.memory_space<smem>>
    %514 = vector.broadcast %513 : f32 to vector<4x128xf32>
    %515 = arith.mulf %514, %457 : vector<4x128xf32>
    %c5_102 = arith.constant 5 : index
    %516 = memref.load %arg4[%c5_102] : memref<32xf32, #tpu.memory_space<smem>>
    %517 = vector.broadcast %516 : f32 to vector<4x128xf32>
    %518 = arith.mulf %517, %459 : vector<4x128xf32>
    %519 = arith.addf %515, %518 : vector<4x128xf32>
    %c9_103 = arith.constant 9 : index
    %520 = memref.load %arg4[%c9_103] : memref<32xf32, #tpu.memory_space<smem>>
    %521 = vector.broadcast %520 : f32 to vector<4x128xf32>
    %522 = arith.mulf %521, %461 : vector<4x128xf32>
    %523 = arith.addf %519, %522 : vector<4x128xf32>
    %c13_104 = arith.constant 13 : index
    %524 = memref.load %arg4[%c13_104] : memref<32xf32, #tpu.memory_space<smem>>
    %525 = vector.broadcast %524 : f32 to vector<4x128xf32>
    %526 = arith.mulf %525, %463 : vector<4x128xf32>
    %527 = arith.addf %523, %526 : vector<4x128xf32>
    %c17_105 = arith.constant 17 : index
    %528 = memref.load %arg4[%c17_105] : memref<32xf32, #tpu.memory_space<smem>>
    %529 = vector.broadcast %528 : f32 to vector<4x128xf32>
    %530 = arith.mulf %529, %472 : vector<4x128xf32>
    %531 = arith.addf %527, %530 : vector<4x128xf32>
    %c21_106 = arith.constant 21 : index
    %532 = memref.load %arg4[%c21_106] : memref<32xf32, #tpu.memory_space<smem>>
    %533 = vector.broadcast %532 : f32 to vector<4x128xf32>
    %534 = arith.mulf %533, %474 : vector<4x128xf32>
    %535 = arith.addf %531, %534 : vector<4x128xf32>
    %c25_107 = arith.constant 25 : index
    %536 = memref.load %arg4[%c25_107] : memref<32xf32, #tpu.memory_space<smem>>
    %537 = vector.broadcast %536 : f32 to vector<4x128xf32>
    %538 = arith.mulf %537, %476 : vector<4x128xf32>
    %539 = arith.addf %535, %538 : vector<4x128xf32>
    %c29_108 = arith.constant 29 : index
    %540 = memref.load %arg4[%c29_108] : memref<32xf32, #tpu.memory_space<smem>>
    %541 = vector.broadcast %540 : f32 to vector<4x128xf32>
    %542 = arith.mulf %541, %478 : vector<4x128xf32>
    %543 = arith.addf %539, %542 : vector<4x128xf32>
    %c1_109 = arith.constant 1 : index
    %c0_110 = arith.constant 0 : index
    %c0_111 = arith.constant 0 : index
    %544 = vector.load %arg8[%c1_109, %c0_110, %c0_111] : memref<4x4x128xf32, #tpu.memory_space<vmem>>, vector<1x4x128xf32>
    %545 = vector.shape_cast %544 : vector<1x4x128xf32> to vector<4x128xf32>
    %546 = vector.shape_cast %543 : vector<4x128xf32> to vector<1x4x128xf32>
    tpu.vector_store %arg8[%c1_109, %c0_110, %c0_111], %546 {strides = array<i32>} : memref<4x4x128xf32, #tpu.memory_space<vmem>>, vector<1x4x128xf32>,
    %c2_112 = arith.constant 2 : index
    %547 = memref.load %arg4[%c2_112] : memref<32xf32, #tpu.memory_space<smem>>
    %548 = vector.broadcast %547 : f32 to vector<4x128xf32>
    %549 = arith.mulf %548, %457 : vector<4x128xf32>
    %c6_113 = arith.constant 6 : index
    %550 = memref.load %arg4[%c6_113] : memref<32xf32, #tpu.memory_space<smem>>
    %551 = vector.broadcast %550 : f32 to vector<4x128xf32>
    %552 = arith.mulf %551, %459 : vector<4x128xf32>
    %553 = arith.addf %549, %552 : vector<4x128xf32>
    %c10_114 = arith.constant 10 : index
    %554 = memref.load %arg4[%c10_114] : memref<32xf32, #tpu.memory_space<smem>>
    %555 = vector.broadcast %554 : f32 to vector<4x128xf32>
    %556 = arith.mulf %555, %461 : vector<4x128xf32>
    %557 = arith.addf %553, %556 : vector<4x128xf32>
    %c14_115 = arith.constant 14 : index
    %558 = memref.load %arg4[%c14_115] : memref<32xf32, #tpu.memory_space<smem>>
    %559 = vector.broadcast %558 : f32 to vector<4x128xf32>
    %560 = arith.mulf %559, %463 : vector<4x128xf32>
    %561 = arith.addf %557, %560 : vector<4x128xf32>
    %c18_116 = arith.constant 18 : index
    %562 = memref.load %arg4[%c18_116] : memref<32xf32, #tpu.memory_space<smem>>
    %563 = vector.broadcast %562 : f32 to vector<4x128xf32>
    %564 = arith.mulf %563, %472 : vector<4x128xf32>
    %565 = arith.addf %561, %564 : vector<4x128xf32>
    %c22_117 = arith.constant 22 : index
    %566 = memref.load %arg4[%c22_117] : memref<32xf32, #tpu.memory_space<smem>>
    %567 = vector.broadcast %566 : f32 to vector<4x128xf32>
    %568 = arith.mulf %567, %474 : vector<4x128xf32>
    %569 = arith.addf %565, %568 : vector<4x128xf32>
    %c26_118 = arith.constant 26 : index
    %570 = memref.load %arg4[%c26_118] : memref<32xf32, #tpu.memory_space<smem>>
    %571 = vector.broadcast %570 : f32 to vector<4x128xf32>
    %572 = arith.mulf %571, %476 : vector<4x128xf32>
    %573 = arith.addf %569, %572 : vector<4x128xf32>
    %c30_119 = arith.constant 30 : index
    %574 = memref.load %arg4[%c30_119] : memref<32xf32, #tpu.memory_space<smem>>
    %575 = vector.broadcast %574 : f32 to vector<4x128xf32>
    %576 = arith.mulf %575, %478 : vector<4x128xf32>
    %577 = arith.addf %573, %576 : vector<4x128xf32>
    %c2_120 = arith.constant 2 : index
    %c0_121 = arith.constant 0 : index
    %c0_122 = arith.constant 0 : index
    %578 = vector.load %arg8[%c2_120, %c0_121, %c0_122] : memref<4x4x128xf32, #tpu.memory_space<vmem>>, vector<1x4x128xf32>
    %579 = vector.shape_cast %578 : vector<1x4x128xf32> to vector<4x128xf32>
    %580 = vector.shape_cast %577 : vector<4x128xf32> to vector<1x4x128xf32>
    tpu.vector_store %arg8[%c2_120, %c0_121, %c0_122], %580 {strides = array<i32>} : memref<4x4x128xf32, #tpu.memory_space<vmem>>, vector<1x4x128xf32>,
    %c3_123 = arith.constant 3 : index
    %581 = memref.load %arg4[%c3_123] : memref<32xf32, #tpu.memory_space<smem>>
    %582 = vector.broadcast %581 : f32 to vector<4x128xf32>
    %583 = arith.mulf %582, %457 : vector<4x128xf32>
    %c7_124 = arith.constant 7 : index
    %584 = memref.load %arg4[%c7_124] : memref<32xf32, #tpu.memory_space<smem>>
    %585 = vector.broadcast %584 : f32 to vector<4x128xf32>
    %586 = arith.mulf %585, %459 : vector<4x128xf32>
    %587 = arith.addf %583, %586 : vector<4x128xf32>
    %c11_125 = arith.constant 11 : index
    %588 = memref.load %arg4[%c11_125] : memref<32xf32, #tpu.memory_space<smem>>
    %589 = vector.broadcast %588 : f32 to vector<4x128xf32>
    %590 = arith.mulf %589, %461 : vector<4x128xf32>
    %591 = arith.addf %587, %590 : vector<4x128xf32>
    %c15_126 = arith.constant 15 : index
    %592 = memref.load %arg4[%c15_126] : memref<32xf32, #tpu.memory_space<smem>>
    %593 = vector.broadcast %592 : f32 to vector<4x128xf32>
    %594 = arith.mulf %593, %463 : vector<4x128xf32>
    %595 = arith.addf %591, %594 : vector<4x128xf32>
    %c19_127 = arith.constant 19 : index
    %596 = memref.load %arg4[%c19_127] : memref<32xf32, #tpu.memory_space<smem>>
    %597 = vector.broadcast %596 : f32 to vector<4x128xf32>
    %598 = arith.mulf %597, %472 : vector<4x128xf32>
    %599 = arith.addf %595, %598 : vector<4x128xf32>
    %c23_128 = arith.constant 23 : index
    %600 = memref.load %arg4[%c23_128] : memref<32xf32, #tpu.memory_space<smem>>
    %601 = vector.broadcast %600 : f32 to vector<4x128xf32>
    %602 = arith.mulf %601, %474 : vector<4x128xf32>
    %603 = arith.addf %599, %602 : vector<4x128xf32>
    %c27_129 = arith.constant 27 : index
    %604 = memref.load %arg4[%c27_129] : memref<32xf32, #tpu.memory_space<smem>>
    %605 = vector.broadcast %604 : f32 to vector<4x128xf32>
    %606 = arith.mulf %605, %476 : vector<4x128xf32>
    %607 = arith.addf %603, %606 : vector<4x128xf32>
    %c31_130 = arith.constant 31 : index
    %608 = memref.load %arg4[%c31_130] : memref<32xf32, #tpu.memory_space<smem>>
    %609 = vector.broadcast %608 : f32 to vector<4x128xf32>
    %610 = arith.mulf %609, %478 : vector<4x128xf32>
    %611 = arith.addf %607, %610 : vector<4x128xf32>
    %c3_131 = arith.constant 3 : index
    %c0_132 = arith.constant 0 : index
    %c0_133 = arith.constant 0 : index
    %612 = vector.load %arg8[%c3_131, %c0_132, %c0_133] : memref<4x4x128xf32, #tpu.memory_space<vmem>>, vector<1x4x128xf32>
    %613 = vector.shape_cast %612 : vector<1x4x128xf32> to vector<4x128xf32>
    %614 = vector.shape_cast %611 : vector<4x128xf32> to vector<1x4x128xf32>
    tpu.vector_store %arg8[%c3_131, %c0_132, %c0_133], %614 {strides = array<i32>} : memref<4x4x128xf32, #tpu.memory_space<vmem>>, vector<1x4x128xf32>,
    return
  }
  func.func @transform_0(%arg0: i32) -> (i32, i32, i32) {
    %c0_i32 = arith.constant 0 : i32
    %c0_i32_0 = arith.constant 0 : i32
    %c0_i32_1 = arith.constant 0 : i32
    return %c0_i32, %arg0, %c0_i32_0 : i32, i32, i32
  }
  func.func @transform_1(%arg0: i32) -> (i32, i32, i32) {
    %c0_i32 = arith.constant 0 : i32
    %c0_i32_0 = arith.constant 0 : i32
    %c0_i32_1 = arith.constant 0 : i32
    return %c0_i32, %arg0, %c0_i32_0 : i32, i32, i32
  }
  func.func @transform_2(%arg0: i32) -> (i32, i32) {
    %c0_i32 = arith.constant 0 : i32
    %c0_i32_0 = arith.constant 0 : i32
    return %arg0, %c0_i32 : i32, i32
  }
  func.func @transform_3(%arg0: i32) -> i32 {
    %c0_i32 = arith.constant 0 : i32
    %c0_i32_0 = arith.constant 0 : i32
    return %c0_i32 : i32
  }
  func.func @transform_4(%arg0: i32) -> i32 {
    %c0_i32 = arith.constant 0 : i32
    %c0_i32_0 = arith.constant 0 : i32
    return %c0_i32 : i32
  }
  func.func @transform_5(%arg0: i32) -> i32 {
    %c0_i32 = arith.constant 0 : i32
    %c0_i32_0 = arith.constant 0 : i32
    return %c0_i32 : i32
  }
  func.func @transform_6(%arg0: i32) -> i32 {
    %c0_i32 = arith.constant 0 : i32
    %c0_i32_0 = arith.constant 0 : i32
    return %c0_i32 : i32
  }
  func.func @transform_7(%arg0: i32) -> (i32, i32, i32) {
    %c0_i32 = arith.constant 0 : i32
    %c0_i32_0 = arith.constant 0 : i32
    %c0_i32_1 = arith.constant 0 : i32
    return %c0_i32, %arg0, %c0_i32_0 : i32, i32, i32
  }
}

module attributes {stable_mosaic.version = 11 : i64} {
  func.func @_stats_kernel(%arg0: i32, %arg1: i32, %arg2: memref<4x4x128xf32, #tpu.memory_space<vmem>>, %arg3: memref<4x4x128xf32, #tpu.memory_space<vmem>>, %arg4: memref<4x1xf32, #tpu.memory_space<vmem>>, %arg5: memref<32xf32, #tpu.memory_space<smem>>, %arg6: memref<8xf32, #tpu.memory_space<smem>>, %arg7: memref<1x16x4x128xf32, #tpu.memory_space<vmem>>) attributes {dimension_semantics = [#tpu.dimension_semantics<parallel>, #tpu.dimension_semantics<arbitrary>], iteration_bounds = array<i64: 1, 1>, scalar_prefetch = 0 : i64, scratch_operands = 0 : i64, tpu.core_type = #tpu.core_type<tc>, window_params = [{transform_indices = @transform_0, window_bounds = array<i64: 4, 4, 128>}, {transform_indices = @transform_1, window_bounds = array<i64: 4, 4, 128>}, {transform_indices = @transform_2, window_bounds = array<i64: 4, 1>}, {transform_indices = @transform_3, window_bounds = array<i64: 32>}, {transform_indices = @transform_4, window_bounds = array<i64: 8>}, {transform_indices = @transform_5, window_bounds = array<i64: 1, 16, 4, 128>}]} {
    %c0_i32 = arith.constant 0 : i32
    %0 = arith.cmpi eq, %arg1, %c0_i32 : i32
    %1 = arith.extui %0 : i1 to i32
    %c0_i32_0 = arith.constant 0 : i32
    %2 = arith.cmpi ne, %1, %c0_i32_0 : i32
    scf.if %2 {
      %cst_206 = arith.constant 0.000000e+00 : f32
      %512 = vector.broadcast %cst_206 : f32 to vector<16x4x128xf32>
      %c0_207 = arith.constant 0 : index
      %c0_208 = arith.constant 0 : index
      %c0_209 = arith.constant 0 : index
      %c0_210 = arith.constant 0 : index
      %513 = vector.load %arg7[%c0_207, %c0_208, %c0_209, %c0_210] : memref<1x16x4x128xf32, #tpu.memory_space<vmem>>, vector<1x16x4x128xf32>
      %514 = vector.shape_cast %513 : vector<1x16x4x128xf32> to vector<16x4x128xf32>
      %515 = vector.shape_cast %512 : vector<16x4x128xf32> to vector<1x16x4x128xf32>
      tpu.vector_store %arg7[%c0_207, %c0_208, %c0_209, %c0_210], %515 {strides = array<i32>} : memref<1x16x4x128xf32, #tpu.memory_space<vmem>>, vector<1x16x4x128xf32>,
    } else {
    }
    %c0 = arith.constant 0 : index
    %c0_1 = arith.constant 0 : index
    %3 = vector.load %arg4[%c0, %c0_1] : memref<4x1xf32, #tpu.memory_space<vmem>>, vector<4x1xf32>
    %c0_2 = arith.constant 0 : index
    %c0_3 = arith.constant 0 : index
    %c0_4 = arith.constant 0 : index
    %4 = vector.load %arg2[%c0_2, %c0_3, %c0_4] : memref<4x4x128xf32, #tpu.memory_space<vmem>>, vector<1x4x128xf32>
    %5 = vector.shape_cast %4 : vector<1x4x128xf32> to vector<4x128xf32>
    %c1 = arith.constant 1 : index
    %c0_5 = arith.constant 0 : index
    %c0_6 = arith.constant 0 : index
    %6 = vector.load %arg2[%c1, %c0_5, %c0_6] : memref<4x4x128xf32, #tpu.memory_space<vmem>>, vector<1x4x128xf32>
    %7 = vector.shape_cast %6 : vector<1x4x128xf32> to vector<4x128xf32>
    %c2 = arith.constant 2 : index
    %c0_7 = arith.constant 0 : index
    %c0_8 = arith.constant 0 : index
    %8 = vector.load %arg2[%c2, %c0_7, %c0_8] : memref<4x4x128xf32, #tpu.memory_space<vmem>>, vector<1x4x128xf32>
    %9 = vector.shape_cast %8 : vector<1x4x128xf32> to vector<4x128xf32>
    %c3 = arith.constant 3 : index
    %c0_9 = arith.constant 0 : index
    %c0_10 = arith.constant 0 : index
    %10 = vector.load %arg2[%c3, %c0_9, %c0_10] : memref<4x4x128xf32, #tpu.memory_space<vmem>>, vector<1x4x128xf32>
    %11 = vector.shape_cast %10 : vector<1x4x128xf32> to vector<4x128xf32>
    %c0_11 = arith.constant 0 : index
    %c0_12 = arith.constant 0 : index
    %c0_13 = arith.constant 0 : index
    %12 = vector.load %arg3[%c0_11, %c0_12, %c0_13] : memref<4x4x128xf32, #tpu.memory_space<vmem>>, vector<1x4x128xf32>
    %13 = vector.shape_cast %12 : vector<1x4x128xf32> to vector<4x128xf32>
    %14 = vector.broadcast %3 : vector<4x1xf32> to vector<4x128xf32>
    %15 = arith.mulf %14, %13 : vector<4x128xf32>
    %16 = arith.addf %5, %15 : vector<4x128xf32>
    %c1_14 = arith.constant 1 : index
    %c0_15 = arith.constant 0 : index
    %c0_16 = arith.constant 0 : index
    %17 = vector.load %arg3[%c1_14, %c0_15, %c0_16] : memref<4x4x128xf32, #tpu.memory_space<vmem>>, vector<1x4x128xf32>
    %18 = vector.shape_cast %17 : vector<1x4x128xf32> to vector<4x128xf32>
    %19 = vector.broadcast %3 : vector<4x1xf32> to vector<4x128xf32>
    %20 = arith.mulf %19, %18 : vector<4x128xf32>
    %21 = arith.addf %7, %20 : vector<4x128xf32>
    %c2_17 = arith.constant 2 : index
    %c0_18 = arith.constant 0 : index
    %c0_19 = arith.constant 0 : index
    %22 = vector.load %arg3[%c2_17, %c0_18, %c0_19] : memref<4x4x128xf32, #tpu.memory_space<vmem>>, vector<1x4x128xf32>
    %23 = vector.shape_cast %22 : vector<1x4x128xf32> to vector<4x128xf32>
    %24 = vector.broadcast %3 : vector<4x1xf32> to vector<4x128xf32>
    %25 = arith.mulf %24, %23 : vector<4x128xf32>
    %26 = arith.addf %9, %25 : vector<4x128xf32>
    %c3_20 = arith.constant 3 : index
    %c0_21 = arith.constant 0 : index
    %c0_22 = arith.constant 0 : index
    %27 = vector.load %arg3[%c3_20, %c0_21, %c0_22] : memref<4x4x128xf32, #tpu.memory_space<vmem>>, vector<1x4x128xf32>
    %28 = vector.shape_cast %27 : vector<1x4x128xf32> to vector<4x128xf32>
    %29 = vector.broadcast %3 : vector<4x1xf32> to vector<4x128xf32>
    %30 = arith.mulf %29, %28 : vector<4x128xf32>
    %31 = arith.addf %11, %30 : vector<4x128xf32>
    %c0_23 = arith.constant 0 : index
    %32 = memref.load %arg5[%c0_23] : memref<32xf32, #tpu.memory_space<smem>>
    %33 = vector.broadcast %32 : f32 to vector<4x128xf32>
    %34 = arith.mulf %33, %16 : vector<4x128xf32>
    %c1_24 = arith.constant 1 : index
    %35 = memref.load %arg5[%c1_24] : memref<32xf32, #tpu.memory_space<smem>>
    %36 = vector.broadcast %35 : f32 to vector<4x128xf32>
    %37 = arith.mulf %36, %21 : vector<4x128xf32>
    %38 = arith.addf %34, %37 : vector<4x128xf32>
    %c2_25 = arith.constant 2 : index
    %39 = memref.load %arg5[%c2_25] : memref<32xf32, #tpu.memory_space<smem>>
    %40 = vector.broadcast %39 : f32 to vector<4x128xf32>
    %41 = arith.mulf %40, %26 : vector<4x128xf32>
    %42 = arith.addf %38, %41 : vector<4x128xf32>
    %c3_26 = arith.constant 3 : index
    %43 = memref.load %arg5[%c3_26] : memref<32xf32, #tpu.memory_space<smem>>
    %44 = vector.broadcast %43 : f32 to vector<4x128xf32>
    %45 = arith.mulf %44, %31 : vector<4x128xf32>
    %46 = arith.addf %42, %45 : vector<4x128xf32>
    %c0_27 = arith.constant 0 : index
    %47 = memref.load %arg6[%c0_27] : memref<8xf32, #tpu.memory_space<smem>>
    %48 = vector.broadcast %47 : f32 to vector<4x128xf32>
    %49 = arith.addf %46, %48 : vector<4x128xf32>
    %c4 = arith.constant 4 : index
    %50 = memref.load %arg5[%c4] : memref<32xf32, #tpu.memory_space<smem>>
    %51 = vector.broadcast %50 : f32 to vector<4x128xf32>
    %52 = arith.mulf %51, %16 : vector<4x128xf32>
    %c5 = arith.constant 5 : index
    %53 = memref.load %arg5[%c5] : memref<32xf32, #tpu.memory_space<smem>>
    %54 = vector.broadcast %53 : f32 to vector<4x128xf32>
    %55 = arith.mulf %54, %21 : vector<4x128xf32>
    %56 = arith.addf %52, %55 : vector<4x128xf32>
    %c6 = arith.constant 6 : index
    %57 = memref.load %arg5[%c6] : memref<32xf32, #tpu.memory_space<smem>>
    %58 = vector.broadcast %57 : f32 to vector<4x128xf32>
    %59 = arith.mulf %58, %26 : vector<4x128xf32>
    %60 = arith.addf %56, %59 : vector<4x128xf32>
    %c7 = arith.constant 7 : index
    %61 = memref.load %arg5[%c7] : memref<32xf32, #tpu.memory_space<smem>>
    %62 = vector.broadcast %61 : f32 to vector<4x128xf32>
    %63 = arith.mulf %62, %31 : vector<4x128xf32>
    %64 = arith.addf %60, %63 : vector<4x128xf32>
    %c1_28 = arith.constant 1 : index
    %65 = memref.load %arg6[%c1_28] : memref<8xf32, #tpu.memory_space<smem>>
    %66 = vector.broadcast %65 : f32 to vector<4x128xf32>
    %67 = arith.addf %64, %66 : vector<4x128xf32>
    %c8 = arith.constant 8 : index
    %68 = memref.load %arg5[%c8] : memref<32xf32, #tpu.memory_space<smem>>
    %69 = vector.broadcast %68 : f32 to vector<4x128xf32>
    %70 = arith.mulf %69, %16 : vector<4x128xf32>
    %c9 = arith.constant 9 : index
    %71 = memref.load %arg5[%c9] : memref<32xf32, #tpu.memory_space<smem>>
    %72 = vector.broadcast %71 : f32 to vector<4x128xf32>
    %73 = arith.mulf %72, %21 : vector<4x128xf32>
    %74 = arith.addf %70, %73 : vector<4x128xf32>
    %c10 = arith.constant 10 : index
    %75 = memref.load %arg5[%c10] : memref<32xf32, #tpu.memory_space<smem>>
    %76 = vector.broadcast %75 : f32 to vector<4x128xf32>
    %77 = arith.mulf %76, %26 : vector<4x128xf32>
    %78 = arith.addf %74, %77 : vector<4x128xf32>
    %c11 = arith.constant 11 : index
    %79 = memref.load %arg5[%c11] : memref<32xf32, #tpu.memory_space<smem>>
    %80 = vector.broadcast %79 : f32 to vector<4x128xf32>
    %81 = arith.mulf %80, %31 : vector<4x128xf32>
    %82 = arith.addf %78, %81 : vector<4x128xf32>
    %c2_29 = arith.constant 2 : index
    %83 = memref.load %arg6[%c2_29] : memref<8xf32, #tpu.memory_space<smem>>
    %84 = vector.broadcast %83 : f32 to vector<4x128xf32>
    %85 = arith.addf %82, %84 : vector<4x128xf32>
    %c12 = arith.constant 12 : index
    %86 = memref.load %arg5[%c12] : memref<32xf32, #tpu.memory_space<smem>>
    %87 = vector.broadcast %86 : f32 to vector<4x128xf32>
    %88 = arith.mulf %87, %16 : vector<4x128xf32>
    %c13 = arith.constant 13 : index
    %89 = memref.load %arg5[%c13] : memref<32xf32, #tpu.memory_space<smem>>
    %90 = vector.broadcast %89 : f32 to vector<4x128xf32>
    %91 = arith.mulf %90, %21 : vector<4x128xf32>
    %92 = arith.addf %88, %91 : vector<4x128xf32>
    %c14 = arith.constant 14 : index
    %93 = memref.load %arg5[%c14] : memref<32xf32, #tpu.memory_space<smem>>
    %94 = vector.broadcast %93 : f32 to vector<4x128xf32>
    %95 = arith.mulf %94, %26 : vector<4x128xf32>
    %96 = arith.addf %92, %95 : vector<4x128xf32>
    %c15 = arith.constant 15 : index
    %97 = memref.load %arg5[%c15] : memref<32xf32, #tpu.memory_space<smem>>
    %98 = vector.broadcast %97 : f32 to vector<4x128xf32>
    %99 = arith.mulf %98, %31 : vector<4x128xf32>
    %100 = arith.addf %96, %99 : vector<4x128xf32>
    %c3_30 = arith.constant 3 : index
    %101 = memref.load %arg6[%c3_30] : memref<8xf32, #tpu.memory_space<smem>>
    %102 = vector.broadcast %101 : f32 to vector<4x128xf32>
    %103 = arith.addf %100, %102 : vector<4x128xf32>
    %104 = arith.maximumf %49, %67 : vector<4x128xf32>
    %105 = arith.maximumf %104, %85 : vector<4x128xf32>
    %106 = arith.maximumf %105, %103 : vector<4x128xf32>
    %107 = arith.subf %49, %106 : vector<4x128xf32>
    %108 = math.exp %107 : vector<4x128xf32>
    %109 = arith.subf %67, %106 : vector<4x128xf32>
    %110 = math.exp %109 : vector<4x128xf32>
    %111 = arith.subf %85, %106 : vector<4x128xf32>
    %112 = math.exp %111 : vector<4x128xf32>
    %113 = arith.subf %103, %106 : vector<4x128xf32>
    %114 = math.exp %113 : vector<4x128xf32>
    %115 = arith.addf %108, %110 : vector<4x128xf32>
    %116 = arith.addf %115, %112 : vector<4x128xf32>
    %117 = arith.addf %116, %114 : vector<4x128xf32>
    %cst = arith.constant 1.000000e+00 : f32
    %118 = vector.broadcast %cst : f32 to vector<4x128xf32>
    %119 = arith.divf %118, %117 : vector<4x128xf32>
    %120 = arith.mulf %108, %119 : vector<4x128xf32>
    %121 = arith.mulf %110, %119 : vector<4x128xf32>
    %122 = arith.mulf %112, %119 : vector<4x128xf32>
    %123 = arith.mulf %114, %119 : vector<4x128xf32>
    %c16 = arith.constant 16 : index
    %124 = memref.load %arg5[%c16] : memref<32xf32, #tpu.memory_space<smem>>
    %125 = vector.broadcast %124 : f32 to vector<4x128xf32>
    %126 = arith.mulf %125, %16 : vector<4x128xf32>
    %c17 = arith.constant 17 : index
    %127 = memref.load %arg5[%c17] : memref<32xf32, #tpu.memory_space<smem>>
    %128 = vector.broadcast %127 : f32 to vector<4x128xf32>
    %129 = arith.mulf %128, %21 : vector<4x128xf32>
    %130 = arith.addf %126, %129 : vector<4x128xf32>
    %c18 = arith.constant 18 : index
    %131 = memref.load %arg5[%c18] : memref<32xf32, #tpu.memory_space<smem>>
    %132 = vector.broadcast %131 : f32 to vector<4x128xf32>
    %133 = arith.mulf %132, %26 : vector<4x128xf32>
    %134 = arith.addf %130, %133 : vector<4x128xf32>
    %c19 = arith.constant 19 : index
    %135 = memref.load %arg5[%c19] : memref<32xf32, #tpu.memory_space<smem>>
    %136 = vector.broadcast %135 : f32 to vector<4x128xf32>
    %137 = arith.mulf %136, %31 : vector<4x128xf32>
    %138 = arith.addf %134, %137 : vector<4x128xf32>
    %c4_31 = arith.constant 4 : index
    %139 = memref.load %arg6[%c4_31] : memref<8xf32, #tpu.memory_space<smem>>
    %140 = vector.broadcast %139 : f32 to vector<4x128xf32>
    %141 = arith.addf %138, %140 : vector<4x128xf32>
    %c20 = arith.constant 20 : index
    %142 = memref.load %arg5[%c20] : memref<32xf32, #tpu.memory_space<smem>>
    %143 = vector.broadcast %142 : f32 to vector<4x128xf32>
    %144 = arith.mulf %143, %16 : vector<4x128xf32>
    %c21 = arith.constant 21 : index
    %145 = memref.load %arg5[%c21] : memref<32xf32, #tpu.memory_space<smem>>
    %146 = vector.broadcast %145 : f32 to vector<4x128xf32>
    %147 = arith.mulf %146, %21 : vector<4x128xf32>
    %148 = arith.addf %144, %147 : vector<4x128xf32>
    %c22 = arith.constant 22 : index
    %149 = memref.load %arg5[%c22] : memref<32xf32, #tpu.memory_space<smem>>
    %150 = vector.broadcast %149 : f32 to vector<4x128xf32>
    %151 = arith.mulf %150, %26 : vector<4x128xf32>
    %152 = arith.addf %148, %151 : vector<4x128xf32>
    %c23 = arith.constant 23 : index
    %153 = memref.load %arg5[%c23] : memref<32xf32, #tpu.memory_space<smem>>
    %154 = vector.broadcast %153 : f32 to vector<4x128xf32>
    %155 = arith.mulf %154, %31 : vector<4x128xf32>
    %156 = arith.addf %152, %155 : vector<4x128xf32>
    %c5_32 = arith.constant 5 : index
    %157 = memref.load %arg6[%c5_32] : memref<8xf32, #tpu.memory_space<smem>>
    %158 = vector.broadcast %157 : f32 to vector<4x128xf32>
    %159 = arith.addf %156, %158 : vector<4x128xf32>
    %c24 = arith.constant 24 : index
    %160 = memref.load %arg5[%c24] : memref<32xf32, #tpu.memory_space<smem>>
    %161 = vector.broadcast %160 : f32 to vector<4x128xf32>
    %162 = arith.mulf %161, %16 : vector<4x128xf32>
    %c25 = arith.constant 25 : index
    %163 = memref.load %arg5[%c25] : memref<32xf32, #tpu.memory_space<smem>>
    %164 = vector.broadcast %163 : f32 to vector<4x128xf32>
    %165 = arith.mulf %164, %21 : vector<4x128xf32>
    %166 = arith.addf %162, %165 : vector<4x128xf32>
    %c26 = arith.constant 26 : index
    %167 = memref.load %arg5[%c26] : memref<32xf32, #tpu.memory_space<smem>>
    %168 = vector.broadcast %167 : f32 to vector<4x128xf32>
    %169 = arith.mulf %168, %26 : vector<4x128xf32>
    %170 = arith.addf %166, %169 : vector<4x128xf32>
    %c27 = arith.constant 27 : index
    %171 = memref.load %arg5[%c27] : memref<32xf32, #tpu.memory_space<smem>>
    %172 = vector.broadcast %171 : f32 to vector<4x128xf32>
    %173 = arith.mulf %172, %31 : vector<4x128xf32>
    %174 = arith.addf %170, %173 : vector<4x128xf32>
    %c6_33 = arith.constant 6 : index
    %175 = memref.load %arg6[%c6_33] : memref<8xf32, #tpu.memory_space<smem>>
    %176 = vector.broadcast %175 : f32 to vector<4x128xf32>
    %177 = arith.addf %174, %176 : vector<4x128xf32>
    %c28 = arith.constant 28 : index
    %178 = memref.load %arg5[%c28] : memref<32xf32, #tpu.memory_space<smem>>
    %179 = vector.broadcast %178 : f32 to vector<4x128xf32>
    %180 = arith.mulf %179, %16 : vector<4x128xf32>
    %c29 = arith.constant 29 : index
    %181 = memref.load %arg5[%c29] : memref<32xf32, #tpu.memory_space<smem>>
    %182 = vector.broadcast %181 : f32 to vector<4x128xf32>
    %183 = arith.mulf %182, %21 : vector<4x128xf32>
    %184 = arith.addf %180, %183 : vector<4x128xf32>
    %c30 = arith.constant 30 : index
    %185 = memref.load %arg5[%c30] : memref<32xf32, #tpu.memory_space<smem>>
    %186 = vector.broadcast %185 : f32 to vector<4x128xf32>
    %187 = arith.mulf %186, %26 : vector<4x128xf32>
    %188 = arith.addf %184, %187 : vector<4x128xf32>
    %c31 = arith.constant 31 : index
    %189 = memref.load %arg5[%c31] : memref<32xf32, #tpu.memory_space<smem>>
    %190 = vector.broadcast %189 : f32 to vector<4x128xf32>
    %191 = arith.mulf %190, %31 : vector<4x128xf32>
    %192 = arith.addf %188, %191 : vector<4x128xf32>
    %c7_34 = arith.constant 7 : index
    %193 = memref.load %arg6[%c7_34] : memref<8xf32, #tpu.memory_space<smem>>
    %194 = vector.broadcast %193 : f32 to vector<4x128xf32>
    %195 = arith.addf %192, %194 : vector<4x128xf32>
    %196 = arith.maximumf %141, %159 : vector<4x128xf32>
    %197 = arith.maximumf %196, %177 : vector<4x128xf32>
    %198 = arith.maximumf %197, %195 : vector<4x128xf32>
    %199 = arith.subf %141, %198 : vector<4x128xf32>
    %200 = math.exp %199 : vector<4x128xf32>
    %201 = arith.subf %159, %198 : vector<4x128xf32>
    %202 = math.exp %201 : vector<4x128xf32>
    %203 = arith.subf %177, %198 : vector<4x128xf32>
    %204 = math.exp %203 : vector<4x128xf32>
    %205 = arith.subf %195, %198 : vector<4x128xf32>
    %206 = math.exp %205 : vector<4x128xf32>
    %207 = arith.addf %200, %202 : vector<4x128xf32>
    %208 = arith.addf %207, %204 : vector<4x128xf32>
    %209 = arith.addf %208, %206 : vector<4x128xf32>
    %cst_35 = arith.constant 1.000000e+00 : f32
    %210 = vector.broadcast %cst_35 : f32 to vector<4x128xf32>
    %211 = arith.divf %210, %209 : vector<4x128xf32>
    %212 = arith.mulf %200, %211 : vector<4x128xf32>
    %213 = arith.mulf %202, %211 : vector<4x128xf32>
    %214 = arith.mulf %204, %211 : vector<4x128xf32>
    %215 = arith.mulf %206, %211 : vector<4x128xf32>
    %c0_36 = arith.constant 0 : index
    %216 = memref.load %arg5[%c0_36] : memref<32xf32, #tpu.memory_space<smem>>
    %217 = vector.broadcast %216 : f32 to vector<4x128xf32>
    %218 = arith.mulf %217, %5 : vector<4x128xf32>
    %c1_37 = arith.constant 1 : index
    %219 = memref.load %arg5[%c1_37] : memref<32xf32, #tpu.memory_space<smem>>
    %220 = vector.broadcast %219 : f32 to vector<4x128xf32>
    %221 = arith.mulf %220, %7 : vector<4x128xf32>
    %222 = arith.addf %218, %221 : vector<4x128xf32>
    %c2_38 = arith.constant 2 : index
    %223 = memref.load %arg5[%c2_38] : memref<32xf32, #tpu.memory_space<smem>>
    %224 = vector.broadcast %223 : f32 to vector<4x128xf32>
    %225 = arith.mulf %224, %9 : vector<4x128xf32>
    %226 = arith.addf %222, %225 : vector<4x128xf32>
    %c3_39 = arith.constant 3 : index
    %227 = memref.load %arg5[%c3_39] : memref<32xf32, #tpu.memory_space<smem>>
    %228 = vector.broadcast %227 : f32 to vector<4x128xf32>
    %229 = arith.mulf %228, %11 : vector<4x128xf32>
    %230 = arith.addf %226, %229 : vector<4x128xf32>
    %c0_40 = arith.constant 0 : index
    %231 = memref.load %arg6[%c0_40] : memref<8xf32, #tpu.memory_space<smem>>
    %232 = vector.broadcast %231 : f32 to vector<4x128xf32>
    %233 = arith.addf %230, %232 : vector<4x128xf32>
    %c4_41 = arith.constant 4 : index
    %234 = memref.load %arg5[%c4_41] : memref<32xf32, #tpu.memory_space<smem>>
    %235 = vector.broadcast %234 : f32 to vector<4x128xf32>
    %236 = arith.mulf %235, %5 : vector<4x128xf32>
    %c5_42 = arith.constant 5 : index
    %237 = memref.load %arg5[%c5_42] : memref<32xf32, #tpu.memory_space<smem>>
    %238 = vector.broadcast %237 : f32 to vector<4x128xf32>
    %239 = arith.mulf %238, %7 : vector<4x128xf32>
    %240 = arith.addf %236, %239 : vector<4x128xf32>
    %c6_43 = arith.constant 6 : index
    %241 = memref.load %arg5[%c6_43] : memref<32xf32, #tpu.memory_space<smem>>
    %242 = vector.broadcast %241 : f32 to vector<4x128xf32>
    %243 = arith.mulf %242, %9 : vector<4x128xf32>
    %244 = arith.addf %240, %243 : vector<4x128xf32>
    %c7_44 = arith.constant 7 : index
    %245 = memref.load %arg5[%c7_44] : memref<32xf32, #tpu.memory_space<smem>>
    %246 = vector.broadcast %245 : f32 to vector<4x128xf32>
    %247 = arith.mulf %246, %11 : vector<4x128xf32>
    %248 = arith.addf %244, %247 : vector<4x128xf32>
    %c1_45 = arith.constant 1 : index
    %249 = memref.load %arg6[%c1_45] : memref<8xf32, #tpu.memory_space<smem>>
    %250 = vector.broadcast %249 : f32 to vector<4x128xf32>
    %251 = arith.addf %248, %250 : vector<4x128xf32>
    %c8_46 = arith.constant 8 : index
    %252 = memref.load %arg5[%c8_46] : memref<32xf32, #tpu.memory_space<smem>>
    %253 = vector.broadcast %252 : f32 to vector<4x128xf32>
    %254 = arith.mulf %253, %5 : vector<4x128xf32>
    %c9_47 = arith.constant 9 : index
    %255 = memref.load %arg5[%c9_47] : memref<32xf32, #tpu.memory_space<smem>>
    %256 = vector.broadcast %255 : f32 to vector<4x128xf32>
    %257 = arith.mulf %256, %7 : vector<4x128xf32>
    %258 = arith.addf %254, %257 : vector<4x128xf32>
    %c10_48 = arith.constant 10 : index
    %259 = memref.load %arg5[%c10_48] : memref<32xf32, #tpu.memory_space<smem>>
    %260 = vector.broadcast %259 : f32 to vector<4x128xf32>
    %261 = arith.mulf %260, %9 : vector<4x128xf32>
    %262 = arith.addf %258, %261 : vector<4x128xf32>
    %c11_49 = arith.constant 11 : index
    %263 = memref.load %arg5[%c11_49] : memref<32xf32, #tpu.memory_space<smem>>
    %264 = vector.broadcast %263 : f32 to vector<4x128xf32>
    %265 = arith.mulf %264, %11 : vector<4x128xf32>
    %266 = arith.addf %262, %265 : vector<4x128xf32>
    %c2_50 = arith.constant 2 : index
    %267 = memref.load %arg6[%c2_50] : memref<8xf32, #tpu.memory_space<smem>>
    %268 = vector.broadcast %267 : f32 to vector<4x128xf32>
    %269 = arith.addf %266, %268 : vector<4x128xf32>
    %c12_51 = arith.constant 12 : index
    %270 = memref.load %arg5[%c12_51] : memref<32xf32, #tpu.memory_space<smem>>
    %271 = vector.broadcast %270 : f32 to vector<4x128xf32>
    %272 = arith.mulf %271, %5 : vector<4x128xf32>
    %c13_52 = arith.constant 13 : index
    %273 = memref.load %arg5[%c13_52] : memref<32xf32, #tpu.memory_space<smem>>
    %274 = vector.broadcast %273 : f32 to vector<4x128xf32>
    %275 = arith.mulf %274, %7 : vector<4x128xf32>
    %276 = arith.addf %272, %275 : vector<4x128xf32>
    %c14_53 = arith.constant 14 : index
    %277 = memref.load %arg5[%c14_53] : memref<32xf32, #tpu.memory_space<smem>>
    %278 = vector.broadcast %277 : f32 to vector<4x128xf32>
    %279 = arith.mulf %278, %9 : vector<4x128xf32>
    %280 = arith.addf %276, %279 : vector<4x128xf32>
    %c15_54 = arith.constant 15 : index
    %281 = memref.load %arg5[%c15_54] : memref<32xf32, #tpu.memory_space<smem>>
    %282 = vector.broadcast %281 : f32 to vector<4x128xf32>
    %283 = arith.mulf %282, %11 : vector<4x128xf32>
    %284 = arith.addf %280, %283 : vector<4x128xf32>
    %c3_55 = arith.constant 3 : index
    %285 = memref.load %arg6[%c3_55] : memref<8xf32, #tpu.memory_space<smem>>
    %286 = vector.broadcast %285 : f32 to vector<4x128xf32>
    %287 = arith.addf %284, %286 : vector<4x128xf32>
    %288 = arith.maximumf %233, %251 : vector<4x128xf32>
    %289 = arith.maximumf %288, %269 : vector<4x128xf32>
    %290 = arith.maximumf %289, %287 : vector<4x128xf32>
    %291 = arith.subf %233, %290 : vector<4x128xf32>
    %292 = math.exp %291 : vector<4x128xf32>
    %293 = arith.subf %251, %290 : vector<4x128xf32>
    %294 = math.exp %293 : vector<4x128xf32>
    %295 = arith.subf %269, %290 : vector<4x128xf32>
    %296 = math.exp %295 : vector<4x128xf32>
    %297 = arith.subf %287, %290 : vector<4x128xf32>
    %298 = math.exp %297 : vector<4x128xf32>
    %299 = arith.addf %292, %294 : vector<4x128xf32>
    %300 = arith.addf %299, %296 : vector<4x128xf32>
    %301 = arith.addf %300, %298 : vector<4x128xf32>
    %cst_56 = arith.constant 1.000000e+00 : f32
    %302 = vector.broadcast %cst_56 : f32 to vector<4x128xf32>
    %303 = arith.divf %302, %301 : vector<4x128xf32>
    %304 = arith.mulf %292, %303 : vector<4x128xf32>
    %305 = arith.mulf %294, %303 : vector<4x128xf32>
    %306 = arith.mulf %296, %303 : vector<4x128xf32>
    %307 = arith.mulf %298, %303 : vector<4x128xf32>
    %c16_57 = arith.constant 16 : index
    %308 = memref.load %arg5[%c16_57] : memref<32xf32, #tpu.memory_space<smem>>
    %309 = vector.broadcast %308 : f32 to vector<4x128xf32>
    %310 = arith.mulf %309, %5 : vector<4x128xf32>
    %c17_58 = arith.constant 17 : index
    %311 = memref.load %arg5[%c17_58] : memref<32xf32, #tpu.memory_space<smem>>
    %312 = vector.broadcast %311 : f32 to vector<4x128xf32>
    %313 = arith.mulf %312, %7 : vector<4x128xf32>
    %314 = arith.addf %310, %313 : vector<4x128xf32>
    %c18_59 = arith.constant 18 : index
    %315 = memref.load %arg5[%c18_59] : memref<32xf32, #tpu.memory_space<smem>>
    %316 = vector.broadcast %315 : f32 to vector<4x128xf32>
    %317 = arith.mulf %316, %9 : vector<4x128xf32>
    %318 = arith.addf %314, %317 : vector<4x128xf32>
    %c19_60 = arith.constant 19 : index
    %319 = memref.load %arg5[%c19_60] : memref<32xf32, #tpu.memory_space<smem>>
    %320 = vector.broadcast %319 : f32 to vector<4x128xf32>
    %321 = arith.mulf %320, %11 : vector<4x128xf32>
    %322 = arith.addf %318, %321 : vector<4x128xf32>
    %c4_61 = arith.constant 4 : index
    %323 = memref.load %arg6[%c4_61] : memref<8xf32, #tpu.memory_space<smem>>
    %324 = vector.broadcast %323 : f32 to vector<4x128xf32>
    %325 = arith.addf %322, %324 : vector<4x128xf32>
    %c20_62 = arith.constant 20 : index
    %326 = memref.load %arg5[%c20_62] : memref<32xf32, #tpu.memory_space<smem>>
    %327 = vector.broadcast %326 : f32 to vector<4x128xf32>
    %328 = arith.mulf %327, %5 : vector<4x128xf32>
    %c21_63 = arith.constant 21 : index
    %329 = memref.load %arg5[%c21_63] : memref<32xf32, #tpu.memory_space<smem>>
    %330 = vector.broadcast %329 : f32 to vector<4x128xf32>
    %331 = arith.mulf %330, %7 : vector<4x128xf32>
    %332 = arith.addf %328, %331 : vector<4x128xf32>
    %c22_64 = arith.constant 22 : index
    %333 = memref.load %arg5[%c22_64] : memref<32xf32, #tpu.memory_space<smem>>
    %334 = vector.broadcast %333 : f32 to vector<4x128xf32>
    %335 = arith.mulf %334, %9 : vector<4x128xf32>
    %336 = arith.addf %332, %335 : vector<4x128xf32>
    %c23_65 = arith.constant 23 : index
    %337 = memref.load %arg5[%c23_65] : memref<32xf32, #tpu.memory_space<smem>>
    %338 = vector.broadcast %337 : f32 to vector<4x128xf32>
    %339 = arith.mulf %338, %11 : vector<4x128xf32>
    %340 = arith.addf %336, %339 : vector<4x128xf32>
    %c5_66 = arith.constant 5 : index
    %341 = memref.load %arg6[%c5_66] : memref<8xf32, #tpu.memory_space<smem>>
    %342 = vector.broadcast %341 : f32 to vector<4x128xf32>
    %343 = arith.addf %340, %342 : vector<4x128xf32>
    %c24_67 = arith.constant 24 : index
    %344 = memref.load %arg5[%c24_67] : memref<32xf32, #tpu.memory_space<smem>>
    %345 = vector.broadcast %344 : f32 to vector<4x128xf32>
    %346 = arith.mulf %345, %5 : vector<4x128xf32>
    %c25_68 = arith.constant 25 : index
    %347 = memref.load %arg5[%c25_68] : memref<32xf32, #tpu.memory_space<smem>>
    %348 = vector.broadcast %347 : f32 to vector<4x128xf32>
    %349 = arith.mulf %348, %7 : vector<4x128xf32>
    %350 = arith.addf %346, %349 : vector<4x128xf32>
    %c26_69 = arith.constant 26 : index
    %351 = memref.load %arg5[%c26_69] : memref<32xf32, #tpu.memory_space<smem>>
    %352 = vector.broadcast %351 : f32 to vector<4x128xf32>
    %353 = arith.mulf %352, %9 : vector<4x128xf32>
    %354 = arith.addf %350, %353 : vector<4x128xf32>
    %c27_70 = arith.constant 27 : index
    %355 = memref.load %arg5[%c27_70] : memref<32xf32, #tpu.memory_space<smem>>
    %356 = vector.broadcast %355 : f32 to vector<4x128xf32>
    %357 = arith.mulf %356, %11 : vector<4x128xf32>
    %358 = arith.addf %354, %357 : vector<4x128xf32>
    %c6_71 = arith.constant 6 : index
    %359 = memref.load %arg6[%c6_71] : memref<8xf32, #tpu.memory_space<smem>>
    %360 = vector.broadcast %359 : f32 to vector<4x128xf32>
    %361 = arith.addf %358, %360 : vector<4x128xf32>
    %c28_72 = arith.constant 28 : index
    %362 = memref.load %arg5[%c28_72] : memref<32xf32, #tpu.memory_space<smem>>
    %363 = vector.broadcast %362 : f32 to vector<4x128xf32>
    %364 = arith.mulf %363, %5 : vector<4x128xf32>
    %c29_73 = arith.constant 29 : index
    %365 = memref.load %arg5[%c29_73] : memref<32xf32, #tpu.memory_space<smem>>
    %366 = vector.broadcast %365 : f32 to vector<4x128xf32>
    %367 = arith.mulf %366, %7 : vector<4x128xf32>
    %368 = arith.addf %364, %367 : vector<4x128xf32>
    %c30_74 = arith.constant 30 : index
    %369 = memref.load %arg5[%c30_74] : memref<32xf32, #tpu.memory_space<smem>>
    %370 = vector.broadcast %369 : f32 to vector<4x128xf32>
    %371 = arith.mulf %370, %9 : vector<4x128xf32>
    %372 = arith.addf %368, %371 : vector<4x128xf32>
    %c31_75 = arith.constant 31 : index
    %373 = memref.load %arg5[%c31_75] : memref<32xf32, #tpu.memory_space<smem>>
    %374 = vector.broadcast %373 : f32 to vector<4x128xf32>
    %375 = arith.mulf %374, %11 : vector<4x128xf32>
    %376 = arith.addf %372, %375 : vector<4x128xf32>
    %c7_76 = arith.constant 7 : index
    %377 = memref.load %arg6[%c7_76] : memref<8xf32, #tpu.memory_space<smem>>
    %378 = vector.broadcast %377 : f32 to vector<4x128xf32>
    %379 = arith.addf %376, %378 : vector<4x128xf32>
    %380 = arith.maximumf %325, %343 : vector<4x128xf32>
    %381 = arith.maximumf %380, %361 : vector<4x128xf32>
    %382 = arith.maximumf %381, %379 : vector<4x128xf32>
    %383 = arith.subf %325, %382 : vector<4x128xf32>
    %384 = math.exp %383 : vector<4x128xf32>
    %385 = arith.subf %343, %382 : vector<4x128xf32>
    %386 = math.exp %385 : vector<4x128xf32>
    %387 = arith.subf %361, %382 : vector<4x128xf32>
    %388 = math.exp %387 : vector<4x128xf32>
    %389 = arith.subf %379, %382 : vector<4x128xf32>
    %390 = math.exp %389 : vector<4x128xf32>
    %391 = arith.addf %384, %386 : vector<4x128xf32>
    %392 = arith.addf %391, %388 : vector<4x128xf32>
    %393 = arith.addf %392, %390 : vector<4x128xf32>
    %cst_77 = arith.constant 1.000000e+00 : f32
    %394 = vector.broadcast %cst_77 : f32 to vector<4x128xf32>
    %395 = arith.divf %394, %393 : vector<4x128xf32>
    %396 = arith.mulf %384, %395 : vector<4x128xf32>
    %397 = arith.mulf %386, %395 : vector<4x128xf32>
    %398 = arith.mulf %388, %395 : vector<4x128xf32>
    %399 = arith.mulf %390, %395 : vector<4x128xf32>
    %c0_78 = arith.constant 0 : index
    %c0_79 = arith.constant 0 : index
    %c0_80 = arith.constant 0 : index
    %c0_81 = arith.constant 0 : index
    %400 = vector.load %arg7[%c0_78, %c0_79, %c0_80, %c0_81] : memref<1x16x4x128xf32, #tpu.memory_space<vmem>>, vector<1x1x4x128xf32>
    %401 = vector.shape_cast %400 : vector<1x1x4x128xf32> to vector<4x128xf32>
    %402 = arith.mulf %120, %120 : vector<4x128xf32>
    %403 = arith.addf %401, %402 : vector<4x128xf32>
    %c0_82 = arith.constant 0 : index
    %c0_83 = arith.constant 0 : index
    %c0_84 = arith.constant 0 : index
    %c0_85 = arith.constant 0 : index
    %404 = vector.load %arg7[%c0_82, %c0_83, %c0_84, %c0_85] : memref<1x16x4x128xf32, #tpu.memory_space<vmem>>, vector<1x1x4x128xf32>
    %405 = vector.shape_cast %404 : vector<1x1x4x128xf32> to vector<4x128xf32>
    %406 = vector.shape_cast %403 : vector<4x128xf32> to vector<1x1x4x128xf32>
    tpu.vector_store %arg7[%c0_82, %c0_83, %c0_84, %c0_85], %406 {strides = array<i32>} : memref<1x16x4x128xf32, #tpu.memory_space<vmem>>, vector<1x1x4x128xf32>,
    %c0_86 = arith.constant 0 : index
    %c1_87 = arith.constant 1 : index
    %c0_88 = arith.constant 0 : index
    %c0_89 = arith.constant 0 : index
    %407 = vector.load %arg7[%c0_86, %c1_87, %c0_88, %c0_89] : memref<1x16x4x128xf32, #tpu.memory_space<vmem>>, vector<1x1x4x128xf32>
    %408 = vector.shape_cast %407 : vector<1x1x4x128xf32> to vector<4x128xf32>
    %409 = arith.mulf %121, %121 : vector<4x128xf32>
    %410 = arith.addf %408, %409 : vector<4x128xf32>
    %c0_90 = arith.constant 0 : index
    %c1_91 = arith.constant 1 : index
    %c0_92 = arith.constant 0 : index
    %c0_93 = arith.constant 0 : index
    %411 = vector.load %arg7[%c0_90, %c1_91, %c0_92, %c0_93] : memref<1x16x4x128xf32, #tpu.memory_space<vmem>>, vector<1x1x4x128xf32>
    %412 = vector.shape_cast %411 : vector<1x1x4x128xf32> to vector<4x128xf32>
    %413 = vector.shape_cast %410 : vector<4x128xf32> to vector<1x1x4x128xf32>
    tpu.vector_store %arg7[%c0_90, %c1_91, %c0_92, %c0_93], %413 {strides = array<i32>} : memref<1x16x4x128xf32, #tpu.memory_space<vmem>>, vector<1x1x4x128xf32>,
    %c0_94 = arith.constant 0 : index
    %c2_95 = arith.constant 2 : index
    %c0_96 = arith.constant 0 : index
    %c0_97 = arith.constant 0 : index
    %414 = vector.load %arg7[%c0_94, %c2_95, %c0_96, %c0_97] : memref<1x16x4x128xf32, #tpu.memory_space<vmem>>, vector<1x1x4x128xf32>
    %415 = vector.shape_cast %414 : vector<1x1x4x128xf32> to vector<4x128xf32>
    %416 = arith.mulf %122, %122 : vector<4x128xf32>
    %417 = arith.addf %415, %416 : vector<4x128xf32>
    %c0_98 = arith.constant 0 : index
    %c2_99 = arith.constant 2 : index
    %c0_100 = arith.constant 0 : index
    %c0_101 = arith.constant 0 : index
    %418 = vector.load %arg7[%c0_98, %c2_99, %c0_100, %c0_101] : memref<1x16x4x128xf32, #tpu.memory_space<vmem>>, vector<1x1x4x128xf32>
    %419 = vector.shape_cast %418 : vector<1x1x4x128xf32> to vector<4x128xf32>
    %420 = vector.shape_cast %417 : vector<4x128xf32> to vector<1x1x4x128xf32>
    tpu.vector_store %arg7[%c0_98, %c2_99, %c0_100, %c0_101], %420 {strides = array<i32>} : memref<1x16x4x128xf32, #tpu.memory_space<vmem>>, vector<1x1x4x128xf32>,
    %c0_102 = arith.constant 0 : index
    %c3_103 = arith.constant 3 : index
    %c0_104 = arith.constant 0 : index
    %c0_105 = arith.constant 0 : index
    %421 = vector.load %arg7[%c0_102, %c3_103, %c0_104, %c0_105] : memref<1x16x4x128xf32, #tpu.memory_space<vmem>>, vector<1x1x4x128xf32>
    %422 = vector.shape_cast %421 : vector<1x1x4x128xf32> to vector<4x128xf32>
    %423 = arith.mulf %123, %123 : vector<4x128xf32>
    %424 = arith.addf %422, %423 : vector<4x128xf32>
    %c0_106 = arith.constant 0 : index
    %c3_107 = arith.constant 3 : index
    %c0_108 = arith.constant 0 : index
    %c0_109 = arith.constant 0 : index
    %425 = vector.load %arg7[%c0_106, %c3_107, %c0_108, %c0_109] : memref<1x16x4x128xf32, #tpu.memory_space<vmem>>, vector<1x1x4x128xf32>
    %426 = vector.shape_cast %425 : vector<1x1x4x128xf32> to vector<4x128xf32>
    %427 = vector.shape_cast %424 : vector<4x128xf32> to vector<1x1x4x128xf32>
    tpu.vector_store %arg7[%c0_106, %c3_107, %c0_108, %c0_109], %427 {strides = array<i32>} : memref<1x16x4x128xf32, #tpu.memory_space<vmem>>, vector<1x1x4x128xf32>,
    %c0_110 = arith.constant 0 : index
    %c4_111 = arith.constant 4 : index
    %c0_112 = arith.constant 0 : index
    %c0_113 = arith.constant 0 : index
    %428 = vector.load %arg7[%c0_110, %c4_111, %c0_112, %c0_113] : memref<1x16x4x128xf32, #tpu.memory_space<vmem>>, vector<1x1x4x128xf32>
    %429 = vector.shape_cast %428 : vector<1x1x4x128xf32> to vector<4x128xf32>
    %430 = arith.mulf %212, %212 : vector<4x128xf32>
    %431 = arith.addf %429, %430 : vector<4x128xf32>
    %c0_114 = arith.constant 0 : index
    %c4_115 = arith.constant 4 : index
    %c0_116 = arith.constant 0 : index
    %c0_117 = arith.constant 0 : index
    %432 = vector.load %arg7[%c0_114, %c4_115, %c0_116, %c0_117] : memref<1x16x4x128xf32, #tpu.memory_space<vmem>>, vector<1x1x4x128xf32>
    %433 = vector.shape_cast %432 : vector<1x1x4x128xf32> to vector<4x128xf32>
    %434 = vector.shape_cast %431 : vector<4x128xf32> to vector<1x1x4x128xf32>
    tpu.vector_store %arg7[%c0_114, %c4_115, %c0_116, %c0_117], %434 {strides = array<i32>} : memref<1x16x4x128xf32, #tpu.memory_space<vmem>>, vector<1x1x4x128xf32>,
    %c0_118 = arith.constant 0 : index
    %c5_119 = arith.constant 5 : index
    %c0_120 = arith.constant 0 : index
    %c0_121 = arith.constant 0 : index
    %435 = vector.load %arg7[%c0_118, %c5_119, %c0_120, %c0_121] : memref<1x16x4x128xf32, #tpu.memory_space<vmem>>, vector<1x1x4x128xf32>
    %436 = vector.shape_cast %435 : vector<1x1x4x128xf32> to vector<4x128xf32>
    %437 = arith.mulf %213, %213 : vector<4x128xf32>
    %438 = arith.addf %436, %437 : vector<4x128xf32>
    %c0_122 = arith.constant 0 : index
    %c5_123 = arith.constant 5 : index
    %c0_124 = arith.constant 0 : index
    %c0_125 = arith.constant 0 : index
    %439 = vector.load %arg7[%c0_122, %c5_123, %c0_124, %c0_125] : memref<1x16x4x128xf32, #tpu.memory_space<vmem>>, vector<1x1x4x128xf32>
    %440 = vector.shape_cast %439 : vector<1x1x4x128xf32> to vector<4x128xf32>
    %441 = vector.shape_cast %438 : vector<4x128xf32> to vector<1x1x4x128xf32>
    tpu.vector_store %arg7[%c0_122, %c5_123, %c0_124, %c0_125], %441 {strides = array<i32>} : memref<1x16x4x128xf32, #tpu.memory_space<vmem>>, vector<1x1x4x128xf32>,
    %c0_126 = arith.constant 0 : index
    %c6_127 = arith.constant 6 : index
    %c0_128 = arith.constant 0 : index
    %c0_129 = arith.constant 0 : index
    %442 = vector.load %arg7[%c0_126, %c6_127, %c0_128, %c0_129] : memref<1x16x4x128xf32, #tpu.memory_space<vmem>>, vector<1x1x4x128xf32>
    %443 = vector.shape_cast %442 : vector<1x1x4x128xf32> to vector<4x128xf32>
    %444 = arith.mulf %214, %214 : vector<4x128xf32>
    %445 = arith.addf %443, %444 : vector<4x128xf32>
    %c0_130 = arith.constant 0 : index
    %c6_131 = arith.constant 6 : index
    %c0_132 = arith.constant 0 : index
    %c0_133 = arith.constant 0 : index
    %446 = vector.load %arg7[%c0_130, %c6_131, %c0_132, %c0_133] : memref<1x16x4x128xf32, #tpu.memory_space<vmem>>, vector<1x1x4x128xf32>
    %447 = vector.shape_cast %446 : vector<1x1x4x128xf32> to vector<4x128xf32>
    %448 = vector.shape_cast %445 : vector<4x128xf32> to vector<1x1x4x128xf32>
    tpu.vector_store %arg7[%c0_130, %c6_131, %c0_132, %c0_133], %448 {strides = array<i32>} : memref<1x16x4x128xf32, #tpu.memory_space<vmem>>, vector<1x1x4x128xf32>,
    %c0_134 = arith.constant 0 : index
    %c7_135 = arith.constant 7 : index
    %c0_136 = arith.constant 0 : index
    %c0_137 = arith.constant 0 : index
    %449 = vector.load %arg7[%c0_134, %c7_135, %c0_136, %c0_137] : memref<1x16x4x128xf32, #tpu.memory_space<vmem>>, vector<1x1x4x128xf32>
    %450 = vector.shape_cast %449 : vector<1x1x4x128xf32> to vector<4x128xf32>
    %451 = arith.mulf %215, %215 : vector<4x128xf32>
    %452 = arith.addf %450, %451 : vector<4x128xf32>
    %c0_138 = arith.constant 0 : index
    %c7_139 = arith.constant 7 : index
    %c0_140 = arith.constant 0 : index
    %c0_141 = arith.constant 0 : index
    %453 = vector.load %arg7[%c0_138, %c7_139, %c0_140, %c0_141] : memref<1x16x4x128xf32, #tpu.memory_space<vmem>>, vector<1x1x4x128xf32>
    %454 = vector.shape_cast %453 : vector<1x1x4x128xf32> to vector<4x128xf32>
    %455 = vector.shape_cast %452 : vector<4x128xf32> to vector<1x1x4x128xf32>
    tpu.vector_store %arg7[%c0_138, %c7_139, %c0_140, %c0_141], %455 {strides = array<i32>} : memref<1x16x4x128xf32, #tpu.memory_space<vmem>>, vector<1x1x4x128xf32>,
    %c0_142 = arith.constant 0 : index
    %c8_143 = arith.constant 8 : index
    %c0_144 = arith.constant 0 : index
    %c0_145 = arith.constant 0 : index
    %456 = vector.load %arg7[%c0_142, %c8_143, %c0_144, %c0_145] : memref<1x16x4x128xf32, #tpu.memory_space<vmem>>, vector<1x1x4x128xf32>
    %457 = vector.shape_cast %456 : vector<1x1x4x128xf32> to vector<4x128xf32>
    %458 = arith.mulf %120, %396 : vector<4x128xf32>
    %459 = arith.addf %457, %458 : vector<4x128xf32>
    %c0_146 = arith.constant 0 : index
    %c8_147 = arith.constant 8 : index
    %c0_148 = arith.constant 0 : index
    %c0_149 = arith.constant 0 : index
    %460 = vector.load %arg7[%c0_146, %c8_147, %c0_148, %c0_149] : memref<1x16x4x128xf32, #tpu.memory_space<vmem>>, vector<1x1x4x128xf32>
    %461 = vector.shape_cast %460 : vector<1x1x4x128xf32> to vector<4x128xf32>
    %462 = vector.shape_cast %459 : vector<4x128xf32> to vector<1x1x4x128xf32>
    tpu.vector_store %arg7[%c0_146, %c8_147, %c0_148, %c0_149], %462 {strides = array<i32>} : memref<1x16x4x128xf32, #tpu.memory_space<vmem>>, vector<1x1x4x128xf32>,
    %c0_150 = arith.constant 0 : index
    %c9_151 = arith.constant 9 : index
    %c0_152 = arith.constant 0 : index
    %c0_153 = arith.constant 0 : index
    %463 = vector.load %arg7[%c0_150, %c9_151, %c0_152, %c0_153] : memref<1x16x4x128xf32, #tpu.memory_space<vmem>>, vector<1x1x4x128xf32>
    %464 = vector.shape_cast %463 : vector<1x1x4x128xf32> to vector<4x128xf32>
    %465 = arith.mulf %121, %397 : vector<4x128xf32>
    %466 = arith.addf %464, %465 : vector<4x128xf32>
    %c0_154 = arith.constant 0 : index
    %c9_155 = arith.constant 9 : index
    %c0_156 = arith.constant 0 : index
    %c0_157 = arith.constant 0 : index
    %467 = vector.load %arg7[%c0_154, %c9_155, %c0_156, %c0_157] : memref<1x16x4x128xf32, #tpu.memory_space<vmem>>, vector<1x1x4x128xf32>
    %468 = vector.shape_cast %467 : vector<1x1x4x128xf32> to vector<4x128xf32>
    %469 = vector.shape_cast %466 : vector<4x128xf32> to vector<1x1x4x128xf32>
    tpu.vector_store %arg7[%c0_154, %c9_155, %c0_156, %c0_157], %469 {strides = array<i32>} : memref<1x16x4x128xf32, #tpu.memory_space<vmem>>, vector<1x1x4x128xf32>,
    %c0_158 = arith.constant 0 : index
    %c10_159 = arith.constant 10 : index
    %c0_160 = arith.constant 0 : index
    %c0_161 = arith.constant 0 : index
    %470 = vector.load %arg7[%c0_158, %c10_159, %c0_160, %c0_161] : memref<1x16x4x128xf32, #tpu.memory_space<vmem>>, vector<1x1x4x128xf32>
    %471 = vector.shape_cast %470 : vector<1x1x4x128xf32> to vector<4x128xf32>
    %472 = arith.mulf %122, %398 : vector<4x128xf32>
    %473 = arith.addf %471, %472 : vector<4x128xf32>
    %c0_162 = arith.constant 0 : index
    %c10_163 = arith.constant 10 : index
    %c0_164 = arith.constant 0 : index
    %c0_165 = arith.constant 0 : index
    %474 = vector.load %arg7[%c0_162, %c10_163, %c0_164, %c0_165] : memref<1x16x4x128xf32, #tpu.memory_space<vmem>>, vector<1x1x4x128xf32>
    %475 = vector.shape_cast %474 : vector<1x1x4x128xf32> to vector<4x128xf32>
    %476 = vector.shape_cast %473 : vector<4x128xf32> to vector<1x1x4x128xf32>
    tpu.vector_store %arg7[%c0_162, %c10_163, %c0_164, %c0_165], %476 {strides = array<i32>} : memref<1x16x4x128xf32, #tpu.memory_space<vmem>>, vector<1x1x4x128xf32>,
    %c0_166 = arith.constant 0 : index
    %c11_167 = arith.constant 11 : index
    %c0_168 = arith.constant 0 : index
    %c0_169 = arith.constant 0 : index
    %477 = vector.load %arg7[%c0_166, %c11_167, %c0_168, %c0_169] : memref<1x16x4x128xf32, #tpu.memory_space<vmem>>, vector<1x1x4x128xf32>
    %478 = vector.shape_cast %477 : vector<1x1x4x128xf32> to vector<4x128xf32>
    %479 = arith.mulf %123, %399 : vector<4x128xf32>
    %480 = arith.addf %478, %479 : vector<4x128xf32>
    %c0_170 = arith.constant 0 : index
    %c11_171 = arith.constant 11 : index
    %c0_172 = arith.constant 0 : index
    %c0_173 = arith.constant 0 : index
    %481 = vector.load %arg7[%c0_170, %c11_171, %c0_172, %c0_173] : memref<1x16x4x128xf32, #tpu.memory_space<vmem>>, vector<1x1x4x128xf32>
    %482 = vector.shape_cast %481 : vector<1x1x4x128xf32> to vector<4x128xf32>
    %483 = vector.shape_cast %480 : vector<4x128xf32> to vector<1x1x4x128xf32>
    tpu.vector_store %arg7[%c0_170, %c11_171, %c0_172, %c0_173], %483 {strides = array<i32>} : memref<1x16x4x128xf32, #tpu.memory_space<vmem>>, vector<1x1x4x128xf32>,
    %c0_174 = arith.constant 0 : index
    %c12_175 = arith.constant 12 : index
    %c0_176 = arith.constant 0 : index
    %c0_177 = arith.constant 0 : index
    %484 = vector.load %arg7[%c0_174, %c12_175, %c0_176, %c0_177] : memref<1x16x4x128xf32, #tpu.memory_space<vmem>>, vector<1x1x4x128xf32>
    %485 = vector.shape_cast %484 : vector<1x1x4x128xf32> to vector<4x128xf32>
    %486 = arith.mulf %212, %304 : vector<4x128xf32>
    %487 = arith.addf %485, %486 : vector<4x128xf32>
    %c0_178 = arith.constant 0 : index
    %c12_179 = arith.constant 12 : index
    %c0_180 = arith.constant 0 : index
    %c0_181 = arith.constant 0 : index
    %488 = vector.load %arg7[%c0_178, %c12_179, %c0_180, %c0_181] : memref<1x16x4x128xf32, #tpu.memory_space<vmem>>, vector<1x1x4x128xf32>
    %489 = vector.shape_cast %488 : vector<1x1x4x128xf32> to vector<4x128xf32>
    %490 = vector.shape_cast %487 : vector<4x128xf32> to vector<1x1x4x128xf32>
    tpu.vector_store %arg7[%c0_178, %c12_179, %c0_180, %c0_181], %490 {strides = array<i32>} : memref<1x16x4x128xf32, #tpu.memory_space<vmem>>, vector<1x1x4x128xf32>,
    %c0_182 = arith.constant 0 : index
    %c13_183 = arith.constant 13 : index
    %c0_184 = arith.constant 0 : index
    %c0_185 = arith.constant 0 : index
    %491 = vector.load %arg7[%c0_182, %c13_183, %c0_184, %c0_185] : memref<1x16x4x128xf32, #tpu.memory_space<vmem>>, vector<1x1x4x128xf32>
    %492 = vector.shape_cast %491 : vector<1x1x4x128xf32> to vector<4x128xf32>
    %493 = arith.mulf %213, %305 : vector<4x128xf32>
    %494 = arith.addf %492, %493 : vector<4x128xf32>
    %c0_186 = arith.constant 0 : index
    %c13_187 = arith.constant 13 : index
    %c0_188 = arith.constant 0 : index
    %c0_189 = arith.constant 0 : index
    %495 = vector.load %arg7[%c0_186, %c13_187, %c0_188, %c0_189] : memref<1x16x4x128xf32, #tpu.memory_space<vmem>>, vector<1x1x4x128xf32>
    %496 = vector.shape_cast %495 : vector<1x1x4x128xf32> to vector<4x128xf32>
    %497 = vector.shape_cast %494 : vector<4x128xf32> to vector<1x1x4x128xf32>
    tpu.vector_store %arg7[%c0_186, %c13_187, %c0_188, %c0_189], %497 {strides = array<i32>} : memref<1x16x4x128xf32, #tpu.memory_space<vmem>>, vector<1x1x4x128xf32>,
    %c0_190 = arith.constant 0 : index
    %c14_191 = arith.constant 14 : index
    %c0_192 = arith.constant 0 : index
    %c0_193 = arith.constant 0 : index
    %498 = vector.load %arg7[%c0_190, %c14_191, %c0_192, %c0_193] : memref<1x16x4x128xf32, #tpu.memory_space<vmem>>, vector<1x1x4x128xf32>
    %499 = vector.shape_cast %498 : vector<1x1x4x128xf32> to vector<4x128xf32>
    %500 = arith.mulf %214, %306 : vector<4x128xf32>
    %501 = arith.addf %499, %500 : vector<4x128xf32>
    %c0_194 = arith.constant 0 : index
    %c14_195 = arith.constant 14 : index
    %c0_196 = arith.constant 0 : index
    %c0_197 = arith.constant 0 : index
    %502 = vector.load %arg7[%c0_194, %c14_195, %c0_196, %c0_197] : memref<1x16x4x128xf32, #tpu.memory_space<vmem>>, vector<1x1x4x128xf32>
    %503 = vector.shape_cast %502 : vector<1x1x4x128xf32> to vector<4x128xf32>
    %504 = vector.shape_cast %501 : vector<4x128xf32> to vector<1x1x4x128xf32>
    tpu.vector_store %arg7[%c0_194, %c14_195, %c0_196, %c0_197], %504 {strides = array<i32>} : memref<1x16x4x128xf32, #tpu.memory_space<vmem>>, vector<1x1x4x128xf32>,
    %c0_198 = arith.constant 0 : index
    %c15_199 = arith.constant 15 : index
    %c0_200 = arith.constant 0 : index
    %c0_201 = arith.constant 0 : index
    %505 = vector.load %arg7[%c0_198, %c15_199, %c0_200, %c0_201] : memref<1x16x4x128xf32, #tpu.memory_space<vmem>>, vector<1x1x4x128xf32>
    %506 = vector.shape_cast %505 : vector<1x1x4x128xf32> to vector<4x128xf32>
    %507 = arith.mulf %215, %307 : vector<4x128xf32>
    %508 = arith.addf %506, %507 : vector<4x128xf32>
    %c0_202 = arith.constant 0 : index
    %c15_203 = arith.constant 15 : index
    %c0_204 = arith.constant 0 : index
    %c0_205 = arith.constant 0 : index
    %509 = vector.load %arg7[%c0_202, %c15_203, %c0_204, %c0_205] : memref<1x16x4x128xf32, #tpu.memory_space<vmem>>, vector<1x1x4x128xf32>
    %510 = vector.shape_cast %509 : vector<1x1x4x128xf32> to vector<4x128xf32>
    %511 = vector.shape_cast %508 : vector<4x128xf32> to vector<1x1x4x128xf32>
    tpu.vector_store %arg7[%c0_202, %c15_203, %c0_204, %c0_205], %511 {strides = array<i32>} : memref<1x16x4x128xf32, #tpu.memory_space<vmem>>, vector<1x1x4x128xf32>,
    return
  }
  func.func @transform_0(%arg0: i32, %arg1: i32) -> (i32, i32, i32) {
    %c1_i32 = arith.constant 1 : i32
    %0 = arith.muli %arg0, %c1_i32 : i32
    %1 = arith.addi %0, %arg1 : i32
    %c0_i32 = arith.constant 0 : i32
    %c0_i32_0 = arith.constant 0 : i32
    %c0_i32_1 = arith.constant 0 : i32
    return %c0_i32, %1, %c0_i32_0 : i32, i32, i32
  }
  func.func @transform_1(%arg0: i32, %arg1: i32) -> (i32, i32, i32) {
    %c1_i32 = arith.constant 1 : i32
    %0 = arith.muli %arg0, %c1_i32 : i32
    %1 = arith.addi %0, %arg1 : i32
    %c0_i32 = arith.constant 0 : i32
    %c0_i32_0 = arith.constant 0 : i32
    %c0_i32_1 = arith.constant 0 : i32
    return %c0_i32, %1, %c0_i32_0 : i32, i32, i32
  }
  func.func @transform_2(%arg0: i32, %arg1: i32) -> (i32, i32) {
    %c1_i32 = arith.constant 1 : i32
    %0 = arith.muli %arg0, %c1_i32 : i32
    %1 = arith.addi %0, %arg1 : i32
    %c0_i32 = arith.constant 0 : i32
    %c0_i32_0 = arith.constant 0 : i32
    return %1, %c0_i32 : i32, i32
  }
  func.func @transform_3(%arg0: i32, %arg1: i32) -> i32 {
    %c0_i32 = arith.constant 0 : i32
    %c0_i32_0 = arith.constant 0 : i32
    return %c0_i32 : i32
  }
  func.func @transform_4(%arg0: i32, %arg1: i32) -> i32 {
    %c0_i32 = arith.constant 0 : i32
    %c0_i32_0 = arith.constant 0 : i32
    return %c0_i32 : i32
  }
  func.func @transform_5(%arg0: i32, %arg1: i32) -> (i32, i32, i32, i32) {
    %c0_i32 = arith.constant 0 : i32
    %c0_i32_0 = arith.constant 0 : i32
    %c0_i32_1 = arith.constant 0 : i32
    %c0_i32_2 = arith.constant 0 : i32
    return %arg0, %c0_i32, %c0_i32_0, %c0_i32_1 : i32, i32, i32, i32
  }
}

</mosaic_0001>

<bundles_post_ra>
// kernel: vat2d_v2_forward.5
= control target key start
LH: loop header
LB: loop body
LE: loop exit
PB: predicated region body
PF: predicated region fallthrough
CT: control target
= control target key end

     0   :  { %s1315_s0 = inlined_call_operand.vmem [shape: f32[4,4,128], index: 0, kind: input, shape index: {}]   ;;  %s1316_s1 = inlined_call_operand.vmem [shape: f32[4,4,128], index: 1, kind: input, shape index: {}]   ;;  %s1317_s2 = inlined_call_operand.vmem [shape: f32[4,1], index: 2, kind: input, shape index: {}]   ;;  %s1318_s3 = inlined_call_operand.vmem [shape: f32[32], index: 3, kind: input, shape index: {}]   ;;  %s1319_s4 = inlined_call_operand.vmem [shape: f32[8], index: 4, kind: input, shape index: {}]   ;;  %s1320_s5 = inlined_call_operand.vmem [shape: f32[1,16,4,128], index: 5, kind: output, shape index: {}]  }
   0x1   :  { %1345 = sst [smem:[#allocation26_spill]] %s1320_s5 }
   0x2   :  { %10 = vsyncpa [#allocation3], 0  ;;  %s42_s20 = sshll.u32 %s1318_s3, 4  ;;  %s43_s20 = int_to_ptr.vmem [resolvable:$true] %s42_s20 }
   0x3   :  { %11 = vsyncpa [#allocation5], 0  ;;  %s52_s23 = sshll.u32 %s1319_s4, 4  ;;  %s670_s24 = scalar_lea.vmem %s43_s20, 16  ;;  %s53_s23 = int_to_ptr.vmem [resolvable:$true] %s52_s23 }
   0x4   :  { %p671_p0 = scmp.ne.s32.totalorder %s43_s20, %s670_s24  ;;  %p675_p1 = scmp.lt.s32.totalorder %s43_s20, %s43_s20 }
   0x5   :  { %p676_p2 = scmp.lt.s32.totalorder %s670_s24, %s670_s24 }
   0x7   :  { %p677_p3 = por %p676_p2, %p675_p1 }
   0x9   :  { %p678_p4 = pnand %p677_p3, %p671_p0 }
   0xb   :  { %681 = shalt.err (!%p678_p4)
}
   0xc   :  { %s698_s25 = smov [#allocation2]   ;;  %s682_s26 = scalar_lea.vmem %s53_s23, 16 }
   0xd   :  { %45 = dma.vmem_to_smem %s43_s20, 16, %s698_s25, [#allocation3]  }
   0xe   :  { %p683_p5 = scmp.ne.s32.totalorder %s53_s23, %s682_s26  ;;  %p687_p6 = scmp.lt.s32.totalorder %s53_s23, %s53_s23 }
   0xf   :  { %p688_p7 = scmp.lt.s32.totalorder %s682_s26, %s682_s26 }
  0x11   :  { %p689_p8 = por %p688_p7, %p687_p6 }
  0x13   :  { %p690_p9 = pnand %p689_p8, %p683_p5 }
  0x15   :  { %693 = shalt.err (!%p690_p9)
}
  0x16   :  { %s699_s3 = smov [#allocation4]  }
  0x17   :  { %55 = dma.vmem_to_smem %s53_s23, 16, %s699_s3, [#allocation5]  }
  0x18   :  { %694 = dma.done.wait [#allocation3], 16  }
  0x19   :  { %695 = vsyncadd [#allocation3], 4294967280 }
  0x1a   :  { %696 = dma.done.wait [#allocation5], 16  }
  0x1b   :  { %697 = vsyncadd [#allocation5], 4294967280 }
  0x1c   :  { %62 = sfence }
  0x1d   :  { %v116_v0 = vld [vmem:[%s1317_s2] sm:$0xf]  ;;  %v700_v1 = vmov 0   ;;  %v701_v2 = vmov 0.0   ;;  %s789_s7 = sld [smem:[#allocation2]] }
  0x1e   :  { %629 = vset.pattern.permute.xlu0 %v700_v1  ;;  %100 = vst [vmem:[%s1320_s5] sm:$0xf] %v701_v2  ;;  %101 = vst [vmem:[%s1320_s5 + $0x4] sm:$0xf] %v701_v2  ;;  %s791_s8 = sld [smem:[#allocation2 + $0x1]]  ;;  %v834_v5 = vld [vmem:[%s1315_s0] sm:$0xf] }
  0x1f   :  { %102 = vst [vmem:[%s1320_s5 + $0x8] sm:$0xf] %v701_v2  ;;  %103 = vst [vmem:[%s1320_s5 + $0xc] sm:$0xf] %v701_v2  ;;  %127 = vperm.xlu0 %629, %v116_v0   ;;  %s793_s9 = sld [smem:[#allocation2 + $0x2]] }
  0x20   :  { %104 = vst [vmem:[%s1320_s5 + $0x10] sm:$0xf] %v701_v2  ;;  %105 = vst [vmem:[%s1320_s5 + $0x14] sm:$0xf] %v701_v2  ;;  %s795_s10 = sld [smem:[#allocation2 + $0x3]] }
  0x21   :  { %106 = vst [vmem:[%s1320_s5 + $0x18] sm:$0xf] %v701_v2  ;;  %107 = vst [vmem:[%s1320_s5 + $0x1c] sm:$0xf] %v701_v2  ;;  %s797_s2 = sld [smem:[#allocation4]] }
  0x22   :  { %108 = vst [vmem:[%s1320_s5 + $0x20] sm:$0xf] %v701_v2  ;;  %109 = vst [vmem:[%s1320_s5 + $0x24] sm:$0xf] %v701_v2  ;;  %s799_s11 = sld [smem:[#allocation2 + $0x4]] }
  0x23   :  { %110 = vst [vmem:[%s1320_s5 + $0x28] sm:$0xf] %v701_v2  ;;  %111 = vst [vmem:[%s1320_s5 + $0x2c] sm:$0xf] %v701_v2  ;;  %s801_s12 = sld [smem:[#allocation2 + $0x5]]  ;;  %v145_v3 = vstv %s789_s7 }
  0x24   :  { %112 = vst [vmem:[%s1320_s5 + $0x30] sm:$0xf] %v701_v2  ;;  %113 = vst [vmem:[%s1320_s5 + $0x34] sm:$0xf] %v701_v2  ;;  %s803_s13 = sld [smem:[#allocation2 + $0x6]]  ;;  %v148_v4 = vstv %s791_s8  ;;  %v336_v9 = vmul.f32 %v145_v3, %v834_v5 }
  0x25   :  { %114 = vst [vmem:[%s1320_s5 + $0x38] sm:$0xf] %v701_v2  ;;  %115 = vst [vmem:[%s1320_s5 + $0x3c] sm:$0xf] %v701_v2  ;;  %s805_s14 = sld [smem:[#allocation2 + $0x7]]  ;;  %v152_v16 = vstv %s793_s9 }
  0x26   :  { %s807_s15 = sld [smem:[#allocation4 + $0x1]]  ;;  %v839_v6 = vld [vmem:[%s1315_s0 + $0x4] sm:$0xf]  ;;  %v864_v15 = vld [vmem:[%s1315_s0 + $0x8] sm:$0xf]  ;;  %v156_v26 = vstv %s795_s10 }
  0x27   :  { %s809_s16 = sld [smem:[#allocation2 + $0x8]]  ;;  %v337_v10 = vmul.f32 %v839_v6, %v148_v4  ;;  %v339_v20 = vmul.f32 %v864_v15, %v152_v16  ;;  %v160_v27 = vstv %s797_s2  ;;  %v917_v38 = vld [vmem:[%s1315_s0 + $0xc] sm:$0xf] }
  0x28   :  { %s811_s17 = sld [smem:[#allocation2 + $0x9]]  ;;  %v163_v7 = vstv %s799_s11  ;;  %v341_v43 = vmul.f32 %v917_v38, %v156_v26 }
  0x29   :  { %s813_s18 = sld [smem:[#allocation2 + $0x10]]  ;;  %v166_v8 = vstv %s801_s12  ;;  %v344_v17 = vmul.f32 %v163_v7, %v834_v5  ;;  %v338_v19 = vadd.f32 %v337_v10, %v336_v9 }
  0x2a   :  { %s815_s19 = sld [smem:[#allocation2 + $0x11]]  ;;  %v345_v18 = vmul.f32 %v839_v6, %v166_v8  ;;  %v170_v23 = vstv %s803_s13 }
  0x2b   :  { %s817_s20 = sld [smem:[#allocation2 + $0x14]]  ;;  %v174_v28 = vstv %s805_s14  ;;  %v347_v29 = vmul.f32 %v864_v15, %v170_v23  ;;  %v340_v35 = vadd.f32 %v339_v20, %v338_v19 }
  0x2c   :  { %s819_s21 = sld [smem:[#allocation2 + $0x15]]  ;;  %v346_v33 = vadd.f32 %v345_v18, %v344_v17  ;;  %v349_v44 = vmul.f32 %v917_v38, %v174_v28 }
  0x2d   :  { %s821_s22 = sld [smem:[#allocation2 + $0xa]]  ;;  %v181_v30 = vstv %s809_s16 }
  0x2e   :  { %s823_s23 = sld [smem:[#allocation2 + $0xc]]  ;;  %v184_v31 = vstv %s811_s17  ;;  %v352_v50 = vmul.f32 %v181_v30, %v834_v5  ;;  %v348_v1 = vadd.f32 %v347_v29, %v346_v33 }
  0x2f   :  { %1346 = sst [smem:[#allocation8_spill]] %s813_s18  ;;  %v241_v11 = vstv %s813_s18  ;;  %v353_v51 = vmul.f32 %v839_v6, %v184_v31 }
  0x30   :  { %1347 = sst [smem:[#allocation9_spill]] %s815_s19  ;;  %v244_v12 = vstv %s815_s19  ;;  %v392_v21 = vmul.f32 %v241_v11, %v834_v5 }
  0x31   :  { %1348 = sst [smem:[#allocation10_spill]] %s817_s20  ;;  %v259_v13 = vstv %s817_s20  ;;  %v393_v22 = vmul.f32 %v839_v6, %v244_v12  ;;  %v354_v10 = vadd.f32 %v353_v51, %v352_v50 }
  0x32   :  { %1349 = sst [smem:[#allocation11_spill]] %s819_s21  ;;  %v262_v14 = vstv %s819_s21  ;;  %v400_v24 = vmul.f32 %v259_v13, %v834_v5 }
  0x33   :  { %s827_s24 = sld [smem:[#allocation2 + $0x12]]  ;;  %v401_v25 = vmul.f32 %v839_v6, %v262_v14  ;;  %v394_v36 = vadd.f32 %v393_v22, %v392_v21  ;;  %v188_v47 = vstv %s821_s22 }
  0x34   :  { %s829_s25 = sld [smem:[#allocation2 + $0x13]]  ;;  %v199_v63 = vstv %s823_s23  ;;  %v355_v2 = vmul.f32 %v864_v15, %v188_v47 }
  0x35   :  { %s841_s28 = sld [smem:[#allocation2 + $0x16]]  ;;  %v402_v41 = vadd.f32 %v401_v25, %v400_v24  ;;  %v360_v17 = vmul.f32 %v199_v63, %v834_v5 }
  0x36   :  { %s845_s29 = sld [smem:[#allocation2 + $0x18]]  ;;  %v356_v50 = vadd.f32 %v355_v2, %v354_v10 }
  0x37   :  { %s855_s30 = sld [smem:[#allocation2 + $0x19]] }
  0x38   :  { %s859_s6 = sld [smem:[#allocation2 + $0x17]] }
  0x39   :  { %1350 = sst [smem:[#allocation12_spill]] %s827_s24  ;;  %v248_v32 = vstv %s827_s24 }
  0x3a   :  { %s867_s4 = sld [smem:[#allocation2 + $0x1a]]  ;;  %v395_v37 = vmul.f32 %v864_v15, %v248_v32  ;;  %v252_v48 = vstv %s829_s25 }
  0x3b   :  { %s875_s27 = sld [smem:[#allocation2 + $0x1c]]  ;;  %v266_v34 = vstv %s841_s28  ;;  %v397_v53 = vmul.f32 %v917_v38, %v252_v48 }
  0x3c   :  { %s887_s26 = sld [smem:[#allocation2 + $0x1d]]  ;;  %v277_v39 = vstv %s845_s29  ;;  %v403_v42 = vmul.f32 %v864_v15, %v266_v34  ;;  %v396_v52 = vadd.f32 %v395_v37, %v394_v36  ;;  %v178_v36 = vstv %s807_s15 }
  0x3d   :  { %s898_s3 = sld [smem:[#allocation2 + $0xd]]  ;;  %v280_v40 = vstv %s855_s30  ;;  %v408_v45 = vmul.f32 %v277_v39, %v834_v5 }
  0x3e   :  { %1351 = sst [smem:[#allocation13_spill]] %s859_s6  ;;  %v409_v46 = vmul.f32 %v839_v6, %v280_v40  ;;  %v270_v49 = vstv %s859_s6  ;;  %v404_v58 = vadd.f32 %v403_v42, %v402_v41  ;;  %v398_v21 = vadd.f32 %v397_v53, %v396_v52 }
  0x3f   :  { %s906_s5 = sld [smem:[#allocation4 + $0x4]]  ;;  %v405_v54 = vmul.f32 %v917_v38, %v270_v49  ;;  %v342_v42 = vadd.f32 %v341_v43, %v340_v35 }
  0x40   :  { %1352 = sst [smem:[#allocation14_spill]] %s867_s4  ;;  %v284_v55 = vstv %s867_s4  ;;  %v410_v59 = vadd.f32 %v409_v46, %v408_v45  ;;  %v350_v46 = vadd.f32 %v349_v44, %v348_v1 }
  0x41   :  { %1353 = sst [smem:[#allocation15_spill]] %s875_s27  ;;  %v295_v56 = vstv %s875_s27  ;;  %v411_v60 = vmul.f32 %v864_v15, %v284_v55  ;;  %v406_v22 = vadd.f32 %v405_v54, %v404_v58 }
  0x42   :  { %1354 = sst [smem:[#allocation16_spill]] %s887_s26  ;;  %v298_v57 = vstv %s887_s26  ;;  %v416_v61 = vmul.f32 %v295_v56, %v834_v5  ;;  %v1027_v1 = vadd.f32 %v350_v46, %v178_v36 }
  0x43   :  { %s909_s21 = sld [smem:[#allocation2 + $0x1b]]  ;;  %v417_v62 = vmul.f32 %v839_v6, %v298_v57  ;;  %v202_v0 = vstv %s898_s3  ;;  %v412_v24 = vadd.f32 %v411_v60, %v410_v59 }
  0x44   :  { %s921_s18 = sld [smem:[#allocation2 + $0x1e]]  ;;  %v361_v18 = vmul.f32 %v839_v6, %v202_v0 }
  0x45   :  { %1355 = sst [smem:[#allocation17_spill]] %s906_s5  ;;  %v256_v9 = vstv %s906_s5  ;;  %v418_v29 = vadd.f32 %v417_v62, %v416_v61  ;;  %v343_v61 = vadd.f32 %v342_v42, %v160_v27 }
  0x46   :  { %s926_s24 = sld [smem:[#allocation2 + $0xb]]  ;;  %v362_v53 = vadd.f32 %v361_v18, %v360_v17  ;;  %v399_v43 = vadd.f32 %v398_v21, %v256_v9 }
  0x47   :  { %s943_s0 = sld [smem:[#allocation4 + $0x5]] }
  0x48   :  { %s948_s19 = sld [smem:[#allocation2 + $0xe]] }
  0x49   :  { %1356 = sst [smem:[#allocation18_spill]] %s909_s21  ;;  %v288_v19 = vstv %s909_s21 }
  0x4a   :  { %1357 = sst [smem:[#allocation19_spill]] %s921_s18  ;;  %v1344_v20 = vstv %s921_s18  ;;  %v413_v25 = vmul.f32 %v917_v38, %v288_v19 }
  0x4b   :  { %s962_s20 = sld [smem:[#allocation2 + $0x1f]]  ;;  %v419_v33 = vmul.f32 %v864_v15, %v1344_v20 }
  0x4c   :  { %s978_s6 = sld [smem:[#allocation2 + $0xf]]  ;;  %v192_v37 = vstv %s926_s24  ;;  %v414_v44 = vadd.f32 %v413_v25, %v412_v24 }
  0x4d   :  { %1358 = sst [smem:[#allocation20_spill]] %s943_s0  ;;  %v274_v41 = vstv %s943_s0  ;;  %v357_v51 = vmul.f32 %v917_v38, %v192_v37  ;;  %v420_v58 = vadd.f32 %v419_v33, %v418_v29  ;;  %v368_v29 = vmax.f32 %v343_v61, %v1027_v1 }
  0x4e   :  { %s988_s26 = sld [smem:[#allocation4 + $0x6]]  ;;  %v206_v45 = vstv %s948_s19  ;;  %v407_v54 = vadd.f32 %v406_v22, %v274_v41 }
  0x4f   :  { %s1000_s27 = sld [smem:[#allocation4 + $0x2]]  ;;  %v363_v35 = vmul.f32 %v864_v15, %v206_v45  ;;  %v358_v2 = vadd.f32 %v357_v51, %v356_v50 }
  0x50   :  { %s1007_s18 = sld [smem:[#allocation4 + $0x7]]  ;;  %v424_v22 = vmax.f32 %v399_v43, %v407_v54 }
  0x51   :  { %1359 = sst [smem:[#allocation21_spill]] %s962_s20  ;;  %v1333_v52 = vstv %s962_s20  ;;  %v364_v17 = vadd.f32 %v363_v35, %v362_v53 }
  0x52   :  { %v421_v59 = vmul.f32 %v917_v38, %v1333_v52  ;;  %v210_v60 = vstv %s978_s6  ;;  %s1022_s21 = sld [smem:[#allocation4 + $0x3]] }
  0x53   :  { %v365_v10 = vmul.f32 %v917_v38, %v210_v60  ;;  %s1386_s28 = sld [smem:[#allocation26_spill]] }
  0x54   :  { %1360 = sst [smem:[#allocation22_spill]] %s988_s26  ;;  %v1343_v62 = vstv %s988_s26  ;;  %v422_v21 = vadd.f32 %v421_v59, %v420_v58  ;;  %v124_v59 = vld [vmem:[%s1316_s1] sm:$0xf] }
  0x55   :  { %1361 = sst [smem:[#allocation23_spill]] %s1000_s27  ;;  %v415_v18 = vadd.f32 %v414_v44, %v1343_v62  ;;  %v196_v24 = vstv %s1000_s27  ;;  %v366_v42 = vadd.f32 %v365_v10, %v364_v17  ;;  %v555_v10 = vld [vmem:[%s1316_s1 + $0x8] sm:$0xf]  ;;  %v556_v17 = vld [vmem:[%s1316_s1 + $0xc] sm:$0xf] }
  0x56   :  { %1362 = sst [smem:[#allocation24_spill]] %s1007_s18  ;;  %v1342_v25 = vstv %s1007_s18  ;;  %v1039_v33 = vadd.f32 %v358_v2, %v196_v24  ;;  %v554_v2 = vld [vmem:[%s1316_s1 + $0x4] sm:$0xf] }
  0x57   :  { %v1043_v46 = vadd.f32 %v422_v21, %v1342_v25  ;;  %v425_v50 = vmax.f32 %v424_v22, %v415_v18  ;;  %s1378_s18 = sld [smem:[#allocation19_spill]] }
  0x58   :  { %1363 = sst [smem:[#allocation25_spill]] %s1022_s21  ;;  %v214_v51 = vstv %s1022_s21  ;;  %v369_v53 = vmax.f32 %v368_v29, %v1039_v33 }
  0x59   :  { %v1048_v52 = vadd.f32 %v366_v42, %v214_v51  ;;  %v1052_v35 = vmax.f32 %v425_v50, %v1043_v46  ;;  %s1379_s21 = sld [smem:[#allocation21_spill]] }
  0x5a   :  { %s1380_s22 = sld [smem:[#allocation22_spill]] }
  0x5b   :  { %v1055_v44 = vmax.f32 %v369_v53, %v1048_v52  ;;  %v427_v58 = vsub.f32 %v399_v43, %v1052_v35  ;;  %v430_v29 = vsub.f32 %v407_v54, %v1052_v35  ;;  %v433_v42 = vsub.f32 %v415_v18, %v1052_v35  ;;  %s1384_s23 = sld [smem:[#allocation24_spill]] }
  0x5d   :  { %v371_v22 = vsub.f32 %v343_v61, %v1055_v44  ;;  %v428_v43 = vmul.f32 1.442695, %v427_v58  ;;  %v374_v20 = vsub.f32 %v1027_v1, %v1055_v44  ;;  %v377_v61 = vsub.f32 %v1039_v33, %v1055_v44 }
  0x5e   :  { %v380_v54 = vsub.f32 %v1048_v52, %v1055_v44 }
  0x5f   :  { %630 = vpow2.f32 %v428_v43 }
  0x9a   :  { %v128_v21 = vpop.permute.xlu0 %127 }
  0x9b   :  { %v130_v50 = vmul.f32 %v128_v21, %v124_v59  ;;  %v134_v53 = vmul.f32 %v554_v2, %v128_v21  ;;  %v138_v25 = vmul.f32 %v555_v10, %v128_v21  ;;  %v142_v62 = vmul.f32 %v556_v17, %v128_v21 }
  0x9c   :  { %v1087_v10 = vmul.f32 1.442695, %v371_v22  ;;  %v431_v17 = vmul.f32 1.442695, %v430_v29  ;;  %v1089_v21 = vmul.f32 1.442695, %v433_v42 }
  0x9d   :  { %v131_v18 = vadd.f32 %v130_v50, %v834_v5  ;;  %v135_v58 = vadd.f32 %v839_v6, %v134_v53  ;;  %v1082_v59 = vadd.f32 %v864_v15, %v138_v25  ;;  %v1085_v2 = vadd.f32 %v917_v38, %v142_v62 }
  0x9e   :  { %v436_v5 = vsub.f32 %v1043_v46, %v1052_v35  ;;  %632 = vpow2.f32 %v431_v17 }
  0x9f   :  { %v146_v6 = vmul.f32 %v145_v3, %v131_v18  ;;  %v149_v15 = vmul.f32 %v148_v4, %v135_v58  ;;  %v153_v38 = vmul.f32 %v152_v16, %v1082_v59  ;;  %v157_v62 = vmul.f32 %v156_v26, %v1085_v2 }
  0xa0   :  { %v164_v25 = vmul.f32 %v163_v7, %v131_v18  ;;  %v167_v22 = vmul.f32 %v166_v8, %v135_v58  ;;  %v171_v29 = vmul.f32 %v170_v23, %v1082_v59  ;;  %v175_v4 = vmul.f32 %v174_v28, %v1085_v2 }
  0xa1   :  { %v150_v3 = vadd.f32 %v149_v15, %v146_v6  ;;  %v182_v16 = vmul.f32 %v181_v30, %v131_v18  ;;  %v185_v43 = vmul.f32 %v184_v31, %v135_v58  ;;  %v189_v7 = vmul.f32 %v188_v47, %v1082_v59 }
  0xa2   :  { %v168_v26 = vadd.f32 %v167_v22, %v164_v25  ;;  %v200_v8 = vmul.f32 %v199_v63, %v131_v18  ;;  %v203_v42 = vmul.f32 %v202_v0, %v135_v58  ;;  %v193_v28 = vmul.f32 %v192_v37, %v1085_v2 }
  0xa3   :  { %v154_v23 = vadd.f32 %v153_v38, %v150_v3  ;;  %v186_v50 = vadd.f32 %v185_v43, %v182_v16  ;;  %v207_v30 = vmul.f32 %v206_v45, %v1082_v59  ;;  %v242_v47 = vmul.f32 %v241_v11, %v131_v18 }
  0xa4   :  { %v172_v31 = vadd.f32 %v171_v29, %v168_v26  ;;  %v204_v53 = vadd.f32 %v203_v42, %v200_v8  ;;  %v245_v63 = vmul.f32 %v244_v12, %v135_v58  ;;  %v211_v15 = vmul.f32 %v210_v60, %v1085_v2 }
  0xa5   :  { %v158_v0 = vadd.f32 %v157_v62, %v154_v23  ;;  %v190_v6 = vadd.f32 %v189_v7, %v186_v50  ;;  %v249_v37 = vmul.f32 %v248_v32, %v1082_v59  ;;  %v260_v11 = vmul.f32 %v259_v13, %v131_v18 }
  0xa6   :  { %v176_v45 = vadd.f32 %v175_v4, %v172_v31  ;;  %v208_v38 = vadd.f32 %v207_v30, %v204_v53  ;;  %v246_v25 = vadd.f32 %v245_v63, %v242_v47  ;;  %v263_v22 = vmul.f32 %v262_v14, %v135_v58 }
  0xa7   :  { %v161_v12 = vadd.f32 %v160_v27, %v158_v0  ;;  %v194_v62 = vadd.f32 %v193_v28, %v190_v6  ;;  %v253_v3 = vmul.f32 %v252_v48, %v1085_v2  ;;  %v267_v13 = vmul.f32 %v266_v34, %v1082_v59 }
  0xa8   :  { %v179_v60 = vadd.f32 %v178_v36, %v176_v45  ;;  %v212_v29 = vadd.f32 %v211_v15, %v208_v38  ;;  %v250_v32 = vadd.f32 %v249_v37, %v246_v25  ;;  %v264_v4 = vadd.f32 %v263_v22, %v260_v11 }
  0xa9   :  { %v278_v27 = vmul.f32 %v277_v39, %v131_v18  ;;  %v281_v14 = vmul.f32 %v280_v40, %v135_v58  ;;  %v197_v17 = vadd.f32 %v196_v24, %v194_v62  ;;  %v271_v43 = vmul.f32 %v270_v49, %v1085_v2  ;;  %v1168_v39 = vpop.eup %630 }
  0xaa   :  { %v216_v36 = vmax.f32 %v161_v12, %v179_v60  ;;  %v254_v16 = vadd.f32 %v253_v3, %v250_v32  ;;  %v268_v26 = vadd.f32 %v267_v13, %v264_v4  ;;  %v285_v7 = vmul.f32 %v284_v55, %v1082_v59 }
  0xab   :  { %v282_v48 = vadd.f32 %v281_v14, %v278_v27  ;;  %v296_v34 = vmul.f32 %v295_v56, %v131_v18  ;;  %v215_v40 = vadd.f32 %v214_v51, %v212_v29  ;;  %v299_v8 = vmul.f32 %v298_v57, %v135_v58  ;;  %v633_v6 = vpop.eup %632 }
  0xac   :  { %v217_v24 = vmax.f32 %v216_v36, %v197_v17  ;;  %v375_v49 = vmul.f32 1.442695, %v374_v20  ;;  %v257_v42 = vadd.f32 %v256_v9, %v254_v16  ;;  %v272_v23 = vadd.f32 %v271_v43, %v268_v26 }
  0xad   :  { %v286_v55 = vadd.f32 %v285_v7, %v282_v48  ;;  %v289_v56 = vmul.f32 %v288_v19, %v1085_v2  ;;  %v300_v50 = vadd.f32 %v299_v8, %v296_v34  ;;  %634 = vpow2.f32 %v1089_v21 }
  0xae   :  { %v218_v18 = vmax.f32 %v217_v24, %v215_v40  ;;  %v437_v57 = vmul.f32 1.442695, %v436_v5  ;;  %v275_v1 = vadd.f32 %v274_v41, %v272_v23  ;;  %v1381_v51 = vstv %s1378_s18 }
  0xaf   :  { %v290_v20 = vadd.f32 %v289_v56, %v286_v55  ;;  %v303_v9 = vmul.f32 %v1381_v51, %v1082_v59  ;;  %636 = vpow2.f32 %v1087_v10  ;;  %v1382_v19 = vstv %s1379_s21 }
  0xb0   :  { %v219_v58 = vsub.f32 %v161_v12, %v218_v18  ;;  %v222_v28 = vsub.f32 %v179_v60, %v218_v18  ;;  %v225_v30 = vsub.f32 %v197_v17, %v218_v18  ;;  %v307_v31 = vmul.f32 %v1382_v19, %v1085_v2  ;;  %v448_v19 = vld [vmem:[%s1386_s28] sm:$0xf] }
  0xb1   :  { %v228_v53 = vsub.f32 %v215_v40, %v218_v18  ;;  %v1383_v21 = vstv %s1380_s22  ;;  %v304_v46 = vadd.f32 %v303_v9, %v300_v50  ;;  %v312_v35 = vmax.f32 %v257_v42, %v275_v1 }
  0xb2   :  { %v293_v47 = vadd.f32 %v1383_v21, %v290_v20  ;;  %v220_v5 = vmul.f32 1.442695, %v219_v58  ;;  %v223_v41 = vmul.f32 1.442695, %v222_v28  ;;  %v378_v59 = vmul.f32 1.442695, %v377_v61 }
  0xb3   :  { %638 = vpow2.f32 %v437_v57  ;;  %v226_v10 = vmul.f32 1.442695, %v225_v30  ;;  %v308_v63 = vadd.f32 %v307_v31, %v304_v46  ;;  %v229_v2 = vmul.f32 1.442695, %v228_v53  ;;  %v595_v31 = vld [vmem:[%s1386_s28 + $0x4] sm:$0xf] }
  0xb4   :  { %v313_v0 = vmax.f32 %v312_v35, %v293_v47  ;;  %640 = vpow2.f32 %v375_v49  ;;  %v1385_v15 = vstv %s1384_s23  ;;  %v381_v38 = vmul.f32 1.442695, %v380_v54  ;;  %v597_v53 = vld [vmem:[%s1386_s28 + $0x8] sm:$0xf]  ;;  %v609_v21 = vld [vmem:[%s1386_s28 + $0x20] sm:$0xf] }
  0xb5   :  { %642 = vpow2.f32 %v220_v5  ;;  %v311_v37 = vadd.f32 %v1385_v15, %v308_v63  ;;  %v439_v12 = vadd.f32 %v633_v6, %v1168_v39 }
  0xb6   :  { %644 = vpow2.f32 %v223_v41  ;;  %v611_v41 = vld [vmem:[%s1386_s28 + $0x24] sm:$0xf] }
  0xb7   :  { %646 = vpow2.f32 %v378_v59  ;;  %v314_v45 = vmax.f32 %v313_v0, %v311_v37  ;;  %v613_v59 = vld [vmem:[%s1386_s28 + $0x28] sm:$0xf] }
  0xb8   :  { %648 = vpow2.f32 %v226_v10  ;;  %v615_v10 = vld [vmem:[%s1386_s28 + $0x2c] sm:$0xf] }
  0xb9   :  { %650 = vpow2.f32 %v229_v2  ;;  %v315_v33 = vsub.f32 %v257_v42, %v314_v45  ;;  %v318_v61 = vsub.f32 %v275_v1, %v314_v45  ;;  %v321_v25 = vsub.f32 %v293_v47, %v314_v45 }
  0xba   :  { %v324_v11 = vsub.f32 %v311_v37, %v314_v45  ;;  %v635_v62 = vpop.eup %634  ;;  %652 = vpow2.f32 %v381_v38 }
  0xbb   :  { %v316_v22 = vmul.f32 1.442695, %v315_v33  ;;  %v319_v60 = vmul.f32 1.442695, %v318_v61  ;;  %v322_v32 = vmul.f32 1.442695, %v321_v25  ;;  %v440_v4 = vadd.f32 %v635_v62, %v439_v12 }
  0xbc   :  { %v1206_v29 = vpop.eup %636  ;;  %v325_v3 = vmul.f32 1.442695, %v324_v11 }
  0xbd   :  { %654 = vpow2.f32 %v316_v22 }
  0xbe   :  { %656 = vpow2.f32 %v319_v60 }
  0xbf   :  { %658 = vpow2.f32 %v322_v32 }
  0xc0   :  { %v639_v52 = vpop.eup %638  ;;  %660 = vpow2.f32 %v325_v3 }
  0xc1   :  { %v1208_v44 = vpop.eup %640  ;;  %v441_v27 = vadd.f32 %v639_v52, %v440_v4 }
  0xc2   :  { %v643_v54 = vpop.eup %642  ;;  %v383_v36 = vadd.f32 %v1208_v44, %v1206_v29 }
  0xc3   :  { %v645_v13 = vpop.eup %644  ;;  %662 = vrcp.f32 %v441_v27  ;;  %v601_v27 = vld [vmem:[%s1386_s28 + $0x10] sm:$0xf] }
  0xc4   :  { %v1210_v14 = vpop.eup %646  ;;  %v231_v17 = vadd.f32 %v645_v13, %v643_v54 }
  0xc5   :  { %v649_v16 = vpop.eup %648  ;;  %v384_v7 = vadd.f32 %v1210_v14, %v383_v36 }
  0xc6   :  { %v232_v43 = vadd.f32 %v649_v16, %v231_v17  ;;  %v651_v26 = vpop.eup %650  ;;  %v603_v17 = vld [vmem:[%s1386_s28 + $0x14] sm:$0xf] }
  0xc7   :  { %v653_v34 = vpop.eup %652 }
  0xc8   :  { %v233_v48 = vadd.f32 %v651_v26, %v232_v43  ;;  %v385_v8 = vadd.f32 %v653_v34, %v384_v7  ;;  %v621_v7 = vld [vmem:[%s1386_s28 + $0x38] sm:$0xf] }
  0xca   :  { %664 = vrcp.f32 %v233_v48  ;;  %v655_v40 = vpop.eup %654  ;;  %v619_v48 = vld [vmem:[%s1386_s28 + $0x34] sm:$0xf] }
  0xcb   :  { %v657_v24 = vpop.eup %656  ;;  %666 = vrcp.f32 %v385_v8 }
  0xcc   :  { %v327_v49 = vadd.f32 %v657_v24, %v655_v40  ;;  %v659_v42 = vpop.eup %658 }
  0xcd   :  { %v661_v55 = vpop.eup %660 }
  0xce   :  { %v328_v23 = vadd.f32 %v659_v42, %v327_v49 }
  0xd0   :  { %v329_v56 = vadd.f32 %v661_v55, %v328_v23  ;;  %v663_v18 = vpop.eup %662 }
  0xd1   :  { %v444_v57 = vmul.f32 %v663_v18, %v1168_v39  ;;  %v445_v1 = vmul.f32 %v663_v18, %v633_v6  ;;  %v446_v20 = vmul.f32 %v663_v18, %v635_v62  ;;  %v447_v51 = vmul.f32 %v663_v18, %v639_v52  ;;  %v599_v39 = vld [vmem:[%s1386_s28 + $0xc] sm:$0xf] }
  0xd2   :  { %668 = vrcp.f32 %v329_v56 }
  0xd7   :  { %v665_v50 = vpop.eup %664 }
  0xd8   :  { %v236_v9 = vmul.f32 %v665_v50, %v643_v54  ;;  %v237_v58 = vmul.f32 %v665_v50, %v645_v13  ;;  %v238_v28 = vmul.f32 %v665_v50, %v649_v16  ;;  %v239_v30 = vmul.f32 %v665_v50, %v651_v26  ;;  %v667_v33 = vpop.eup %666 }
  0xd9   :  { %v388_v22 = vmul.f32 %v667_v33, %v1206_v29  ;;  %v389_v60 = vmul.f32 %v667_v33, %v1208_v44  ;;  %v390_v32 = vmul.f32 %v667_v33, %v1210_v14  ;;  %v391_v3 = vmul.f32 %v667_v33, %v653_v34  ;;  %v605_v29 = vld [vmem:[%s1386_s28 + $0x18] sm:$0xf]  ;;  %v607_v44 = vld [vmem:[%s1386_s28 + $0x1c] sm:$0xf]  ;;  %v617_v14 = vld [vmem:[%s1386_s28 + $0x30] sm:$0xf] }
  0xda   :  { %v449_v47 = vmul.f32 %v236_v9, %v236_v9  ;;  %v454_v46 = vmul.f32 %v237_v58, %v237_v58  ;;  %v459_v35 = vmul.f32 %v238_v28, %v238_v28  ;;  %v464_v5 = vmul.f32 %v239_v30, %v239_v30  ;;  %v623_v34 = vld [vmem:[%s1386_s28 + $0x3c] sm:$0xf] }
  0xdb   :  { %v489_v63 = vmul.f32 %v444_v57, %v236_v9  ;;  %v494_v0 = vmul.f32 %v445_v1, %v237_v58  ;;  %v499_v6 = vmul.f32 %v446_v20, %v238_v28  ;;  %v504_v2 = vmul.f32 %v447_v51, %v239_v30 }
  0xdc   :  { %v450_v15 = vadd.f32 %v449_v47, %v448_v19  ;;  %v455_v37 = vadd.f32 %v595_v31, %v454_v46  ;;  %v460_v45 = vadd.f32 %v597_v53, %v459_v35  ;;  %v465_v38 = vadd.f32 %v599_v39, %v464_v5 }
  0xdd   :  { %v490_v61 = vadd.f32 %v609_v21, %v489_v63  ;;  %v495_v25 = vadd.f32 %v611_v41, %v494_v0  ;;  %v500_v11 = vadd.f32 %v613_v59, %v499_v6  ;;  %v505_v12 = vadd.f32 %v615_v10, %v504_v2 }
  0xde   :  { %451 = vst [vmem:[%s1386_s28] sm:$0xf] %v450_v15  ;;  %596 = vst [vmem:[%s1386_s28 + $0x4] sm:$0xf] %v455_v37 }
  0xdf   :  { %598 = vst [vmem:[%s1386_s28 + $0x8] sm:$0xf] %v460_v45  ;;  %600 = vst [vmem:[%s1386_s28 + $0xc] sm:$0xf] %v465_v38  ;;  %v669_v62 = vpop.eup %668 }
  0xe0   :  { %610 = vst [vmem:[%s1386_s28 + $0x20] sm:$0xf] %v490_v61  ;;  %612 = vst [vmem:[%s1386_s28 + $0x24] sm:$0xf] %v495_v25  ;;  %v332_v4 = vmul.f32 %v669_v62, %v655_v40  ;;  %v333_v52 = vmul.f32 %v669_v62, %v657_v24  ;;  %v334_v54 = vmul.f32 %v669_v62, %v659_v42 }
  0xe1   :  { %614 = vst [vmem:[%s1386_s28 + $0x28] sm:$0xf] %v500_v11  ;;  %616 = vst [vmem:[%s1386_s28 + $0x2c] sm:$0xf] %v505_v12  ;;  %v335_v13 = vmul.f32 %v669_v62, %v661_v55 }
  0xe2   :  { %v469_v36 = vmul.f32 %v332_v4, %v332_v4  ;;  %v474_v16 = vmul.f32 %v333_v52, %v333_v52  ;;  %v479_v43 = vmul.f32 %v334_v54, %v334_v54  ;;  %v509_v40 = vmul.f32 %v388_v22, %v332_v4 }
  0xe3   :  { %v484_v26 = vmul.f32 %v335_v13, %v335_v13  ;;  %v514_v24 = vmul.f32 %v389_v60, %v333_v52  ;;  %v519_v8 = vmul.f32 %v390_v32, %v334_v54  ;;  %v524_v49 = vmul.f32 %v391_v3, %v335_v13 }
  0xe4   :  { %v470_v42 = vadd.f32 %v601_v27, %v469_v36  ;;  %v475_v23 = vadd.f32 %v603_v17, %v474_v16  ;;  %v480_v55 = vadd.f32 %v605_v29, %v479_v43  ;;  %v510_v18 = vadd.f32 %v617_v14, %v509_v40 }
  0xe5   :  { %v485_v56 = vadd.f32 %v607_v44, %v484_v26  ;;  %v515_v50 = vadd.f32 %v619_v48, %v514_v24  ;;  %v520_v57 = vadd.f32 %v621_v7, %v519_v8  ;;  %v525_v1 = vadd.f32 %v623_v34, %v524_v49 }
  0xe6   :  { %602 = vst [vmem:[%s1386_s28 + $0x10] sm:$0xf] %v470_v42  ;;  %604 = vst [vmem:[%s1386_s28 + $0x14] sm:$0xf] %v475_v23 }
  0xe7   :  { %606 = vst [vmem:[%s1386_s28 + $0x18] sm:$0xf] %v480_v55  ;;  %608 = vst [vmem:[%s1386_s28 + $0x1c] sm:$0xf] %v485_v56 }
  0xe8   :  { %618 = vst [vmem:[%s1386_s28 + $0x30] sm:$0xf] %v510_v18  ;;  %620 = vst [vmem:[%s1386_s28 + $0x34] sm:$0xf] %v515_v50 }
  0xe9   :  { %622 = vst [vmem:[%s1386_s28 + $0x38] sm:$0xf] %v520_v57  ;;  %624 = vst [vmem:[%s1386_s28 + $0x3c] sm:$0xf] %v525_v1 }
  0xea   :  { %531 = vsyncpa [#allocation3], 1 }
  0xeb   :  { %532 = vsyncpa [#allocation5], 1 }

// kernel: vat2d_v2_forward.3
= control target key start
LH: loop header
LB: loop body
LE: loop exit
PB: predicated region body
PF: predicated region fallthrough
CT: control target
= control target key end

     0   :  { %10 = vsyncpa [#allocation3], 0  ;;  %s1433_s0 = inlined_call_operand.vmem [shape: f32[4,4,128], index: 0, kind: input, shape index: {}]   ;;  %s1434_s1 = inlined_call_operand.vmem [shape: f32[4,4,128], index: 1, kind: input, shape index: {}]   ;;  %s1435_s2 = inlined_call_operand.vmem [shape: f32[4,1], index: 2, kind: input, shape index: {}]   ;;  %s1436_s3 = inlined_call_operand.vmem [shape: f32[32], index: 3, kind: input, shape index: {}]   ;;  %s1437_s4 = inlined_call_operand.vmem [shape: f32[8], index: 4, kind: input, shape index: {}]   ;;  %s1438_s5 = inlined_call_operand.vmem [shape: f32[1,24,4,128], index: 5, kind: output, shape index: {}]  }
   0x1   :  { %s42_s20 = sshll.u32 %s1436_s3, 4  ;;  %s43_s20 = int_to_ptr.vmem [resolvable:$true] %s42_s20 }
   0x2   :  { %11 = vsyncpa [#allocation5], 0  ;;  %s52_s23 = sshll.u32 %s1437_s4, 4  ;;  %s734_s24 = scalar_lea.vmem %s43_s20, 16  ;;  %s53_s23 = int_to_ptr.vmem [resolvable:$true] %s52_s23 }
   0x3   :  { %p735_p0 = scmp.ne.s32.totalorder %s43_s20, %s734_s24  ;;  %p739_p1 = scmp.lt.s32.totalorder %s43_s20, %s43_s20 }
   0x4   :  { %p740_p2 = scmp.lt.s32.totalorder %s734_s24, %s734_s24 }
   0x6   :  { %p741_p3 = por %p740_p2, %p739_p1 }
   0x8   :  { %p742_p4 = pnand %p741_p3, %p735_p0 }
   0xa   :  { %745 = shalt.err (!%p742_p4)
}
   0xb   :  { %s762_s25 = smov [#allocation2]   ;;  %s746_s26 = scalar_lea.vmem %s53_s23, 16 }
   0xc   :  { %45 = dma.vmem_to_smem %s43_s20, 16, %s762_s25, [#allocation3]  }
   0xd   :  { %p747_p5 = scmp.ne.s32.totalorder %s53_s23, %s746_s26  ;;  %p751_p6 = scmp.lt.s32.totalorder %s53_s23, %s53_s23 }
   0xe   :  { %p752_p7 = scmp.lt.s32.totalorder %s746_s26, %s746_s26 }
  0x10   :  { %p753_p8 = por %p752_p7, %p751_p6 }
  0x12   :  { %p754_p9 = pnand %p753_p8, %p747_p5 }
  0x14   :  { %757 = shalt.err (!%p754_p9)
}
  0x15   :  { %s763_s3 = smov [#allocation4]  }
  0x16   :  { %55 = dma.vmem_to_smem %s53_s23, 16, %s763_s3, [#allocation5]  }
  0x17   :  { %758 = dma.done.wait [#allocation3], 16  }
  0x18   :  { %759 = vsyncadd [#allocation3], 4294967280 }
  0x19   :  { %760 = dma.done.wait [#allocation5], 16  }
  0x1a   :  { %761 = vsyncadd [#allocation5], 4294967280 }
  0x1b   :  { %62 = sfence }
  0x1c   :  { %v124_v0 = vld [vmem:[%s1435_s2] sm:$0xf]  ;;  %v764_v1 = vmov 0   ;;  %v765_v2 = vmov 0.0   ;;  %s877_s22 = sld [smem:[#allocation2]] }
  0x1d   :  { %693 = vset.pattern.permute.xlu0 %v764_v1  ;;  %100 = vst [vmem:[%s1438_s5] sm:$0xf] %v765_v2  ;;  %101 = vst [vmem:[%s1438_s5 + $0x4] sm:$0xf] %v765_v2  ;;  %s879_s23 = sld [smem:[#allocation2 + $0x1]]  ;;  %v907_v6 = vld [vmem:[%s1433_s0] sm:$0xf] }
  0x1e   :  { %102 = vst [vmem:[%s1438_s5 + $0x8] sm:$0xf] %v765_v2  ;;  %103 = vst [vmem:[%s1438_s5 + $0xc] sm:$0xf] %v765_v2  ;;  %135 = vperm.xlu0 %693, %v124_v0   ;;  %s881_s24 = sld [smem:[#allocation2 + $0x2]] }
  0x1f   :  { %104 = vst [vmem:[%s1438_s5 + $0x10] sm:$0xf] %v765_v2  ;;  %105 = vst [vmem:[%s1438_s5 + $0x14] sm:$0xf] %v765_v2  ;;  %s883_s25 = sld [smem:[#allocation2 + $0x3]] }
  0x20   :  { %106 = vst [vmem:[%s1438_s5 + $0x18] sm:$0xf] %v765_v2  ;;  %107 = vst [vmem:[%s1438_s5 + $0x1c] sm:$0xf] %v765_v2  ;;  %s885_s26 = sld [smem:[#allocation4]] }
  0x21   :  { %108 = vst [vmem:[%s1438_s5 + $0x20] sm:$0xf] %v765_v2  ;;  %109 = vst [vmem:[%s1438_s5 + $0x24] sm:$0xf] %v765_v2  ;;  %s887_s3 = sld [smem:[#allocation2 + $0x4]] }
  0x22   :  { %110 = vst [vmem:[%s1438_s5 + $0x28] sm:$0xf] %v765_v2  ;;  %111 = vst [vmem:[%s1438_s5 + $0x2c] sm:$0xf] %v765_v2  ;;  %s889_s4 = sld [smem:[#allocation2 + $0x5]]  ;;  %v153_v3 = vstv %s877_s22 }
  0x23   :  { %112 = vst [vmem:[%s1438_s5 + $0x30] sm:$0xf] %v765_v2  ;;  %113 = vst [vmem:[%s1438_s5 + $0x34] sm:$0xf] %v765_v2  ;;  %s891_s27 = sld [smem:[#allocation2 + $0x6]]  ;;  %v156_v4 = vstv %s879_s23  ;;  %v344_v9 = vmul.f32 %v153_v3, %v907_v6 }
  0x24   :  { %114 = vst [vmem:[%s1438_s5 + $0x38] sm:$0xf] %v765_v2  ;;  %115 = vst [vmem:[%s1438_s5 + $0x3c] sm:$0xf] %v765_v2  ;;  %s893_s28 = sld [smem:[#allocation2 + $0x7]]  ;;  %v160_v13 = vstv %s881_s24 }
  0x25   :  { %116 = vst [vmem:[%s1438_s5 + $0x40] sm:$0xf] %v765_v2  ;;  %117 = vst [vmem:[%s1438_s5 + $0x44] sm:$0xf] %v765_v2  ;;  %s895_s29 = sld [smem:[#allocation4 + $0x1]]  ;;  %v164_v16 = vstv %s883_s25 }
  0x26   :  { %118 = vst [vmem:[%s1438_s5 + $0x48] sm:$0xf] %v765_v2  ;;  %119 = vst [vmem:[%s1438_s5 + $0x4c] sm:$0xf] %v765_v2  ;;  %1465 = sst [smem:[#allocation8_spill]] %s885_s26  ;;  %v168_v21 = vstv %s885_s26 }
  0x27   :  { %120 = vst [vmem:[%s1438_s5 + $0x50] sm:$0xf] %v765_v2  ;;  %121 = vst [vmem:[%s1438_s5 + $0x54] sm:$0xf] %v765_v2  ;;  %s899_s30 = sld [smem:[#allocation2 + $0x8]]  ;;  %v171_v5 = vstv %s887_s3 }
  0x28   :  { %122 = vst [vmem:[%s1438_s5 + $0x58] sm:$0xf] %v765_v2  ;;  %123 = vst [vmem:[%s1438_s5 + $0x5c] sm:$0xf] %v765_v2  ;;  %s902_s6 = sld [smem:[#allocation2 + $0x9]]  ;;  %v174_v8 = vstv %s889_s4  ;;  %v352_v11 = vmul.f32 %v171_v5, %v907_v6 }
  0x29   :  { %v912_v7 = vld [vmem:[%s1433_s0 + $0x4] sm:$0xf]  ;;  %s915_s2 = sld [smem:[#allocation2 + $0xa]]  ;;  %v931_v12 = vld [vmem:[%s1433_s0 + $0x8] sm:$0xf]  ;;  %v178_v14 = vstv %s891_s27 }
  0x2a   :  { %s917_s11 = sld [smem:[#allocation2 + $0xb]]  ;;  %v345_v10 = vmul.f32 %v912_v7, %v156_v4  ;;  %v353_v15 = vmul.f32 %v912_v7, %v174_v8  ;;  %v347_v18 = vmul.f32 %v931_v12, %v160_v13  ;;  %v355_v19 = vmul.f32 %v931_v12, %v178_v14  ;;  %v952_v20 = vld [vmem:[%s1433_s0 + $0xc] sm:$0xf] }
  0x2b   :  { %1466 = sst [smem:[#allocation9_spill]] %s895_s29  ;;  %v182_v22 = vstv %s893_s28  ;;  %v349_v27 = vmul.f32 %v952_v20, %v164_v16  ;;  %v186_v33 = vstv %s895_s29 }
  0x2c   :  { %s935_s14 = sld [smem:[#allocation4 + $0x2]]  ;;  %v346_v17 = vadd.f32 %v345_v10, %v344_v9  ;;  %v354_v24 = vadd.f32 %v353_v15, %v352_v11  ;;  %v357_v28 = vmul.f32 %v952_v20, %v182_v22 }
  0x2d   :  { %s941_s15 = sld [smem:[#allocation2 + $0xc]]  ;;  %v189_v23 = vstv %s899_s30 }
  0x2e   :  { %s957_s18 = sld [smem:[#allocation2 + $0xd]]  ;;  %v192_v25 = vstv %s902_s6  ;;  %v348_v26 = vadd.f32 %v347_v18, %v346_v17  ;;  %v356_v30 = vadd.f32 %v355_v19, %v354_v24  ;;  %v360_v31 = vmul.f32 %v189_v23, %v907_v6 }
  0x2f   :  { %s960_s19 = sld [smem:[#allocation2 + $0xe]]  ;;  %v196_v29 = vstv %s915_s2  ;;  %v361_v32 = vmul.f32 %v912_v7, %v192_v25 }
  0x30   :  { %s969_s0 = sld [smem:[#allocation2 + $0xf]]  ;;  %v200_v34 = vstv %s917_s11  ;;  %v350_v35 = vadd.f32 %v349_v27, %v348_v26  ;;  %v363_v36 = vmul.f32 %v931_v12, %v196_v29  ;;  %v358_v37 = vadd.f32 %v357_v28, %v356_v30 }
  0x31   :  { %s979_s20 = sld [smem:[#allocation4 + $0x3]]  ;;  %v362_v38 = vadd.f32 %v361_v32, %v360_v31  ;;  %v365_v39 = vmul.f32 %v952_v20, %v200_v34 }
  0x32   :  { %1467 = sst [smem:[#allocation10_spill]] %s935_s14  ;;  %v994_v41 = vadd.f32 %v350_v35, %v168_v21  ;;  %v359_v43 = vadd.f32 %v358_v37, %v186_v33  ;;  %v204_v51 = vstv %s935_s14 }
  0x33   :  { %s984_s21 = sld [smem:[#allocation2 + $0x10]]  ;;  %v207_v40 = vstv %s941_s15  ;;  %v364_v44 = vadd.f32 %v363_v36, %v362_v38 }
  0x34   :  { %s990_s7 = sld [smem:[#allocation2 + $0x11]]  ;;  %v210_v42 = vstv %s957_s18  ;;  %v368_v45 = vmul.f32 %v207_v40, %v907_v6  ;;  %v376_v54 = vmax.f32 %v994_v41, %v359_v43 }
  0x35   :  { %s997_s8 = sld [smem:[#allocation2 + $0x12]]  ;;  %v214_v46 = vstv %s960_s19  ;;  %v369_v47 = vmul.f32 %v912_v7, %v210_v42  ;;  %v366_v49 = vadd.f32 %v365_v39, %v364_v44 }
  0x36   :  { %1468 = sst [smem:[#allocation11_spill]] %s969_s0  ;;  %v218_v48 = vstv %s969_s0  ;;  %v371_v50 = vmul.f32 %v931_v12, %v214_v46 }
  0x37   :  { %1469 = sst [smem:[#allocation12_spill]] %s979_s20  ;;  %v370_v52 = vadd.f32 %v369_v47, %v368_v45  ;;  %v373_v53 = vmul.f32 %v952_v20, %v218_v48  ;;  %v367_v56 = vadd.f32 %v366_v49, %v204_v51  ;;  %v222_v2 = vstv %s979_s20 }
  0x38   :  { %s1005_s9 = sld [smem:[#allocation2 + $0x13]] }
  0x39   :  { %s1011_s10 = sld [smem:[#allocation4 + $0x4]]  ;;  %v249_v55 = vstv %s984_s21  ;;  %v372_v58 = vadd.f32 %v371_v50, %v370_v52  ;;  %v377_v0 = vmax.f32 %v376_v54, %v367_v56 }
  0x3a   :  { %s1017_s12 = sld [smem:[#allocation2 + $0x14]]  ;;  %v252_v57 = vstv %s990_s7  ;;  %v400_v59 = vmul.f32 %v249_v55, %v907_v6 }
  0x3b   :  { %1470 = sst [smem:[#allocation13_spill]] %s997_s8  ;;  %v256_v60 = vstv %s997_s8  ;;  %v401_v61 = vmul.f32 %v912_v7, %v252_v57  ;;  %v374_v63 = vadd.f32 %v373_v53, %v372_v58 }
  0x3c   :  { %s1024_s13 = sld [smem:[#allocation2 + $0x15]]  ;;  %v403_v1 = vmul.f32 %v931_v12, %v256_v60 }
  0x3d   :  { %s1029_s16 = sld [smem:[#allocation2 + $0x16]]  ;;  %v402_v9 = vadd.f32 %v401_v61, %v400_v59  ;;  %v375_v15 = vadd.f32 %v374_v63, %v222_v2 }
  0x3e   :  { %1471 = sst [smem:[#allocation14_spill]] %s1005_s9  ;;  %v260_v62 = vstv %s1005_s9 }
  0x3f   :  { %1472 = sst [smem:[#allocation15_spill]] %s1011_s10  ;;  %v405_v10 = vmul.f32 %v952_v20, %v260_v62  ;;  %v404_v18 = vadd.f32 %v403_v1, %v402_v9  ;;  %v378_v26 = vmax.f32 %v377_v0, %v375_v15  ;;  %v1454_v28 = vstv %s1011_s10 }
  0x40   :  { %1473 = sst [smem:[#allocation16_spill]] %s1017_s12  ;;  %v267_v11 = vstv %s1017_s12 }
  0x41   :  { %s1035_s17 = sld [smem:[#allocation2 + $0x17]]  ;;  %v408_v19 = vmul.f32 %v267_v11, %v907_v6  ;;  %v406_v30 = vadd.f32 %v405_v10, %v404_v18  ;;  %v379_v35 = vsub.f32 %v994_v41, %v378_v26  ;;  %v382_v36 = vsub.f32 %v359_v43, %v378_v26 }
  0x42   :  { %1474 = sst [smem:[#allocation17_spill]] %s1024_s13  ;;  %v270_v17 = vstv %s1024_s13  ;;  %v385_v37 = vsub.f32 %v367_v56, %v378_v26  ;;  %v388_v44 = vsub.f32 %v375_v15, %v378_v26 }
  0x43   :  { %1475 = sst [smem:[#allocation18_spill]] %s1029_s16  ;;  %v274_v24 = vstv %s1029_s16  ;;  %v409_v27 = vmul.f32 %v912_v7, %v270_v17  ;;  %v380_v47 = vmul.f32 1.442695, %v379_v35  ;;  %v383_v49 = vmul.f32 1.442695, %v382_v36 }
  0x44   :  { %s1041_s14 = sld [smem:[#allocation4 + $0x5]]  ;;  %v411_v31 = vmul.f32 %v931_v12, %v274_v24  ;;  %v407_v41 = vadd.f32 %v406_v30, %v1454_v28  ;;  %v386_v52 = vmul.f32 1.442695, %v385_v37  ;;  %v389_v53 = vmul.f32 1.442695, %v388_v44 }
  0x45   :  { %s1047_s29 = sld [smem:[#allocation2 + $0x18]]  ;;  %v410_v45 = vadd.f32 %v409_v27, %v408_v19  ;;  %694 = vpow2.f32 %v380_v47 }
  0x46   :  { %s1053_s26 = sld [smem:[#allocation2 + $0x19]]  ;;  %696 = vpow2.f32 %v383_v49 }
  0x47   :  { %1476 = sst [smem:[#allocation19_spill]] %s1035_s17  ;;  %v278_v32 = vstv %s1035_s17  ;;  %v412_v54 = vadd.f32 %v411_v31, %v410_v45  ;;  %698 = vpow2.f32 %v386_v52 }
  0x48   :  { %s1058_s8 = sld [smem:[#allocation2 + $0x1a]]  ;;  %v413_v43 = vmul.f32 %v952_v20, %v278_v32  ;;  %700 = vpow2.f32 %v389_v53 }
  0x49   :  { %s1064_s9 = sld [smem:[#allocation2 + $0x1b]] }
  0x4a   :  { %1477 = sst [smem:[#allocation20_spill]] %s1041_s14  ;;  %v1452_v38 = vstv %s1041_s14  ;;  %v414_v63 = vadd.f32 %v413_v43, %v412_v54 }
  0x4b   :  { %s1070_s0 = sld [smem:[#allocation4 + $0x6]]  ;;  %v285_v39 = vstv %s1047_s29 }
  0x4c   :  { %s1076_s20 = sld [smem:[#allocation2 + $0x1c]]  ;;  %v288_v50 = vstv %s1053_s26  ;;  %v416_v58 = vmul.f32 %v285_v39, %v907_v6  ;;  %v415_v18 = vadd.f32 %v414_v63, %v1452_v38 }
  0x4d   :  { %s1081_s13 = sld [smem:[#allocation2 + $0x1d]]  ;;  %v417_v59 = vmul.f32 %v912_v7, %v288_v50 }
  0x4e   :  { %1478 = sst [smem:[#allocation21_spill]] %s1058_s8  ;;  %v292_v56 = vstv %s1058_s8  ;;  %v432_v45 = vmax.f32 %v407_v41, %v415_v18 }
  0x4f   :  { %1479 = sst [smem:[#allocation22_spill]] %s1064_s9  ;;  %v1453_v61 = vstv %s1064_s9  ;;  %v419_v0 = vmul.f32 %v931_v12, %v292_v56  ;;  %v418_v9 = vadd.f32 %v417_v59, %v416_v58 }
  0x50   :  { %s1083_s16 = sld [smem:[#allocation2 + $0x1e]]  ;;  %v421_v10 = vmul.f32 %v952_v20, %v1453_v61 }
  0x51   :  { %1480 = sst [smem:[#allocation23_spill]] %s1070_s0  ;;  %v420_v27 = vadd.f32 %v419_v0, %v418_v9  ;;  %v300_v47 = vstv %s1070_s0 }
  0x52   :  { %1481 = sst [smem:[#allocation24_spill]] %s1076_s20  ;;  %v303_v1 = vstv %s1076_s20  ;;  %v695_v59 = vpop.eup %694 }
  0x53   :  { %1482 = sst [smem:[#allocation25_spill]] %s1081_s13  ;;  %v306_v15 = vstv %s1081_s13  ;;  %v424_v19 = vmul.f32 %v303_v1, %v907_v6  ;;  %v422_v36 = vadd.f32 %v421_v10, %v420_v27  ;;  %v697_v63 = vpop.eup %696 }
  0x54   :  { %s1091_s12 = sld [smem:[#allocation2 + $0x1f]]  ;;  %v425_v30 = vmul.f32 %v912_v7, %v306_v15  ;;  %v699_v9 = vpop.eup %698 }
  0x55   :  { %s1109_s10 = sld [smem:[#allocation4 + $0x7]]  ;;  %v423_v49 = vadd.f32 %v422_v36, %v300_v47  ;;  %v701_v10 = vpop.eup %700 }
  0x56   :  { %1483 = sst [smem:[#allocation26_spill]] %s1083_s16  ;;  %v1450_v26 = vstv %s1083_s16  ;;  %v426_v37 = vadd.f32 %v425_v30, %v424_v19 }
  0x57   :  { %v427_v35 = vmul.f32 %v931_v12, %v1450_v26  ;;  %v433_v53 = vmax.f32 %v432_v45, %v423_v49  ;;  %v391_v26 = vadd.f32 %v697_v63, %v695_v59  ;;  %s1500_s18 = sld [smem:[#allocation15_spill]] }
  0x58   :  { %s1501_s19 = sld [smem:[#allocation22_spill]] }
  0x59   :  { %v428_v43 = vadd.f32 %v427_v35, %v426_v37  ;;  %v392_v38 = vadd.f32 %v699_v9, %v391_v26  ;;  %s1502_s21 = sld [smem:[#allocation20_spill]] }
  0x5a   :  { %1484 = sst [smem:[#allocation27_spill]] %s1091_s12  ;;  %v1451_v31 = vstv %s1091_s12 }
  0x5b   :  { %1485 = sst [smem:[#allocation28_spill]] %s1109_s10  ;;  %v429_v44 = vmul.f32 %v952_v20, %v1451_v31  ;;  %v318_v54 = vstv %s1109_s10  ;;  %v393_v36 = vadd.f32 %v701_v10, %v392_v38  ;;  %v673_v38 = vld [vmem:[%s1438_s5 + $0x40] sm:$0xf] }
  0x5c   :  { %s1503_s7 = sld [smem:[#allocation26_spill]] }
  0x5d   :  { %v430_v52 = vadd.f32 %v429_v44, %v428_v43  ;;  %s1504_s26 = sld [smem:[#allocation27_spill]] }
  0x5f   :  { %v431_v58 = vadd.f32 %v430_v52, %v318_v54 }
  0x61   :  { %v434_v0 = vmax.f32 %v433_v53, %v431_v58  ;;  %v679_v53 = vld [vmem:[%s1438_s5 + $0x4c] sm:$0xf] }
  0x63   :  { %v435_v19 = vsub.f32 %v407_v41, %v434_v0  ;;  %v438_v27 = vsub.f32 %v415_v18, %v434_v0  ;;  %v441_v30 = vsub.f32 %v423_v49, %v434_v0  ;;  %v444_v31 = vsub.f32 %v431_v58, %v434_v0  ;;  %v677_v49 = vld [vmem:[%s1438_s5 + $0x48] sm:$0xf] }
  0x65   :  { %v436_v61 = vmul.f32 1.442695, %v435_v19  ;;  %v439_v28 = vmul.f32 1.442695, %v438_v27  ;;  %v442_v35 = vmul.f32 1.442695, %v441_v30 }
  0x66   :  { %v445_v37 = vmul.f32 1.442695, %v444_v31 }
  0x67   :  { %702 = vpow2.f32 %v436_v61 }
  0x68   :  { %704 = vrcp.f32 %v393_v36 }
  0x69   :  { %706 = vpow2.f32 %v439_v28  ;;  %v675_v28 = vld [vmem:[%s1438_s5 + $0x44] sm:$0xf] }
  0x6a   :  { %708 = vpow2.f32 %v442_v35 }
  0x6b   :  { %710 = vpow2.f32 %v445_v37 }
  0x74   :  { %v703_v44 = vpop.eup %702 }
  0x75   :  { %v705_v45 = vpop.eup %704 }
  0x76   :  { %v707_v43 = vpop.eup %706  ;;  %v1133_v52 = vmul.f32 %v705_v45, %v695_v59  ;;  %v1135_v41 = vmul.f32 %v705_v45, %v697_v63  ;;  %v1137_v18 = vmul.f32 %v705_v45, %v699_v9  ;;  %v1139_v26 = vmul.f32 %v705_v45, %v701_v10 }
  0x77   :  { %v709_v61 = vpop.eup %708  ;;  %v447_v31 = vadd.f32 %v707_v43, %v703_v44 }
  0x78   :  { %v711_v58 = vpop.eup %710  ;;  %v537_v59 = vmul.f32 %v1133_v52, %v1133_v52  ;;  %v542_v63 = vmul.f32 %v1135_v41, %v1135_v41  ;;  %v547_v0 = vmul.f32 %v1137_v18, %v1137_v18  ;;  %v552_v9 = vmul.f32 %v1139_v26, %v1139_v26 }
  0x79   :  { %v448_v10 = vadd.f32 %v709_v61, %v447_v31 }
  0x7a   :  { %v538_v19 = vadd.f32 %v673_v38, %v537_v59  ;;  %v543_v27 = vadd.f32 %v675_v28, %v542_v63  ;;  %v548_v30 = vadd.f32 %v677_v49, %v547_v0  ;;  %v553_v36 = vadd.f32 %v679_v53, %v552_v9  ;;  %v681_v49 = vld [vmem:[%s1438_s5 + $0x50] sm:$0xf]  ;;  %v683_v53 = vld [vmem:[%s1438_s5 + $0x54] sm:$0xf]  ;;  %v685_v59 = vld [vmem:[%s1438_s5 + $0x58] sm:$0xf] }
  0x7b   :  { %v449_v35 = vadd.f32 %v711_v58, %v448_v10 }
  0x7c   :  { %674 = vst [vmem:[%s1438_s5 + $0x40] sm:$0xf] %v538_v19  ;;  %676 = vst [vmem:[%s1438_s5 + $0x44] sm:$0xf] %v543_v27  ;;  %v132_v27 = vld [vmem:[%s1434_s1] sm:$0xf] }
  0x7d   :  { %678 = vst [vmem:[%s1438_s5 + $0x48] sm:$0xf] %v548_v30  ;;  %680 = vst [vmem:[%s1438_s5 + $0x4c] sm:$0xf] %v553_v36  ;;  %712 = vrcp.f32 %v449_v35  ;;  %v602_v30 = vld [vmem:[%s1434_s1 + $0x4] sm:$0xf] }
  0x7e   :  { %v603_v36 = vld [vmem:[%s1434_s1 + $0x8] sm:$0xf]  ;;  %v604_v35 = vld [vmem:[%s1434_s1 + $0xc] sm:$0xf] }
  0x8a   :  { %v713_v37 = vpop.eup %712 }
  0x8b   :  { %v1173_v45 = vmul.f32 %v713_v37, %v703_v44  ;;  %v1175_v38 = vmul.f32 %v713_v37, %v707_v43  ;;  %v1177_v31 = vmul.f32 %v713_v37, %v709_v61  ;;  %v1179_v28 = vmul.f32 %v713_v37, %v711_v58  ;;  %v687_v44 = vld [vmem:[%s1438_s5 + $0x5c] sm:$0xf] }
  0x8d   :  { %v557_v43 = vmul.f32 %v1173_v45, %v1173_v45  ;;  %v562_v61 = vmul.f32 %v1175_v38, %v1175_v38  ;;  %v567_v58 = vmul.f32 %v1177_v31, %v1177_v31  ;;  %v572_v63 = vmul.f32 %v1179_v28, %v1179_v28 }
  0x8f   :  { %v558_v0 = vadd.f32 %v681_v49, %v557_v43  ;;  %v563_v9 = vadd.f32 %v683_v53, %v562_v61  ;;  %v568_v10 = vadd.f32 %v685_v59, %v567_v58  ;;  %v573_v19 = vadd.f32 %v687_v44, %v572_v63 }
  0x91   :  { %682 = vst [vmem:[%s1438_s5 + $0x50] sm:$0xf] %v558_v0  ;;  %684 = vst [vmem:[%s1438_s5 + $0x54] sm:$0xf] %v563_v9 }
  0x92   :  { %686 = vst [vmem:[%s1438_s5 + $0x58] sm:$0xf] %v568_v10  ;;  %688 = vst [vmem:[%s1438_s5 + $0x5c] sm:$0xf] %v573_v19 }
  0x99   :  { %v136_v37 = vpop.permute.xlu0 %135 }
  0x9a   :  { %v138_v49 = vmul.f32 %v136_v37, %v132_v27  ;;  %v142_v53 = vmul.f32 %v602_v30, %v136_v37  ;;  %v146_v59 = vmul.f32 %v603_v36, %v136_v37  ;;  %v150_v44 = vmul.f32 %v604_v35, %v136_v37 }
  0x9c   :  { %v139_v43 = vadd.f32 %v138_v49, %v907_v6  ;;  %v143_v61 = vadd.f32 %v912_v7, %v142_v53  ;;  %v1228_v58 = vadd.f32 %v931_v12, %v146_v59  ;;  %v1231_v63 = vadd.f32 %v952_v20, %v150_v44 }
  0x9e   :  { %v154_v0 = vmul.f32 %v153_v3, %v139_v43  ;;  %v157_v9 = vmul.f32 %v156_v4, %v143_v61  ;;  %v161_v10 = vmul.f32 %v160_v13, %v1228_v58  ;;  %v165_v6 = vmul.f32 %v164_v16, %v1231_v63 }
  0x9f   :  { %v172_v7 = vmul.f32 %v171_v5, %v139_v43  ;;  %v175_v12 = vmul.f32 %v174_v8, %v143_v61  ;;  %v179_v20 = vmul.f32 %v178_v14, %v1228_v58  ;;  %v183_v4 = vmul.f32 %v182_v22, %v1231_v63 }
  0xa0   :  { %v158_v3 = vadd.f32 %v157_v9, %v154_v0  ;;  %v190_v19 = vmul.f32 %v189_v23, %v139_v43  ;;  %v193_v13 = vmul.f32 %v192_v25, %v143_v61  ;;  %v197_v5 = vmul.f32 %v196_v29, %v1228_v58 }
  0xa1   :  { %v176_v16 = vadd.f32 %v175_v12, %v172_v7  ;;  %v208_v8 = vmul.f32 %v207_v40, %v139_v43  ;;  %v211_v27 = vmul.f32 %v210_v42, %v143_v61  ;;  %v201_v22 = vmul.f32 %v200_v34, %v1231_v63 }
  0xa2   :  { %v162_v14 = vadd.f32 %v161_v10, %v158_v3  ;;  %v194_v30 = vadd.f32 %v193_v13, %v190_v19  ;;  %v215_v23 = vmul.f32 %v214_v46, %v1228_v58  ;;  %v250_v29 = vmul.f32 %v249_v55, %v139_v43 }
  0xa3   :  { %v180_v25 = vadd.f32 %v179_v20, %v176_v16  ;;  %v212_v36 = vadd.f32 %v211_v27, %v208_v8  ;;  %v253_v40 = vmul.f32 %v252_v57, %v143_v61  ;;  %v219_v37 = vmul.f32 %v218_v48, %v1231_v63 }
  0xa4   :  { %v166_v42 = vadd.f32 %v165_v6, %v162_v14  ;;  %v198_v35 = vadd.f32 %v197_v5, %v194_v30  ;;  %v257_v34 = vmul.f32 %v256_v60, %v1228_v58  ;;  %v268_v55 = vmul.f32 %v267_v11, %v139_v43 }
  0xa5   :  { %v184_v46 = vadd.f32 %v183_v4, %v180_v25  ;;  %v216_v49 = vadd.f32 %v215_v23, %v212_v36  ;;  %v254_v53 = vadd.f32 %v253_v40, %v250_v29  ;;  %v271_v44 = vmul.f32 %v270_v17, %v143_v61 }
  0xa6   :  { %v169_v57 = vadd.f32 %v168_v21, %v166_v42  ;;  %v202_v59 = vadd.f32 %v201_v22, %v198_v35  ;;  %v261_v60 = vmul.f32 %v260_v62, %v1231_v63  ;;  %v275_v11 = vmul.f32 %v274_v24, %v1228_v58 }
  0xa7   :  { %v187_v48 = vadd.f32 %v186_v33, %v184_v46  ;;  %v220_v0 = vadd.f32 %v219_v37, %v216_v49  ;;  %v258_v9 = vadd.f32 %v257_v34, %v254_v53  ;;  %v272_v10 = vadd.f32 %v271_v44, %v268_v55 }
  0xa8   :  { %v286_v21 = vmul.f32 %v285_v39, %v139_v43  ;;  %v289_v17 = vmul.f32 %v288_v50, %v143_v61  ;;  %v205_v6 = vadd.f32 %v204_v51, %v202_v59  ;;  %v279_v12 = vmul.f32 %v278_v32, %v1231_v63 }
  0xa9   :  { %v224_v33 = vmax.f32 %v169_v57, %v187_v48  ;;  %v262_v7 = vadd.f32 %v261_v60, %v258_v9  ;;  %v276_v62 = vadd.f32 %v275_v11, %v272_v10  ;;  %v293_v3 = vmul.f32 %v292_v56, %v1228_v58 }
  0xaa   :  { %v290_v20 = vadd.f32 %v289_v17, %v286_v21  ;;  %v304_v24 = vmul.f32 %v303_v1, %v139_v43  ;;  %v223_v39 = vadd.f32 %v222_v2, %v220_v0  ;;  %v307_v51 = vmul.f32 %v306_v15, %v143_v61 }
  0xab   :  { %v225_v50 = vmax.f32 %v224_v33, %v205_v6  ;;  %v1506_v4 = vstv %s1500_s18  ;;  %v280_v13 = vadd.f32 %v279_v12, %v276_v62  ;;  %v1507_v32 = vstv %s1501_s19 }
  0xac   :  { %v265_v19 = vadd.f32 %v1506_v4, %v262_v7  ;;  %v294_v16 = vadd.f32 %v293_v3, %v290_v20  ;;  %v297_v5 = vmul.f32 %v1507_v32, %v1231_v63  ;;  %v308_v27 = vadd.f32 %v307_v51, %v304_v24  ;;  %v647_v32 = vld [vmem:[%s1438_s5 + $0xc] sm:$0xf] }
  0xad   :  { %v226_v8 = vmax.f32 %v225_v50, %v223_v39  ;;  %v1508_v14 = vstv %s1502_s21  ;;  %v1509_v1 = vstv %s1503_s7  ;;  %v1511_v15 = vstv %s1504_s26 }
  0xae   :  { %v283_v56 = vadd.f32 %v1508_v14, %v280_v13  ;;  %v298_v30 = vadd.f32 %v297_v5, %v294_v16  ;;  %v311_v43 = vmul.f32 %v1509_v1, %v1228_v58  ;;  %v315_v61 = vmul.f32 %v1511_v15, %v1231_v63  ;;  %v643_v13 = vld [vmem:[%s1438_s5 + $0x4] sm:$0xf]  ;;  %v645_v16 = vld [vmem:[%s1438_s5 + $0x8] sm:$0xf]  ;;  %v657_v5 = vld [vmem:[%s1438_s5 + $0x20] sm:$0xf] }
  0xaf   :  { %v227_v2 = vsub.f32 %v169_v57, %v226_v8  ;;  %v230_v22 = vsub.f32 %v187_v48, %v226_v8  ;;  %v233_v23 = vsub.f32 %v205_v6, %v226_v8  ;;  %v236_v25 = vsub.f32 %v223_v39, %v226_v8  ;;  %v661_v1 = vld [vmem:[%s1438_s5 + $0x28] sm:$0xf] }
  0xb0   :  { %v301_v36 = vadd.f32 %v300_v47, %v298_v30  ;;  %v312_v29 = vadd.f32 %v311_v43, %v308_v27  ;;  %v320_v40 = vmax.f32 %v265_v19, %v283_v56  ;;  %v659_v30 = vld [vmem:[%s1438_s5 + $0x24] sm:$0xf]  ;;  %v663_v43 = vld [vmem:[%s1438_s5 + $0x2c] sm:$0xf] }
  0xb1   :  { %v228_v42 = vmul.f32 1.442695, %v227_v2  ;;  %v231_v35 = vmul.f32 1.442695, %v230_v22  ;;  %v234_v37 = vmul.f32 1.442695, %v233_v23 }
  0xb2   :  { %v316_v34 = vadd.f32 %v315_v61, %v312_v29  ;;  %v321_v46 = vmax.f32 %v320_v40, %v301_v36  ;;  %v237_v58 = vmul.f32 1.442695, %v236_v25 }
  0xb3   :  { %714 = vpow2.f32 %v228_v42 }
  0xb4   :  { %716 = vpow2.f32 %v231_v35  ;;  %v319_v49 = vadd.f32 %v318_v54, %v316_v34 }
  0xb5   :  { %718 = vpow2.f32 %v234_v37 }
  0xb6   :  { %v322_v53 = vmax.f32 %v321_v46, %v319_v49  ;;  %720 = vpow2.f32 %v237_v58  ;;  %v649_v46 = vld [vmem:[%s1438_s5 + $0x10] sm:$0xf]  ;;  %v651_v58 = vld [vmem:[%s1438_s5 + $0x14] sm:$0xf] }
  0xb8   :  { %v323_v55 = vsub.f32 %v265_v19, %v322_v53  ;;  %v326_v63 = vsub.f32 %v283_v56, %v322_v53  ;;  %v329_v57 = vsub.f32 %v301_v36, %v322_v53  ;;  %v332_v59 = vsub.f32 %v319_v49, %v322_v53  ;;  %v456_v19 = vld [vmem:[%s1438_s5] sm:$0xf]  ;;  %v653_v49 = vld [vmem:[%s1438_s5 + $0x18] sm:$0xf]  ;;  %v655_v53 = vld [vmem:[%s1438_s5 + $0x1c] sm:$0xf] }
  0xba   :  { %v324_v47 = vmul.f32 1.442695, %v323_v55  ;;  %v327_v44 = vmul.f32 1.442695, %v326_v63  ;;  %v330_v48 = vmul.f32 1.442695, %v329_v57 }
  0xbb   :  { %v333_v0 = vmul.f32 1.442695, %v332_v59  ;;  %v665_v55 = vld [vmem:[%s1438_s5 + $0x30] sm:$0xf] }
  0xbc   :  { %722 = vpow2.f32 %v324_v47 }
  0xbd   :  { %724 = vpow2.f32 %v327_v44  ;;  %v667_v44 = vld [vmem:[%s1438_s5 + $0x34] sm:$0xf] }
  0xbe   :  { %726 = vpow2.f32 %v330_v48  ;;  %v669_v48 = vld [vmem:[%s1438_s5 + $0x38] sm:$0xf] }
  0xbf   :  { %728 = vpow2.f32 %v333_v0  ;;  %v671_v0 = vld [vmem:[%s1438_s5 + $0x3c] sm:$0xf] }
  0xc0   :  { %v715_v9 = vpop.eup %714 }
  0xc1   :  { %v717_v60 = vpop.eup %716 }
  0xc2   :  { %v239_v10 = vadd.f32 %v717_v60, %v715_v9  ;;  %v719_v11 = vpop.eup %718 }
  0xc3   :  { %v721_v21 = vpop.eup %720 }
  0xc4   :  { %v240_v54 = vadd.f32 %v719_v11, %v239_v10 }
  0xc6   :  { %v241_v17 = vadd.f32 %v721_v21, %v240_v54 }
  0xc8   :  { %730 = vrcp.f32 %v241_v17 }
  0xc9   :  { %v723_v6 = vpop.eup %722 }
  0xca   :  { %v725_v33 = vpop.eup %724 }
  0xcb   :  { %v335_v7 = vadd.f32 %v725_v33, %v723_v6  ;;  %v727_v12 = vpop.eup %726 }
  0xcc   :  { %v729_v20 = vpop.eup %728 }
  0xcd   :  { %v336_v62 = vadd.f32 %v727_v12, %v335_v7 }
  0xcf   :  { %v337_v3 = vadd.f32 %v729_v20, %v336_v62 }
  0xd1   :  { %732 = vrcp.f32 %v337_v3 }
  0xd5   :  { %v731_v24 = vpop.eup %730 }
  0xd6   :  { %v244_v39 = vmul.f32 %v731_v24, %v715_v9  ;;  %v245_v50 = vmul.f32 %v731_v24, %v717_v60  ;;  %v246_v51 = vmul.f32 %v731_v24, %v719_v11  ;;  %v247_v4 = vmul.f32 %v731_v24, %v721_v21 }
  0xd8   :  { %v457_v8 = vmul.f32 %v244_v39, %v244_v39  ;;  %v462_v27 = vmul.f32 %v245_v50, %v245_v50  ;;  %v467_v14 = vmul.f32 %v246_v51, %v246_v51  ;;  %v472_v56 = vmul.f32 %v247_v4, %v247_v4 }
  0xd9   :  { %v497_v2 = vmul.f32 %v1173_v45, %v244_v39  ;;  %v502_v22 = vmul.f32 %v1175_v38, %v245_v50  ;;  %v507_v23 = vmul.f32 %v1177_v31, %v246_v51  ;;  %v512_v15 = vmul.f32 %v1179_v28, %v247_v4 }
  0xda   :  { %v458_v61 = vadd.f32 %v457_v8, %v456_v19  ;;  %v463_v25 = vadd.f32 %v643_v13, %v462_v27  ;;  %v468_v36 = vadd.f32 %v645_v16, %v467_v14  ;;  %v473_v29 = vadd.f32 %v647_v32, %v472_v56 }
  0xdb   :  { %v498_v40 = vadd.f32 %v657_v5, %v497_v2  ;;  %v503_v42 = vadd.f32 %v659_v30, %v502_v22  ;;  %v508_v35 = vadd.f32 %v661_v1, %v507_v23  ;;  %v513_v37 = vadd.f32 %v663_v43, %v512_v15 }
  0xdc   :  { %459 = vst [vmem:[%s1438_s5] sm:$0xf] %v458_v61  ;;  %644 = vst [vmem:[%s1438_s5 + $0x4] sm:$0xf] %v463_v25 }
  0xdd   :  { %646 = vst [vmem:[%s1438_s5 + $0x8] sm:$0xf] %v468_v36  ;;  %648 = vst [vmem:[%s1438_s5 + $0xc] sm:$0xf] %v473_v29 }
  0xde   :  { %658 = vst [vmem:[%s1438_s5 + $0x20] sm:$0xf] %v498_v40  ;;  %660 = vst [vmem:[%s1438_s5 + $0x24] sm:$0xf] %v503_v42  ;;  %v733_v45 = vpop.eup %732 }
  0xdf   :  { %662 = vst [vmem:[%s1438_s5 + $0x28] sm:$0xf] %v508_v35  ;;  %664 = vst [vmem:[%s1438_s5 + $0x2c] sm:$0xf] %v513_v37  ;;  %v340_v38 = vmul.f32 %v733_v45, %v723_v6  ;;  %v341_v31 = vmul.f32 %v733_v45, %v725_v33  ;;  %v342_v28 = vmul.f32 %v733_v45, %v727_v12 }
  0xe0   :  { %v343_v34 = vmul.f32 %v733_v45, %v729_v20 }
  0xe1   :  { %v477_v63 = vmul.f32 %v340_v38, %v340_v38  ;;  %v482_v57 = vmul.f32 %v341_v31, %v341_v31  ;;  %v487_v59 = vmul.f32 %v342_v28, %v342_v28  ;;  %v517_v9 = vmul.f32 %v1133_v52, %v340_v38 }
  0xe2   :  { %v492_v47 = vmul.f32 %v343_v34, %v343_v34  ;;  %v522_v60 = vmul.f32 %v1135_v41, %v341_v31  ;;  %v527_v10 = vmul.f32 %v1137_v18, %v342_v28  ;;  %v532_v11 = vmul.f32 %v1139_v26, %v343_v34 }
  0xe3   :  { %v478_v54 = vadd.f32 %v649_v46, %v477_v63  ;;  %v483_v21 = vadd.f32 %v651_v58, %v482_v57  ;;  %v488_v17 = vadd.f32 %v653_v49, %v487_v59  ;;  %v518_v33 = vadd.f32 %v665_v55, %v517_v9 }
  0xe4   :  { %v493_v6 = vadd.f32 %v655_v53, %v492_v47  ;;  %v523_v7 = vadd.f32 %v667_v44, %v522_v60  ;;  %v528_v12 = vadd.f32 %v669_v48, %v527_v10  ;;  %v533_v62 = vadd.f32 %v671_v0, %v532_v11 }
  0xe5   :  { %650 = vst [vmem:[%s1438_s5 + $0x10] sm:$0xf] %v478_v54  ;;  %652 = vst [vmem:[%s1438_s5 + $0x14] sm:$0xf] %v483_v21 }
  0xe6   :  { %654 = vst [vmem:[%s1438_s5 + $0x18] sm:$0xf] %v488_v17  ;;  %656 = vst [vmem:[%s1438_s5 + $0x1c] sm:$0xf] %v493_v6 }
  0xe7   :  { %666 = vst [vmem:[%s1438_s5 + $0x30] sm:$0xf] %v518_v33  ;;  %668 = vst [vmem:[%s1438_s5 + $0x34] sm:$0xf] %v523_v7 }
  0xe8   :  { %670 = vst [vmem:[%s1438_s5 + $0x38] sm:$0xf] %v528_v12  ;;  %672 = vst [vmem:[%s1438_s5 + $0x3c] sm:$0xf] %v533_v62 }
  0xe9   :  { %579 = vsyncpa [#allocation3], 1 }
  0xea   :  { %580 = vsyncpa [#allocation5], 1 }

// kernel: vat2d_v2_forward.4
= control target key start
LH: loop header
LB: loop body
LE: loop exit
PB: predicated region body
PF: predicated region fallthrough
CT: control target
= control target key end

     0   :  { %12 = vsyncpa [#allocation3], 0  ;;  %s1368_s0 = inlined_call_operand.vmem [shape: f32[4,4,128], index: 0, kind: input, shape index: {}]   ;;  %s1369_s1 = inlined_call_operand.vmem [shape: f32[4,4,128], index: 1, kind: input, shape index: {}]   ;;  %s1370_s2 = inlined_call_operand.vmem [shape: f32[4,1], index: 2, kind: input, shape index: {}]   ;;  %s1371_s3 = inlined_call_operand.vmem [shape: f32[32], index: 3, kind: input, shape index: {}]   ;;  %s1372_s4 = inlined_call_operand.vmem [shape: f32[8], index: 4, kind: input, shape index: {}]   ;;  %s1373_s5 = inlined_call_operand.vmem [shape: f32[8], index: 5, kind: input, shape index: {}]   ;;  %s1374_s6 = inlined_call_operand.vmem [shape: f32[8], index: 6, kind: input, shape index: {}]   ;;  %s1375_s7 = inlined_call_operand.vmem [shape: f32[4,4,128], index: 7, kind: output, shape index: {}]  }
   0x1   :  { %13 = vsyncpa [#allocation5], 0  ;;  %s37_s26 = sshll.u32 %s1372_s4, 4  ;;  %s38_s26 = int_to_ptr.vmem [resolvable:$true] %s37_s26 }
   0x2   :  { %14 = vsyncpa [#allocation8], 0  ;;  %s27_s29 = sshll.u32 %s1371_s3, 4  ;;  %s741_s30 = scalar_lea.vmem %s38_s26, 16  ;;  %s28_s29 = int_to_ptr.vmem [resolvable:$true] %s27_s29 }
   0x3   :  { %p742_p0 = scmp.ne.s32.totalorder %s38_s26, %s741_s30  ;;  %p746_p1 = scmp.lt.s32.totalorder %s38_s26, %s38_s26 }
   0x4   :  { %p747_p2 = scmp.lt.s32.totalorder %s741_s30, %s741_s30 }
   0x6   :  { %p748_p3 = por %p747_p2, %p746_p1 }
   0x8   :  { %p749_p4 = pnand %p748_p3, %p742_p0 }
   0xa   :  { %752 = shalt.err (!%p749_p4)
}
   0xb   :  { %s795_s8 = smov [#allocation4]   ;;  %s753_s9 = scalar_lea.vmem %s28_s29, 16 }
   0xc   :  { %40 = dma.vmem_to_smem %s38_s26, 16, %s795_s8, [#allocation5]  }
   0xd   :  { %p754_p5 = scmp.ne.s32.totalorder %s28_s29, %s753_s9  ;;  %p758_p6 = scmp.lt.s32.totalorder %s28_s29, %s28_s29 }
   0xe   :  { %p759_p7 = scmp.lt.s32.totalorder %s753_s9, %s753_s9 }
  0x10   :  { %p760_p8 = por %p759_p7, %p758_p6 }
  0x12   :  { %p761_p9 = pnand %p760_p8, %p754_p5 }
  0x14   :  { %764 = shalt.err (!%p761_p9)
}
  0x15   :  { %s796_s4 = smov [#allocation2]   ;;  %s47_s11 = sshll.u32 %s1373_s5, 4  ;;  %s48_s11 = int_to_ptr.vmem [resolvable:$true] %s47_s11 }
  0x16   :  { %30 = dma.vmem_to_smem %s28_s29, 16, %s796_s4, [#allocation3]  }
  0x17   :  { %s57_s14 = sshll.u32 %s1374_s6, 4  ;;  %s765_s15 = scalar_lea.vmem %s48_s11, 16  ;;  %s58_s14 = int_to_ptr.vmem [resolvable:$true] %s57_s14 }
  0x18   :  { %p766_p10 = scmp.ne.s32.totalorder %s48_s11, %s765_s15  ;;  %p770_p11 = scmp.lt.s32.totalorder %s48_s11, %s48_s11 }
  0x19   :  { %p771_p12 = scmp.lt.s32.totalorder %s765_s15, %s765_s15 }
  0x1b   :  { %p772_p13 = por %p771_p12, %p770_p11 }
  0x1d   :  { %p773_p0 = pnand %p772_p13, %p766_p10 }
  0x1f   :  { %776 = shalt.err (!%p773_p0)
}
  0x20   :  { %s797_s16 = smov [#allocation6]   ;;  %s777_s17 = scalar_lea.vmem %s58_s14, 16 }
  0x21   :  { %50 = dma.vmem_to_smem %s48_s11, 16, %s797_s16, [#allocation5]  }
  0x22   :  { %p778_p1 = scmp.ne.s32.totalorder %s58_s14, %s777_s17  ;;  %p782_p2 = scmp.lt.s32.totalorder %s58_s14, %s58_s14 }
  0x23   :  { %p783_p3 = scmp.lt.s32.totalorder %s777_s17, %s777_s17 }
  0x25   :  { %p784_p4 = por %p783_p3, %p782_p2 }
  0x27   :  { %p785_p5 = pnand %p784_p4, %p778_p1 }
  0x29   :  { %788 = shalt.err (!%p785_p5)
}
  0x2a   :  { %s798_s5 = smov [#allocation7]  }
  0x2b   :  { %60 = dma.vmem_to_smem %s58_s14, 16, %s798_s5, [#allocation8]  }
  0x2c   :  { %789 = dma.done.wait [#allocation3], 16  }
  0x2d   :  { %790 = vsyncadd [#allocation3], 4294967280 }
  0x2e   :  { %791 = dma.done.wait [#allocation5], 32  }
  0x2f   :  { %792 = vsyncadd [#allocation5], 4294967264 }
  0x30   :  { %793 = dma.done.wait [#allocation8], 16  }
  0x31   :  { %794 = vsyncadd [#allocation8], 4294967280 }
  0x32   :  { %73 = sfence }
  0x33   :  { %v74_v0 = vld [vmem:[%s1370_s2] sm:$0xf]  ;;  %v799_v1 = vmov 0   ;;  %s102_s19 = sld [smem:[#allocation2]]  ;;  %v889_v5 = vld [vmem:[%s1368_s0 + $0x4] sm:$0xf] }
  0x34   :  { %700 = vset.pattern.permute.xlu0 %v799_v1  ;;  %s616_s20 = sld [smem:[#allocation2 + $0x1]]  ;;  %v884_v4 = vld [vmem:[%s1368_s0] sm:$0xf]  ;;  %v914_v12 = vld [vmem:[%s1368_s0 + $0x8] sm:$0xf] }
  0x35   :  { %85 = vperm.xlu0 %700, %v74_v0   ;;  %s855_s21 = sld [smem:[#allocation2 + $0x2]]  ;;  %v962_v30 = vld [vmem:[%s1368_s0 + $0xc] sm:$0xf] }
  0x36   :  { %s857_s22 = sld [smem:[#allocation2 + $0x3]] }
  0x37   :  { %s859_s23 = sld [smem:[#allocation4]] }
  0x38   :  { %s619_s24 = sld [smem:[#allocation2 + $0x4]] }
  0x39   :  { %s620_s25 = sld [smem:[#allocation2 + $0x5]]  ;;  %v875_v2 = vstv %s102_s19 }
  0x3a   :  { %s861_s26 = sld [smem:[#allocation2 + $0x6]]  ;;  %v877_v3 = vstv %s616_s20  ;;  %v292_v8 = vmul.f32 %v875_v2, %v884_v4 }
  0x3b   :  { %s863_s27 = sld [smem:[#allocation2 + $0x7]]  ;;  %v293_v9 = vmul.f32 %v889_v5, %v877_v3  ;;  %v917_v13 = vstv %s855_s21 }
  0x3c   :  { %s865_s28 = sld [smem:[#allocation4 + $0x1]]  ;;  %v295_v17 = vmul.f32 %v914_v12, %v917_v13  ;;  %v930_v18 = vstv %s857_s22 }
  0x3d   :  { %s867_s2 = sld [smem:[#allocation2 + $0x8]]  ;;  %v294_v16 = vadd.f32 %v293_v9, %v292_v8  ;;  %v1383_v22 = vstv %s859_s23  ;;  %v297_v35 = vmul.f32 %v962_v30, %v930_v18 }
  0x3e   :  { %s869_s29 = sld [smem:[#allocation2 + $0x9]]  ;;  %v891_v6 = vstv %s619_s24 }
  0x3f   :  { %s871_s30 = sld [smem:[#allocation2 + $0xa]]  ;;  %v893_v7 = vstv %s620_s25  ;;  %v300_v10 = vmul.f32 %v891_v6, %v884_v4  ;;  %v296_v32 = vadd.f32 %v295_v17, %v294_v16 }
  0x40   :  { %s873_s8 = sld [smem:[#allocation2 + $0xb]]  ;;  %v301_v11 = vmul.f32 %v889_v5, %v893_v7  ;;  %v933_v19 = vstv %s861_s26 }
  0x41   :  { %s634_s9 = sld [smem:[#allocation2 + $0x10]]  ;;  %v943_v23 = vstv %s863_s27  ;;  %v303_v25 = vmul.f32 %v914_v12, %v933_v19 }
  0x42   :  { %s635_s4 = sld [smem:[#allocation2 + $0x11]]  ;;  %v302_v24 = vadd.f32 %v301_v11, %v300_v10  ;;  %v1382_v26 = vstv %s865_s28  ;;  %v305_v36 = vmul.f32 %v962_v30, %v943_v23 }
  0x43   :  { %s639_s3 = sld [smem:[#allocation2 + $0x14]]  ;;  %v951_v27 = vstv %s867_s2 }
  0x44   :  { %s640_s10 = sld [smem:[#allocation2 + $0x15]]  ;;  %v965_v31 = vstv %s869_s29  ;;  %v308_v37 = vmul.f32 %v951_v27, %v884_v4  ;;  %v304_v42 = vadd.f32 %v303_v25, %v302_v24  ;;  %v298_v24 = vadd.f32 %v297_v35, %v296_v32 }
  0x45   :  { %s879_s11 = sld [smem:[#allocation2 + $0xc]]  ;;  %v309_v38 = vmul.f32 %v889_v5, %v965_v31  ;;  %v984_v39 = vstv %s871_s30 }
  0x46   :  { %s895_s16 = sld [smem:[#allocation2 + $0xd]]  ;;  %v987_v40 = vstv %s873_s8  ;;  %v311_v44 = vmul.f32 %v914_v12, %v984_v39  ;;  %v306_v25 = vadd.f32 %v305_v36, %v304_v42 }
  0x47   :  { %s897_s17 = sld [smem:[#allocation2 + $0x12]]  ;;  %v921_v14 = vstv %s634_s9  ;;  %1396 = vst [vmem:[#allocation12_spill] sm:$0xff] %v987_v40  ;;  %v310_v52 = vadd.f32 %v309_v38, %v308_v37 }
  0x48   :  { %s903_s5 = sld [smem:[#allocation2 + $0x13]]  ;;  %v923_v15 = vstv %s635_s4  ;;  %v347_v28 = vmul.f32 %v921_v14, %v884_v4 }
  0x49   :  { %s905_s6 = sld [smem:[#allocation2 + $0x16]]  ;;  %v935_v20 = vstv %s639_s3  ;;  %v348_v29 = vmul.f32 %v889_v5, %v923_v15 }
  0x4a   :  { %s919_s20 = sld [smem:[#allocation2 + $0x18]]  ;;  %v937_v21 = vstv %s640_s10  ;;  %v355_v33 = vmul.f32 %v935_v20, %v884_v4 }
  0x4b   :  { %s925_s24 = sld [smem:[#allocation2 + $0x19]]  ;;  %v356_v34 = vmul.f32 %v889_v5, %v937_v21  ;;  %v349_v45 = vadd.f32 %v348_v29, %v347_v28  ;;  %v1014_v51 = vstv %s879_s11  ;;  %v313_v28 = vmul.f32 %v962_v30, %v987_v40 }
  0x4c   :  { %s939_s21 = sld [smem:[#allocation2 + $0x17]]  ;;  %v1023_v55 = vstv %s895_s16  ;;  %v316_v58 = vmul.f32 %v1014_v51, %v884_v4 }
  0x4d   :  { %s945_s25 = sld [smem:[#allocation2 + $0x1a]]  ;;  %v990_v41 = vstv %s897_s17  ;;  %v357_v49 = vadd.f32 %v356_v34, %v355_v33  ;;  %v317_v59 = vmul.f32 %v889_v5, %v1023_v55  ;;  %v312_v33 = vadd.f32 %v311_v44, %v310_v52 }
  0x4e   :  { %s953_s22 = sld [smem:[#allocation2 + $0x1c]]  ;;  %v350_v46 = vmul.f32 %v914_v12, %v990_v41  ;;  %v1026_v56 = vstv %s903_s5  ;;  %v299_v52 = vadd.f32 %v298_v24, %v1383_v22 }
  0x4f   :  { %s967_s2 = sld [smem:[#allocation2 + $0x1d]]  ;;  %v995_v43 = vstv %s905_s6  ;;  %1399 = vst [vmem:[#allocation15_spill] sm:$0xff] %v1026_v56  ;;  %v352_v61 = vmul.f32 %v962_v30, %v1026_v56  ;;  %v318_v34 = vadd.f32 %v317_v59, %v316_v58 }
  0x50   :  { %s973_s9 = sld [smem:[#allocation2 + $0xe]]  ;;  %1397 = vst [vmem:[#allocation13_spill] sm:$0xff] %v995_v43  ;;  %v1004_v47 = vstv %s919_s20  ;;  %v358_v50 = vmul.f32 %v914_v12, %v995_v43  ;;  %v351_v60 = vadd.f32 %v350_v46, %v349_v45 }
  0x51   :  { %s992_s0 = sld [smem:[#allocation4 + $0x4]]  ;;  %v1007_v48 = vstv %s925_s24  ;;  %v363_v53 = vmul.f32 %v1004_v47, %v884_v4 }
  0x52   :  { %s997_s29 = sld [smem:[#allocation2 + $0x1b]]  ;;  %1398 = vst [vmem:[#allocation14_spill] sm:$0xff] %v1007_v48  ;;  %v364_v54 = vmul.f32 %v889_v5, %v1007_v48  ;;  %v1029_v57 = vstv %s939_s21  ;;  %v359_v8 = vadd.f32 %v358_v50, %v357_v49  ;;  %v353_v35 = vadd.f32 %v352_v61, %v351_v60 }
  0x53   :  { %s1009_s30 = sld [smem:[#allocation2 + $0x1e]]  ;;  %1400 = vst [vmem:[#allocation16_spill] sm:$0xff] %v1029_v57  ;;  %v360_v62 = vmul.f32 %v962_v30, %v1029_v57  ;;  %v1042_v63 = vstv %s945_s25 }
  0x54   :  { %s1016_s8 = sld [smem:[#allocation2 + $0xf]]  ;;  %1401 = vst [vmem:[#allocation17_spill] sm:$0xff] %v1042_v63  ;;  %v1045_v0 = vstv %s953_s22  ;;  %v365_v9 = vadd.f32 %v364_v54, %v363_v53  ;;  %v366_v10 = vmul.f32 %v914_v12, %v1042_v63  ;;  %v307_v53 = vadd.f32 %v306_v25, %v1382_v26 }
  0x55   :  { %s1031_s4 = sld [smem:[#allocation4 + $0x5]]  ;;  %1402 = vst [vmem:[#allocation18_spill] sm:$0xff] %v1045_v0  ;;  %v1048_v1 = vstv %s967_s2  ;;  %v371_v11 = vmul.f32 %v1045_v0, %v884_v4  ;;  %v361_v36 = vadd.f32 %v360_v62, %v359_v8  ;;  %v314_v54 = vadd.f32 %v313_v28, %v312_v33 }
  0x56   :  { %1403 = vst [vmem:[#allocation19_spill] sm:$0xff] %v1048_v1  ;;  %s1050_s3 = sld [smem:[#allocation2 + $0x1f]]  ;;  %v372_v16 = vmul.f32 %v889_v5, %v1048_v1  ;;  %v1061_v17 = vstv %s973_s9  ;;  %v367_v42 = vadd.f32 %v366_v10, %v365_v9  ;;  %v324_v25 = vmax.f32 %v299_v52, %v307_v53 }
  0x57   :  { %s1058_s10 = sld [smem:[#allocation4 + $0x2]]  ;;  %v1379_v29 = vstv %s992_s0  ;;  %v319_v37 = vmul.f32 %v914_v12, %v1061_v17 }
  0x58   :  { %v1069_v38 = vstv %s997_s29  ;;  %s1071_s11 = sld [smem:[#allocation4 + $0x6]]  ;;  %v373_v45 = vadd.f32 %v372_v16, %v371_v11  ;;  %v354_v61 = vadd.f32 %v353_v35, %v1379_v29 }
  0x59   :  { %1404 = vst [vmem:[#allocation20_spill] sm:$0xff] %v1069_v38  ;;  %v1074_v32 = vstv %s1009_s30  ;;  %v368_v44 = vmul.f32 %v962_v30, %v1069_v38  ;;  %s1083_s12 = sld [smem:[#allocation4 + $0x3]]  ;;  %v320_v58 = vadd.f32 %v319_v37, %v318_v34 }
  0x5a   :  { %1405 = vst [vmem:[#allocation21_spill] sm:$0xff] %v1074_v32  ;;  %v374_v46 = vmul.f32 %v914_v12, %v1074_v32  ;;  %v1081_v49 = vstv %s1016_s8  ;;  %s1095_s13 = sld [smem:[#allocation4 + $0x7]] }
  0x5b   :  { %1406 = vst [vmem:[#allocation22_spill] sm:$0xff] %v1081_v49  ;;  %v1376_v50 = vstv %s1031_s4  ;;  %v321_v59 = vmul.f32 %v962_v30, %v1081_v49  ;;  %v369_v8 = vadd.f32 %v368_v44, %v367_v42  ;;  %s1261_s20 = sld [smem:[#allocation6 + $0x1]] }
  0x5c   :  { %v1093_v60 = vstv %s1050_s3  ;;  %v362_v62 = vadd.f32 %v361_v36, %v1376_v50  ;;  %v375_v9 = vadd.f32 %v374_v46, %v373_v45  ;;  %s1265_s24 = sld [smem:[#allocation6 + $0x2]] }
  0x5d   :  { %1407 = vst [vmem:[#allocation23_spill] sm:$0xff] %v1093_v60  ;;  %v376_v10 = vmul.f32 %v962_v30, %v1093_v60  ;;  %v1381_v11 = vstv %s1058_s10  ;;  %v322_v24 = vadd.f32 %v321_v59, %v320_v58  ;;  %s1269_s21 = sld [smem:[#allocation7 + $0x2]] }
  0x5e   :  { %v1106_v16 = vadd.f32 %v314_v54, %v1381_v11  ;;  %v1378_v28 = vstv %s1071_s11  ;;  %v379_v37 = vmax.f32 %v354_v61, %v362_v62  ;;  %s1273_s25 = sld [smem:[#allocation6 + $0x3]] }
  0x5f   :  { %v370_v33 = vadd.f32 %v369_v8, %v1378_v28  ;;  %v377_v34 = vadd.f32 %v376_v10, %v375_v9  ;;  %v1380_v35 = vstv %s1083_s12  ;;  %v82_v9 = vld [vmem:[%s1369_s1] sm:$0xf]  ;;  %v613_v10 = vld [vmem:[%s1369_s1 + $0x4] sm:$0xf]  ;;  %s1276_s22 = sld [smem:[#allocation7 + $0x3]] }
  0x60   :  { %v1114_v36 = vadd.f32 %v322_v24, %v1380_v35  ;;  %v325_v42 = vmax.f32 %v324_v25, %v1106_v16  ;;  %v1377_v44 = vstv %s1095_s13  ;;  %v614_v24 = vld [vmem:[%s1369_s1 + $0x8] sm:$0xf]  ;;  %v615_v25 = vld [vmem:[%s1369_s1 + $0xc] sm:$0xf]  ;;  %s1253_s1 = sld [smem:[#allocation7]] }
  0x61   :  { %v378_v45 = vadd.f32 %v377_v34, %v1377_v44  ;;  %v380_v46 = vmax.f32 %v379_v37, %v370_v33  ;;  %s1280_s26 = sld [smem:[#allocation7 + $0x4]] }
  0x62   :  { %v1121_v54 = vmax.f32 %v325_v42, %v1114_v36  ;;  %s1283_s27 = sld [smem:[#allocation7 + $0x5]] }
  0x63   :  { %v381_v58 = vmax.f32 %v380_v46, %v378_v45  ;;  %s1285_s2 = sld [smem:[#allocation7 + $0x6]] }
  0x64   :  { %v327_v59 = vsub.f32 %v299_v52, %v1121_v54  ;;  %v330_v52 = vsub.f32 %v307_v53, %v1121_v54  ;;  %s1290_s9 = sld [smem:[#allocation6 + $0x4]] }
  0x65   :  { %v382_v50 = vsub.f32 %v354_v61, %v381_v58  ;;  %v385_v8 = vsub.f32 %v362_v62, %v381_v58  ;;  %v388_v42 = vsub.f32 %v370_v33, %v381_v58  ;;  %v391_v46 = vsub.f32 %v378_v45, %v381_v58  ;;  %s1297_s29 = sld [smem:[#allocation6 + $0x6]] }
  0x66   :  { %v328_v34 = vmul.f32 1.442695, %v327_v59  ;;  %v1151_v45 = vmul.f32 1.442695, %v330_v52  ;;  %s1302_s30 = sld [smem:[#allocation7 + $0x7]] }
  0x67   :  { %v383_v62 = vmul.f32 1.442695, %v382_v50  ;;  %v386_v37 = vmul.f32 1.442695, %v385_v8  ;;  %v389_v58 = vmul.f32 1.442695, %v388_v42 }
  0x68   :  { %701 = vpow2.f32 %v328_v34  ;;  %v392_v8 = vmul.f32 1.442695, %v391_v46  ;;  %s1306_s8 = sld [smem:[#allocation6 + $0x7]] }
  0x69   :  { %703 = vpow2.f32 %v383_v62 }
  0x6a   :  { %705 = vpow2.f32 %v386_v37 }
  0x6b   :  { %707 = vpow2.f32 %v389_v58  ;;  %v1410_v58 = vstv %s1058_s10 }
  0x6c   :  { %709 = vpow2.f32 %v392_v8 }
  0x6d   :  { %711 = vpow2.f32 %v1151_v45 }
  0xb0   :  { %v86_v61 = vpop.permute.xlu0 %85 }
  0xb1   :  { %v88_v44 = vmul.f32 %v86_v61, %v82_v9  ;;  %v92_v28 = vmul.f32 %v613_v10, %v86_v61  ;;  %v96_v29 = vmul.f32 %v614_v24, %v86_v61  ;;  %v100_v35 = vmul.f32 %v615_v25, %v86_v61 }
  0xb3   :  { %v89_v59 = vadd.f32 %v88_v44, %v884_v4  ;;  %v1143_v53 = vadd.f32 %v889_v5, %v92_v28  ;;  %v1146_v50 = vadd.f32 %v914_v12, %v96_v29  ;;  %v1149_v33 = vadd.f32 %v962_v30, %v100_v35 }
  0xb5   :  { %v104_v9 = vmul.f32 %v875_v2, %v89_v59  ;;  %v107_v10 = vmul.f32 %v877_v3, %v1143_v53  ;;  %v111_v4 = vmul.f32 %v917_v13, %v1146_v50  ;;  %v115_v5 = vmul.f32 %v930_v18, %v1149_v33 }
  0xb6   :  { %v122_v12 = vmul.f32 %v891_v6, %v89_v59  ;;  %v125_v30 = vmul.f32 %v893_v7, %v1143_v53  ;;  %v129_v29 = vmul.f32 %v933_v19, %v1146_v50  ;;  %v133_v35 = vmul.f32 %v943_v23, %v1149_v33 }
  0xb7   :  { %v108_v28 = vadd.f32 %v107_v10, %v104_v9  ;;  %v140_v44 = vmul.f32 %v951_v27, %v89_v59  ;;  %v143_v24 = vmul.f32 %v965_v31, %v1143_v53  ;;  %v147_v34 = vmul.f32 %v984_v39, %v1146_v50 }
  0xb8   :  { %v126_v25 = vadd.f32 %v125_v30, %v122_v12  ;;  %v158_v52 = vmul.f32 %v1014_v51, %v89_v59  ;;  %v161_v61 = vmul.f32 %v1023_v55, %v1143_v53  ;;  %v151_v42 = vmul.f32 %v987_v40, %v1149_v33 }
  0xb9   :  { %v112_v62 = vadd.f32 %v111_v4, %v108_v28  ;;  %v144_v37 = vadd.f32 %v143_v24, %v140_v44  ;;  %v165_v46 = vmul.f32 %v1061_v17, %v1146_v50  ;;  %v199_v12 = vmul.f32 %v921_v14, %v89_v59 }
  0xba   :  { %v130_v9 = vadd.f32 %v129_v29, %v126_v25  ;;  %v162_v10 = vadd.f32 %v161_v61, %v158_v52  ;;  %v202_v30 = vmul.f32 %v923_v15, %v1143_v53  ;;  %v169_v4 = vmul.f32 %v1081_v49, %v1149_v33 }
  0xbb   :  { %v116_v26 = vadd.f32 %v115_v5, %v112_v62  ;;  %v148_v11 = vadd.f32 %v147_v34, %v144_v37  ;;  %v206_v28 = vmul.f32 %v990_v41, %v1146_v50  ;;  %v217_v29 = vmul.f32 %v935_v20, %v89_v59 }
  0xbc   :  { %v134_v44 = vadd.f32 %v133_v35, %v130_v9  ;;  %v166_v24 = vadd.f32 %v165_v46, %v162_v10  ;;  %v203_v22 = vadd.f32 %v202_v30, %v199_v12  ;;  %v1408_v25 = vstv %s859_s23  ;;  %v1195_v35 = vpop.eup %701  ;;  %s1255_s23 = sld [smem:[#allocation7 + $0x1]] }
  0xbd   :  { %v119_v52 = vadd.f32 %v1408_v25, %v116_v26  ;;  %v152_v61 = vadd.f32 %v151_v42, %v148_v11  ;;  %v220_v40 = vmul.f32 %v937_v21, %v1143_v53  ;;  %v1409_v5 = vstv %s865_s28  ;;  %v1206_v30 = vpop.eup %703  ;;  %s1257_s28 = sld [smem:[#allocation6]] }
  0xbe   :  { %v137_v34 = vadd.f32 %v1409_v5, %v134_v44  ;;  %v170_v62 = vadd.f32 %v169_v4, %v166_v24  ;;  %v207_v37 = vadd.f32 %v206_v28, %v203_v22  ;;  %v210_v49 = vmul.f32 %v1026_v56, %v1149_v33  ;;  %v1211_v24 = vpop.eup %705 }
  0xbf   :  { %v221_v46 = vadd.f32 %v220_v40, %v217_v29  ;;  %v224_v9 = vmul.f32 %v995_v43, %v1146_v50  ;;  %v235_v26 = vmul.f32 %v1004_v47, %v89_v59  ;;  %v238_v11 = vmul.f32 %v1007_v48, %v1143_v53 }
  0xc0   :  { %v155_v42 = vadd.f32 %v1410_v58, %v152_v61  ;;  %v174_v10 = vmax.f32 %v119_v52, %v137_v34  ;;  %v211_v22 = vadd.f32 %v210_v49, %v207_v37  ;;  %v228_v12 = vmul.f32 %v1029_v57, %v1149_v33 }
  0xc1   :  { %v225_v4 = vadd.f32 %v224_v9, %v221_v46  ;;  %v239_v40 = vadd.f32 %v238_v11, %v235_v26  ;;  %v242_v28 = vmul.f32 %v1042_v63, %v1146_v50  ;;  %v253_v44 = vmul.f32 %v1045_v0, %v89_v59 }
  0xc2   :  { %v1411_v29 = vstv %s1083_s12  ;;  %v175_v61 = vmax.f32 %v174_v10, %v155_v42  ;;  %v256_v49 = vmul.f32 %v1048_v1, %v1143_v53  ;;  %v1412_v5 = vstv %s992_s0  ;;  %s1295_s0 = sld [smem:[#allocation6 + $0x5]] }
  0xc3   :  { %v173_v25 = vadd.f32 %v1411_v29, %v170_v62  ;;  %v214_v37 = vadd.f32 %v1412_v5, %v211_v22  ;;  %v229_v46 = vadd.f32 %v228_v12, %v225_v4  ;;  %v243_v9 = vadd.f32 %v242_v28, %v239_v40 }
  0xc4   :  { %v246_v26 = vmul.f32 %v1069_v38, %v1149_v33  ;;  %v257_v58 = vadd.f32 %v256_v49, %v253_v44  ;;  %v1413_v59 = vsub.f32 %v1106_v16, %v1121_v54  ;;  %v1414_v10 = vstv %s1031_s4 }
  0xc5   :  { %v176_v11 = vmax.f32 %v175_v61, %v173_v25  ;;  %v232_v29 = vadd.f32 %v1414_v10, %v229_v46  ;;  %v260_v8 = vmul.f32 %v1074_v32, %v1146_v50  ;;  %v264_v40 = vmul.f32 %v1093_v60, %v1149_v33 }
  0xc6   :  { %v334_v62 = vmul.f32 1.442695, %v1413_v59  ;;  %v247_v53 = vadd.f32 %v246_v26, %v243_v9  ;;  %v1415_v44 = vstv %s1071_s11  ;;  %v1416_v46 = vsub.f32 %v1114_v36, %v1121_v54 }
  0xc7   :  { %v177_v22 = vsub.f32 %v119_v52, %v176_v11  ;;  %v180_v12 = vsub.f32 %v137_v34, %v176_v11  ;;  %v183_v4 = vsub.f32 %v155_v42, %v176_v11  ;;  %v186_v28 = vsub.f32 %v173_v25, %v176_v11  ;;  %v1236_v42 = vpop.eup %707 }
  0xc8   :  { %v250_v45 = vadd.f32 %v1415_v44, %v247_v53  ;;  %v261_v61 = vadd.f32 %v260_v8, %v257_v58  ;;  %v269_v49 = vmax.f32 %v214_v37, %v232_v29  ;;  %713 = vpow2.f32 %v334_v62  ;;  %v710_v36 = vpop.eup %709 }
  0xc9   :  { %v178_v16 = vmul.f32 1.442695, %v177_v22  ;;  %v181_v5 = vmul.f32 1.442695, %v180_v12  ;;  %v337_v9 = vmul.f32 1.442695, %v1416_v46  ;;  %v394_v33 = vadd.f32 %v1211_v24, %v1206_v30  ;;  %v1243_v8 = vpop.eup %711 }
  0xca   :  { %v184_v50 = vmul.f32 1.442695, %v183_v4  ;;  %v265_v52 = vadd.f32 %v264_v40, %v261_v61  ;;  %v270_v34 = vmax.f32 %v269_v49, %v250_v45  ;;  %v187_v25 = vmul.f32 1.442695, %v186_v28 }
  0xcb   :  { %715 = vpow2.f32 %v178_v16  ;;  %v1417_v26 = vstv %s1095_s13  ;;  %v395_v59 = vadd.f32 %v1236_v42, %v394_v33  ;;  %v339_v44 = vadd.f32 %v1243_v8, %v1195_v35 }
  0xcc   :  { %717 = vpow2.f32 %v181_v5  ;;  %v268_v11 = vadd.f32 %v1417_v26, %v265_v52 }
  0xcd   :  { %719 = vpow2.f32 %v337_v9  ;;  %v396_v40 = vadd.f32 %v710_v36, %v395_v59 }
  0xce   :  { %721 = vpow2.f32 %v184_v50  ;;  %v271_v58 = vmax.f32 %v270_v34, %v268_v11 }
  0xcf   :  { %723 = vpow2.f32 %v187_v25 }
  0xd0   :  { %v272_v54 = vsub.f32 %v214_v37, %v271_v58  ;;  %v275_v62 = vsub.f32 %v232_v29, %v271_v58  ;;  %v278_v10 = vsub.f32 %v250_v45, %v271_v58  ;;  %v281_v53 = vsub.f32 %v268_v11, %v271_v58 }
  0xd2   :  { %v273_v22 = vmul.f32 1.442695, %v272_v54  ;;  %v276_v12 = vmul.f32 1.442695, %v275_v62  ;;  %v279_v4 = vmul.f32 1.442695, %v278_v10 }
  0xd3   :  { %v282_v28 = vmul.f32 1.442695, %v281_v53 }
  0xd4   :  { %725 = vpow2.f32 %v273_v22  ;;  %v427_v22 = vstv %s1257_s28 }
  0xd5   :  { %727 = vpow2.f32 %v276_v12  ;;  %v1247_v61 = vpop.eup %713  ;;  %v431_v12 = vstv %s1261_s20 }
  0xd6   :  { %729 = vpow2.f32 %v279_v4  ;;  %v340_v29 = vadd.f32 %v1247_v61, %v339_v44  ;;  %v435_v4 = vstv %s1265_s24  ;;  %v406_v44 = vstv %s1255_s23 }
  0xd7   :  { %731 = vrcp.f32 %v396_v40 }
  0xd8   :  { %v716_v49 = vpop.eup %715  ;;  %733 = vpow2.f32 %v282_v28  ;;  %v403_v28 = vstv %s1253_s1 }
  0xd9   :  { %v718_v37 = vpop.eup %717 }
  0xda   :  { %v1250_v45 = vpop.eup %719  ;;  %v189_v16 = vadd.f32 %v718_v37, %v716_v49 }
  0xdb   :  { %v722_v5 = vpop.eup %721  ;;  %v341_v50 = vadd.f32 %v1250_v45, %v340_v29  ;;  %v409_v29 = vstv %s1269_s21 }
  0xdc   :  { %v190_v46 = vadd.f32 %v722_v5, %v189_v16  ;;  %v724_v9 = vpop.eup %723 }
  0xde   :  { %v191_v52 = vadd.f32 %v724_v9, %v190_v46 }
  0xe0   :  { %735 = vrcp.f32 %v191_v52 }
  0xe1   :  { %v1259_v34 = vpop.eup %725  ;;  %737 = vrcp.f32 %v341_v50 }
  0xe2   :  { %v1263_v33 = vpop.eup %727 }
  0xe3   :  { %v284_v25 = vadd.f32 %v1263_v33, %v1259_v34  ;;  %v1271_v26 = vpop.eup %729 }
  0xe4   :  { %v732_v11 = vpop.eup %731 }
  0xe5   :  { %v285_v58 = vadd.f32 %v1271_v26, %v284_v25  ;;  %v1278_v59 = vpop.eup %733  ;;  %v398_v62 = vmul.f32 %v732_v11, %v1206_v30  ;;  %v399_v10 = vmul.f32 %v732_v11, %v1211_v24  ;;  %v400_v53 = vmul.f32 %v732_v11, %v1236_v42 }
  0xe6   :  { %v401_v40 = vmul.f32 %v732_v11, %v710_v36  ;;  %v439_v30 = vstv %s1273_s25  ;;  %v412_v24 = vstv %s1276_s22 }
  0xe7   :  { %v286_v54 = vadd.f32 %v1278_v59, %v285_v58  ;;  %v428_v46 = vmul.f32 %v427_v22, %v398_v62  ;;  %v432_v42 = vmul.f32 %v431_v12, %v399_v10  ;;  %v436_v50 = vmul.f32 %v435_v4, %v400_v53 }
  0xe8   :  { %v443_v22 = vstv %s1290_s9  ;;  %v418_v12 = vstv %s1283_s27  ;;  %v447_v4 = vstv %s1295_s0 }
  0xe9   :  { %739 = vrcp.f32 %v286_v54  ;;  %v440_v54 = vmul.f32 %v439_v30, %v401_v40  ;;  %v451_v40 = vstv %s1297_s29 }
  0xed   :  { %v736_v16 = vpop.eup %735 }
  0xee   :  { %v738_v52 = vpop.eup %737  ;;  %v193_v25 = vmul.f32 %v736_v16, %v716_v49  ;;  %v194_v36 = vmul.f32 %v736_v16, %v718_v37  ;;  %v195_v11 = vmul.f32 %v736_v16, %v722_v5  ;;  %v196_v58 = vmul.f32 %v736_v16, %v724_v9 }
  0xef   :  { %v343_v62 = vmul.f32 %v738_v52, %v1195_v35  ;;  %v344_v10 = vmul.f32 %v738_v52, %v1243_v8  ;;  %v345_v49 = vmul.f32 %v738_v52, %v1247_v61  ;;  %v415_v9 = vstv %s1280_s26 }
  0xf0   :  { %v404_v60 = vmul.f32 %v403_v28, %v193_v25  ;;  %v407_v38 = vmul.f32 %v406_v44, %v194_v36  ;;  %v410_v32 = vmul.f32 %v409_v29, %v195_v11  ;;  %v413_v57 = vmul.f32 %v412_v24, %v196_v58 }
  0xf1   :  { %v346_v28 = vmul.f32 %v738_v52, %v1250_v45  ;;  %v421_v35 = vstv %s1285_s2  ;;  %v424_v16 = vstv %s1302_s30  ;;  %v444_v24 = vmul.f32 %v443_v22, %v343_v62 }
  0xf2   :  { %v429_v37 = vadd.f32 %v428_v46, %v404_v60  ;;  %v433_v53 = vadd.f32 %v432_v42, %v407_v38  ;;  %v437_v5 = vadd.f32 %v436_v50, %v410_v32  ;;  %v441_v44 = vadd.f32 %v440_v54, %v413_v57 }
  0xf3   :  { %v455_v8 = vstv %s1306_s8  ;;  %v448_v61 = vmul.f32 %v447_v4, %v344_v10  ;;  %v452_v63 = vmul.f32 %v451_v40, %v345_v49 }
  0xf4   :  { %v458_v29 = vmul.f32 %v429_v37, %v193_v25  ;;  %v459_v30 = vmul.f32 %v433_v53, %v194_v36  ;;  %v461_v38 = vmul.f32 %v437_v5, %v195_v11  ;;  %v456_v57 = vmul.f32 %v455_v8, %v346_v28 }
  0xf5   :  { %v463_v52 = vmul.f32 %v441_v44, %v196_v58 }
  0xf6   :  { %v740_v1 = vpop.eup %739  ;;  %v460_v60 = vadd.f32 %v459_v30, %v458_v29 }
  0xf7   :  { %v288_v32 = vmul.f32 %v740_v1, %v1259_v34  ;;  %v289_v46 = vmul.f32 %v740_v1, %v1263_v33  ;;  %v290_v42 = vmul.f32 %v740_v1, %v1271_v26  ;;  %v291_v45 = vmul.f32 %v740_v1, %v1278_v59 }
  0xf8   :  { %v462_v50 = vadd.f32 %v461_v38, %v460_v60 }
  0xf9   :  { %v416_v54 = vmul.f32 %v415_v9, %v288_v32  ;;  %v419_v0 = vmul.f32 %v418_v12, %v289_v46  ;;  %v422_v62 = vmul.f32 %v421_v35, %v290_v42  ;;  %v425_v22 = vmul.f32 %v424_v16, %v291_v45 }
  0xfa   :  { %v464_v56 = vadd.f32 %v463_v52, %v462_v50 }
  0xfb   :  { %v445_v10 = vadd.f32 %v444_v24, %v416_v54  ;;  %v449_v49 = vadd.f32 %v448_v61, %v419_v0  ;;  %v453_v4 = vadd.f32 %v452_v63, %v422_v62  ;;  %v457_v40 = vadd.f32 %v456_v57, %v425_v22  ;;  %v1418_v22 = vld [vmem:[#allocation12_spill] sm:$0xff] }
  0xfc   :  { %v465_v29 = vsub.f32 %v429_v37, %v464_v56  ;;  %v467_v34 = vsub.f32 %v433_v53, %v464_v56  ;;  %v469_v30 = vsub.f32 %v437_v5, %v464_v56  ;;  %v471_v33 = vsub.f32 %v441_v44, %v464_v56 }
  0xfd   :  { %v473_v48 = vmul.f32 %v445_v10, %v288_v32  ;;  %v474_v26 = vmul.f32 %v449_v49, %v289_v46  ;;  %v476_v8 = vmul.f32 %v453_v4, %v290_v42  ;;  %v478_v9 = vmul.f32 %v457_v40, %v291_v45 }
  0xfe   :  { %v466_v43 = vmul.f32 %v465_v29, %v193_v25  ;;  %v468_v1 = vmul.f32 %v467_v34, %v194_v36  ;;  %v470_v59 = vmul.f32 %v469_v30, %v195_v11  ;;  %v472_v16 = vmul.f32 %v471_v33, %v196_v58  ;;  %v1420_v30 = vld [vmem:[#allocation13_spill] sm:$0xff] }
  0xff   :  { %v475_v28 = vadd.f32 %v474_v26, %v473_v48  ;;  %v1421_v26 = vld [vmem:[#allocation14_spill] sm:$0xff] }
 0x100   :  { %v488_v12 = vmul.f32 %v466_v43, %v875_v2  ;;  %v489_v35 = vmul.f32 %v468_v1, %v891_v6  ;;  %v506_v63 = vmul.f32 %v466_v43, %v877_v3  ;;  %v509_v37 = vmul.f32 %v468_v1, %v893_v7 }
 0x101   :  { %v477_v0 = vadd.f32 %v476_v8, %v475_v28  ;;  %v491_v56 = vmul.f32 %v470_v59, %v951_v27  ;;  %v539_v25 = vmul.f32 %v466_v43, %v917_v13  ;;  %v542_v36 = vmul.f32 %v468_v1, %v933_v19 }
 0x102   :  { %v490_v53 = vadd.f32 %v489_v35, %v488_v12  ;;  %v510_v11 = vadd.f32 %v509_v37, %v506_v63  ;;  %v513_v5 = vmul.f32 %v470_v59, %v965_v31  ;;  %v546_v2 = vmul.f32 %v470_v59, %v984_v39 }
 0x103   :  { %v479_v48 = vadd.f32 %v478_v9, %v477_v0  ;;  %v543_v58 = vadd.f32 %v542_v36, %v539_v25  ;;  %v572_v44 = vmul.f32 %v466_v43, %v930_v18  ;;  %v575_v3 = vmul.f32 %v468_v1, %v943_v23  ;;  %v1427_v25 = vld [vmem:[#allocation21_spill] sm:$0xff] }
 0x104   :  { %v492_v6 = vadd.f32 %v491_v56, %v490_v53  ;;  %v493_v27 = vmul.f32 %v472_v16, %v1014_v51  ;;  %v514_v13 = vadd.f32 %v513_v5, %v510_v11  ;;  %v517_v19 = vmul.f32 %v472_v16, %v1023_v55  ;;  %v1428_v5 = vld [vmem:[#allocation20_spill] sm:$0xff] }
 0x105   :  { %v480_v7 = vsub.f32 %v445_v10, %v479_v48  ;;  %v482_v24 = vsub.f32 %v449_v49, %v479_v48  ;;  %v484_v61 = vsub.f32 %v453_v4, %v479_v48  ;;  %v547_v60 = vadd.f32 %v546_v2, %v543_v58 }
 0x106   :  { %v550_v38 = vmul.f32 %v472_v16, %v1061_v17  ;;  %v486_v39 = vsub.f32 %v457_v40, %v479_v48  ;;  %v494_v50 = vadd.f32 %v493_v27, %v492_v6  ;;  %v518_v52 = vadd.f32 %v517_v19, %v514_v13  ;;  %v1419_v40 = vld [vmem:[#allocation22_spill] sm:$0xff] }
 0x107   :  { %v481_v31 = vmul.f32 %v480_v7, %v288_v32  ;;  %v483_v57 = vmul.f32 %v482_v24, %v289_v46  ;;  %v576_v54 = vadd.f32 %v575_v3, %v572_v44  ;;  %v485_v18 = vmul.f32 %v484_v61, %v290_v42  ;;  %v1429_v44 = vld [vmem:[#allocation23_spill] sm:$0xff] }
 0x108   :  { %v551_v43 = vadd.f32 %v550_v38, %v547_v60  ;;  %v579_v51 = vmul.f32 %v470_v59, %v1418_v22  ;;  %v487_v10 = vmul.f32 %v486_v39, %v291_v45  ;;  %v583_v29 = vmul.f32 %v472_v16, %v1419_v40  ;;  %v1422_v59 = vld [vmem:[#allocation15_spill] sm:$0xff] }
 0x109   :  { %v495_v23 = vmul.f32 %v481_v31, %v921_v14  ;;  %v521_v62 = vmul.f32 %v481_v31, %v923_v15  ;;  %v497_v55 = vmul.f32 %v483_v57, %v935_v20  ;;  %v554_v17 = vmul.f32 %v481_v31, %v990_v41  ;;  %v1423_v41 = vld [vmem:[#allocation18_spill] sm:$0xff]  ;;  %v1425_v16 = vld [vmem:[#allocation19_spill] sm:$0xff] }
 0x10a   :  { %v525_v46 = vmul.f32 %v483_v57, %v937_v21  ;;  %v580_v4 = vadd.f32 %v579_v51, %v576_v54  ;;  %v499_v14 = vmul.f32 %v485_v18, %v1004_v47  ;;  %v558_v15 = vmul.f32 %v483_v57, %v1420_v30  ;;  %v1424_v21 = vld [vmem:[#allocation17_spill] sm:$0xff]  ;;  %v1426_v47 = vld [vmem:[#allocation16_spill] sm:$0xff] }
 0x10b   :  { %v496_v49 = vadd.f32 %v495_v23, %v494_v50  ;;  %v522_v32 = vadd.f32 %v521_v62, %v518_v52  ;;  %v555_v34 = vadd.f32 %v554_v17, %v551_v43  ;;  %v529_v45 = vmul.f32 %v485_v18, %v1421_v26 }
 0x10c   :  { %v584_v1 = vadd.f32 %v583_v29, %v580_v4  ;;  %v587_v20 = vmul.f32 %v481_v31, %v1422_v59  ;;  %v501_v8 = vmul.f32 %v487_v10, %v1423_v41  ;;  %v562_v12 = vmul.f32 %v485_v18, %v1424_v21 }
 0x10d   :  { %v498_v42 = vadd.f32 %v497_v55, %v496_v49  ;;  %v526_v33 = vadd.f32 %v525_v46, %v522_v32  ;;  %v559_v9 = vadd.f32 %v558_v15, %v555_v34  ;;  %v533_v0 = vmul.f32 %v487_v10, %v1425_v16 }
 0x10e   :  { %v588_v63 = vadd.f32 %v587_v20, %v584_v1  ;;  %v591_v37 = vmul.f32 %v483_v57, %v1426_v47  ;;  %v566_v36 = vmul.f32 %v487_v10, %v1427_v25  ;;  %v595_v2 = vmul.f32 %v485_v18, %v1428_v5 }
 0x10f   :  { %v500_v28 = vadd.f32 %v499_v14, %v498_v42  ;;  %v530_v35 = vadd.f32 %v529_v45, %v526_v33  ;;  %v563_v56 = vadd.f32 %v562_v12, %v559_v9  ;;  %v599_v3 = vmul.f32 %v487_v10, %v1429_v44 }
 0x110   :  { %v592_v11 = vadd.f32 %v591_v37, %v588_v63 }
 0x111   :  { %v502_v53 = vadd.f32 %v501_v8, %v500_v28  ;;  %v534_v48 = vadd.f32 %v533_v0, %v530_v35  ;;  %v567_v6 = vadd.f32 %v566_v36, %v563_v56 }
 0x112   :  { %v596_v58 = vadd.f32 %v595_v2, %v592_v11 }
 0x113   :  { %503 = vst [vmem:[%s1375_s7] sm:$0xf] %v502_v53  ;;  %676 = vst [vmem:[%s1375_s7 + $0x4] sm:$0xf] %v534_v48 }
 0x114   :  { %685 = vst [vmem:[%s1375_s7 + $0x8] sm:$0xf] %v567_v6  ;;  %v600_v7 = vadd.f32 %v599_v3, %v596_v58 }
 0x116   :  { %694 = vst [vmem:[%s1375_s7 + $0xc] sm:$0xf] %v600_v7 }
 0x117   :  { %607 = vsyncpa [#allocation3], 1 }
 0x118   :  { %608 = vsyncpa [#allocation5], 1 }
 0x119   :  { %609 = vsyncpa [#allocation8], 1 }

</bundles_post_ra>
